<compile_context>
chip_gen: v7x
topology: tpu7x:2x2x1
jax: 0.10.0
libtpu: 0.0.40
codegen_flags: <defaults>
</compile_context>

<pallas_src>
import functools

import jax
import jax.numpy as jnp
from jax.experimental import pallas as pl
from jax.experimental.pallas import tpu as pltpu


NUM_GCN_LAYERS = 8
GCN_DIMS = [(64 * 4, 128), (128, 64), (64, 64), (64, 32),
            (32, 32), (32, 16), (16, 16), (16, 1)]


# ----------------------------------------------------------------------------
# Fused Pallas kernel: 8x (adj @ (h @ W) + b, relu) -> mask -> FC -> softmax
# ----------------------------------------------------------------------------
def _gcn8_fused_kernel(s1_ref, adj_ref, mask_ref, w_ref, b_ref, fc_ref, o_ref,
                       *, bt, np_, layer_meta):
    """Processes `bt` graphs fully in VMEM.

    s1_ref   : (bt*np_, 128) bf16  -- x @ W1, already folded through embeddings
    adj_ref  : (bt, np_, np_) bf16 -- per-graph (padded) adjacency
    mask_ref : (bt*np_, 1)  f32    -- node mask (zeros on padded rows)
    w_ref    : (R, 128)     bf16   -- W2..W8 packed along sublanes, lane-padded
    b_ref    : (8, 128)     f32    -- b1..b8, one lane-padded row per layer
    fc_ref   : (np_+8, 2)   f32    -- rows [0:np_) fc_w (zero on pad), row np_ fc_b
    o_ref    : (1, bt, 2)   f32    -- softmax probabilities
    """
    n_gcn = len(layer_meta) + 1          # layer 1's weight is folded outside

    # ---- GCN stack -------------------------------------------------------
    # `support` is (x @ W) for the current layer, flattened to (bt*np_, Fout)
    # so the shared weight matmul of the next layer sees M = bt*np_ rows.
    support = s1_ref[...]                                   # (bt*np_, 128) bf16
    h = None
    h8 = None
    for li in range(n_gcn):
        if li > 0:
            r0, fin, fout = layer_meta[li - 1]
            w = w_ref[r0:r0 + fin, 0:fout]                  # static VMEM view
            support = jnp.dot(h, w,
                              preferred_element_type=jnp.float32
                              ).astype(jnp.bfloat16)        # (bt*np_, fout)
        fout = support.shape[-1]

        # Per-graph neighbourhood aggregation adj[b] @ support[b].  The bt
        # chains are independent so the scheduler interleaves their MXU pushes.
        rows = []
        for b in range(bt):
            sb = support[b * np_:(b + 1) * np_, :]          # tile-aligned slice
            rows.append(jnp.dot(adj_ref[b], sb,
                                preferred_element_type=jnp.float32))
        hf = rows[0] if bt == 1 else jnp.concatenate(rows, axis=0)
        hf = hf + b_ref[li:li + 1, 0:fout]                  # bias in f32

        if li < n_gcn - 1:
            # ReLU in f32 (v5e-safe); store the activation in bf16.
            h = jnp.maximum(hf, 0.0).astype(jnp.bfloat16)
            # TODO(synk): F.dropout(p=0.5) is identity in eval mode; training
            # would need pltpu.prng_seed/prng_random_bits masking here.
        else:
            h8 = hf                                         # (bt*np_, 1) f32

    # ---- mask -> FC(132 -> 2) -> softmax ----------------------------------
    feat = h8 * mask_ref[...]                               # (bt*np_, 1) f32
    fcw = fc_ref[0:np_, :]                                  # (np_, 2)
    fcb = fc_ref[np_:np_ + 1, :]                            # (1, 2)
    lrows = []
    for b in range(bt):
        fb = feat[b * np_:(b + 1) * np_, :]                 # (np_, 1)
        lrows.append(jnp.sum(fb * fcw, axis=0, keepdims=True))   # (1, 2)
    logits = (lrows[0] if bt == 1 else jnp.concatenate(lrows, axis=0)) + fcb
    m = jnp.max(logits, axis=-1, keepdims=True)
    e = jnp.exp(logits - m)
    o_ref[0] = (e / jnp.sum(e, axis=-1, keepdims=True)).astype(o_ref.dtype)


def gcn8_fused(s1, adj, mask, w_slab, b_slab, fc_slab, layer_meta, np_pad,
               *, num_steps=None):
    """Single fused pallas_call; one grid step processes `B // num_steps` graphs."""
    B, Np, _ = adj.shape
    assert Np == np_pad
    if num_steps is None:
        # >=2 grid steps keeps both v7x TensorCores busy via "parallel"
        # semantics; on single-TC v5e/v6e pass num_steps=1 to remove the
        # per-step pipeline overhead for small batches.
        num_steps = 2 if (B >= 2 and B % 2 == 0) else 1
    assert B % num_steps == 0
    bt = B // num_steps
    n_cls = fc_slab.shape[-1]

    kernel = functools.partial(_gcn8_fused_kernel, bt=bt, np_=Np,
                               layer_meta=tuple(layer_meta))

    out = pl.pallas_call(
        kernel,
        out_shape=jax.ShapeDtypeStruct((num_steps, bt, n_cls), jnp.float32),
        grid=(num_steps,),
        in_specs=[
            pl.BlockSpec((bt * Np, 128), lambda i: (i, 0)),     # support1 (bf16)
            pl.BlockSpec((bt, Np, Np), lambda i: (i, 0, 0)),    # adj (bf16)
            pl.BlockSpec((bt * Np, 1), lambda i: (i, 0)),       # mask (f32)
            pl.BlockSpec(w_slab.shape, lambda i: (0, 0)),       # packed W2..W8
            pl.BlockSpec(b_slab.shape, lambda i: (0, 0)),       # packed b1..b8
            pl.BlockSpec(fc_slab.shape, lambda i: (0, 0)),      # fc_w / fc_b
        ],
        out_specs=pl.BlockSpec((1, bt, n_cls), lambda i: (i, 0, 0)),
        compiler_params=pltpu.CompilerParams(
            dimension_semantics=("parallel",)),
    )(s1, adj, mask, w_slab, b_slab, fc_slab)
    return out.reshape(B, n_cls)


# ----------------------------------------------------------------------------
# Parameter construction (deterministic, matches module __init__ shapes)
# ----------------------------------------------------------------------------
def init_params(key):
    keys = jax.random.split(key, 32)
    ki = iter(keys)
    params = {}
    params["em_element"] = jax.random.normal(next(ki), (54, 64), jnp.float32)
    params["em_hcount"] = jax.random.normal(next(ki), (6, 64), jnp.float32)
    params["em_charge"] = jax.random.normal(next(ki), (7, 64), jnp.float32)
    params["em_aromatic"] = jax.random.normal(next(ki), (3, 64), jnp.float32)
    gcs = []
    for fin, fout in GCN_DIMS:
        stdv = 1.0 / jnp.sqrt(jnp.float32(fout))
        w = jax.random.uniform(next(ki), (fin, fout), jnp.float32, -stdv, stdv)
        bb = jax.random.uniform(next(ki), (fout,), jnp.float32, -stdv, stdv)
        gcs.append((w, bb))
    params["gcs"] = gcs
    stdv = 1.0 / jnp.sqrt(jnp.float32(132))
    params["fc_w"] = jax.random.uniform(next(ki), (132, 2), jnp.float32, -stdv, stdv)
    params["fc_b"] = jax.random.uniform(next(ki), (2,), jnp.float32, -stdv, stdv)
    return params


# ----------------------------------------------------------------------------
# Forward pass (inference / eval mode: dropout is identity)
# ----------------------------------------------------------------------------
def gcn_8layer_forward(params, element, hcount, charge, adj, aromatic,
                       mask=None, *, num_steps=None):
    # NOTE: the PyTorch `aromatic is None` branch would feed 192 features into
    # gc1(256, ...) and fail there too, so aromatic is required here as well.
    B, N = element.shape
    w1, _ = params["gcs"][0]

    # Fold gc1's weight through the embedding tables (tiny one-off matmuls):
    # support1 = concat(emb...) @ W1  ==  sum_k  emb_k[ids_k] @ W1[64k:64k+64].
    p_el = params["em_element"] @ w1[0:64]
    p_hc = params["em_hcount"] @ w1[64:128]
    p_ch = params["em_charge"] @ w1[128:192]
    p_ar = params["em_aromatic"] @ w1[192:256]
    support1 = p_el[element] + p_hc[hcount] + p_ch[charge] + p_ar[aromatic]

    # Pad node dim to a multiple of 16 (bf16 sublane tile) for aligned slices.
    np_pad = ((N + 15) // 16) * 16
    pad = np_pad - N
    support1 = jnp.pad(support1, ((0, 0), (0, pad), (0, 0)))
    adj_p = jnp.pad(adj.astype(jnp.float32), ((0, 0), (0, pad), (0, pad)))
    if mask is None:
        mask2 = jnp.ones((B, N), jnp.float32)
    else:
        mask2 = mask.reshape(B, N).astype(jnp.float32)
    mask2 = jnp.pad(mask2, ((0, 0), (0, pad)))   # padded nodes masked out

    s1_flat = support1.reshape(B * np_pad, 128).astype(jnp.bfloat16)
    adj_bf16 = adj_p.astype(jnp.bfloat16)
    mask_flat = mask2.reshape(B * np_pad, 1)

    # Pack W2..W8 into one lane-padded bf16 slab; b1..b8 into one f32 slab.
    tail = params["gcs"][1:]
    total_rows = sum(w.shape[0] for (w, _) in tail)
    slab_rows = ((total_rows + 15) // 16) * 16
    w_slab = jnp.zeros((slab_rows, 128), jnp.float32)
    layer_meta = []
    off = 0
    for (w, _) in tail:
        fin, fout = w.shape
        w_slab = w_slab.at[off:off + fin, 0:fout].set(w)
        layer_meta.append((off, fin, fout))
        off += fin
    w_slab = w_slab.astype(jnp.bfloat16)

    n_layers = len(params["gcs"])
    b_rows = ((n_layers + 7) // 8) * 8
    b_slab = jnp.zeros((b_rows, 128), jnp.float32)
    for li, (_, b) in enumerate(params["gcs"]):
        b_slab = b_slab.at[li, 0:b.shape[0]].set(b)

    # fc slab: rows [0:N) = fc_w, padded rows zero, row np_pad = fc_b.
    fc_slab = jnp.zeros((np_pad + 8, 2), jnp.float32)
    fc_slab = fc_slab.at[0:N, :].set(params["fc_w"])
    fc_slab = fc_slab.at[np_pad, :].set(params["fc_b"])

    return gcn8_fused(s1_flat, adj_bf16, mask_flat, w_slab, b_slab, fc_slab,
                      layer_meta, np_pad, num_steps=num_steps)


# ----------------------------------------------------------------------------
# Pure-JAX f32 reference (for tolerance validation of the bf16 kernel path)
# ----------------------------------------------------------------------------
def gcn_8layer_reference(params, element, hcount, charge, adj, aromatic,
                         mask=None):
    x = jnp.concatenate(
        [params["em_element"][element], params["em_hcount"][hcount],
         params["em_charge"][charge], params["em_aromatic"][aromatic]], axis=2)
    h = x
    n = len(params["gcs"])
    for li, (w, b) in enumerate(params["gcs"]):
        support = jnp.einsum("bnf,fg->bng", h, w)
        h = jnp.einsum("bnm,bmg->bng", adj, support) + b
        if li < n - 1:
            h = jnp.maximum(h, 0.0)
    feat = h.reshape(h.shape[0], -1)
    if mask is not None:
        feat = feat * mask
    logits = feat @ params["fc_w"] + params["fc_b"]
    return jax.nn.softmax(logits, axis=1)


# ----------------------------------------------------------------------------
if __name__ == "__main__":
    key = jax.random.PRNGKey(0)
    pkey, dkey = jax.random.split(key)
    params = init_params(pkey)

    B = 2
    N = 132  # fc = Linear(132, 2) implies 132 nodes per graph
    k1, k2, k3, k4, k5 = jax.random.split(dkey, 5)
    element = jax.random.randint(k1, (B, N), 0, 54, jnp.int32)
    hcount = jax.random.randint(k2, (B, N), 0, 6, jnp.int32)
    charge = jax.random.randint(k3, (B, N), 0, 7, jnp.int32)
    aromatic = jax.random.randint(k4, (B, N), 0, 3, jnp.int32)

    # Symmetric, row-normalized adjacency with self loops (typical GCN input).
    a = (jax.random.uniform(k5, (B, N, N)) > 0.9).astype(jnp.float32)
    a = jnp.maximum(a, jnp.transpose(a, (0, 2, 1)))
    a = a + jnp.eye(N, dtype=jnp.float32)[None]
    adj = a / jnp.sum(a, axis=-1, keepdims=True)

    out = gcn_8layer_forward(params, element, hcount, charge, adj, aromatic)
    out = jax.block_until_ready(out)

    ref = gcn_8layer_reference(params, element, hcount, charge, adj, aromatic)

    assert out.shape == (B, 2)
    assert bool(jnp.all(jnp.isfinite(out)))
    assert bool(jnp.allclose(jnp.sum(out, axis=1), 1.0, atol=1e-5))
    # bf16 adj/activation chain vs f32 reference: generous-but-meaningful bound.
    assert float(jnp.max(jnp.abs(out - ref))) < 0.08
    print("KERNEL_OK")
</pallas_src>

<mosaic_0001>
module attributes {stable_mosaic.version = 11 : i64} {
  func.func @_gcn8_fused_kernel(%arg0: i32, %arg1: memref<144x128xbf16, #tpu.memory_space<vmem>>, %arg2: memref<1x144x144xbf16, #tpu.memory_space<vmem>>, %arg3: memref<144x1xf32, #tpu.memory_space<vmem>>, %arg4: memref<352x128xbf16, #tpu.memory_space<vmem>>, %arg5: memref<8x128xf32, #tpu.memory_space<vmem>>, %arg6: memref<152x2xf32, #tpu.memory_space<vmem>>, %arg7: memref<1x1x2xf32, #tpu.memory_space<vmem>>) attributes {dimension_semantics = [#tpu.dimension_semantics<parallel>], iteration_bounds = array<i64: 2>, scalar_prefetch = 0 : i64, scratch_operands = 0 : i64, tpu.core_type = #tpu.core_type<tc>, window_params = [{transform_indices = @transform_0, window_bounds = array<i64: 144, 128>}, {transform_indices = @transform_1, window_bounds = array<i64: 1, 144, 144>}, {transform_indices = @transform_2, window_bounds = array<i64: 144, 1>}, {pipeline_mode = #tpu.pipeline_mode<synchronous>, transform_indices = @transform_3, window_bounds = array<i64: 352, 128>}, {pipeline_mode = #tpu.pipeline_mode<synchronous>, transform_indices = @transform_4, window_bounds = array<i64: 8, 128>}, {pipeline_mode = #tpu.pipeline_mode<synchronous>, transform_indices = @transform_5, window_bounds = array<i64: 152, 2>}, {transform_indices = @transform_6, window_bounds = array<i64: 1, 1, 2>}]} {
    %c0 = arith.constant 0 : index
    %c0_0 = arith.constant 0 : index
    %0 = vector.load %arg1[%c0, %c0_0] : memref<144x128xbf16, #tpu.memory_space<vmem>>, vector<144x128xbf16>
    %c0_1 = arith.constant 0 : index
    %c0_2 = arith.constant 0 : index
    %c0_3 = arith.constant 0 : index
    %1 = vector.load %arg2[%c0_1, %c0_2, %c0_3] : memref<1x144x144xbf16, #tpu.memory_space<vmem>>, vector<1x144x144xbf16>
    %2 = vector.shape_cast %1 : vector<1x144x144xbf16> to vector<144x144xbf16>
    %cst = arith.constant dense<0.000000e+00> : vector<144x128xf32>
    %3 = tpu.matmul %2, %0, %cst {dimension_numbers = #tpu.dot_dimension_numbers<[1], [0], [0], [1], [0, 0, 1, 1], [], []>} : vector<144x144xbf16>, vector<144x128xbf16>, vector<144x128xf32> -> vector<144x128xf32>
    %c0_4 = arith.constant 0 : index
    %c0_5 = arith.constant 0 : index
    %4 = vector.load %arg5[%c0_4, %c0_5] : memref<8x128xf32, #tpu.memory_space<vmem>>, vector<1x128xf32>
    %5 = vector.broadcast %4 : vector<1x128xf32> to vector<144x128xf32>
    %6 = arith.addf %3, %5 : vector<144x128xf32>
    %cst_6 = arith.constant 0.000000e+00 : f32
    %7 = vector.broadcast %cst_6 : f32 to vector<144x128xf32>
    %8 = arith.maximumf %6, %7 : vector<144x128xf32>
    %9 = arith.truncf %8 : vector<144x128xf32> to vector<144x128xbf16>
    %c0_7 = arith.constant 0 : index
    %c0_8 = arith.constant 0 : index
    %10 = vector.load %arg4[%c0_7, %c0_8] : memref<352x128xbf16, #tpu.memory_space<vmem>>, vector<128x64xbf16>
    %cst_9 = arith.constant dense<0.000000e+00> : vector<144x64xf32>
    %11 = tpu.matmul %9, %10, %cst_9 {dimension_numbers = #tpu.dot_dimension_numbers<[1], [0], [0], [1], [0, 0, 1, 1], [], []>} : vector<144x128xbf16>, vector<128x64xbf16>, vector<144x64xf32> -> vector<144x64xf32>
    %12 = arith.truncf %11 : vector<144x64xf32> to vector<144x64xbf16>
    %c0_10 = arith.constant 0 : index
    %c0_11 = arith.constant 0 : index
    %c0_12 = arith.constant 0 : index
    %13 = vector.load %arg2[%c0_10, %c0_11, %c0_12] : memref<1x144x144xbf16, #tpu.memory_space<vmem>>, vector<1x144x144xbf16>
    %14 = vector.shape_cast %13 : vector<1x144x144xbf16> to vector<144x144xbf16>
    %cst_13 = arith.constant dense<0.000000e+00> : vector<144x64xf32>
    %15 = tpu.matmul %14, %12, %cst_13 {dimension_numbers = #tpu.dot_dimension_numbers<[1], [0], [0], [1], [0, 0, 1, 1], [], []>} : vector<144x144xbf16>, vector<144x64xbf16>, vector<144x64xf32> -> vector<144x64xf32>
    %c1 = arith.constant 1 : index
    %c0_14 = arith.constant 0 : index
    %16 = vector.load %arg5[%c1, %c0_14] : memref<8x128xf32, #tpu.memory_space<vmem>>, vector<1x64xf32>
    %17 = vector.broadcast %16 : vector<1x64xf32> to vector<144x64xf32>
    %18 = arith.addf %15, %17 : vector<144x64xf32>
    %cst_15 = arith.constant 0.000000e+00 : f32
    %19 = vector.broadcast %cst_15 : f32 to vector<144x64xf32>
    %20 = arith.maximumf %18, %19 : vector<144x64xf32>
    %21 = arith.truncf %20 : vector<144x64xf32> to vector<144x64xbf16>
    %c128 = arith.constant 128 : index
    %c0_16 = arith.constant 0 : index
    %22 = vector.load %arg4[%c128, %c0_16] : memref<352x128xbf16, #tpu.memory_space<vmem>>, vector<64x64xbf16>
    %cst_17 = arith.constant dense<0.000000e+00> : vector<144x64xf32>
    %23 = tpu.matmul %21, %22, %cst_17 {dimension_numbers = #tpu.dot_dimension_numbers<[1], [0], [0], [1], [0, 0, 1, 1], [], []>} : vector<144x64xbf16>, vector<64x64xbf16>, vector<144x64xf32> -> vector<144x64xf32>
    %24 = arith.truncf %23 : vector<144x64xf32> to vector<144x64xbf16>
    %c0_18 = arith.constant 0 : index
    %c0_19 = arith.constant 0 : index
    %c0_20 = arith.constant 0 : index
    %25 = vector.load %arg2[%c0_18, %c0_19, %c0_20] : memref<1x144x144xbf16, #tpu.memory_space<vmem>>, vector<1x144x144xbf16>
    %26 = vector.shape_cast %25 : vector<1x144x144xbf16> to vector<144x144xbf16>
    %cst_21 = arith.constant dense<0.000000e+00> : vector<144x64xf32>
    %27 = tpu.matmul %26, %24, %cst_21 {dimension_numbers = #tpu.dot_dimension_numbers<[1], [0], [0], [1], [0, 0, 1, 1], [], []>} : vector<144x144xbf16>, vector<144x64xbf16>, vector<144x64xf32> -> vector<144x64xf32>
    %c2 = arith.constant 2 : index
    %c0_22 = arith.constant 0 : index
    %28 = vector.load %arg5[%c2, %c0_22] : memref<8x128xf32, #tpu.memory_space<vmem>>, vector<1x64xf32>
    %29 = vector.broadcast %28 : vector<1x64xf32> to vector<144x64xf32>
    %30 = arith.addf %27, %29 : vector<144x64xf32>
    %cst_23 = arith.constant 0.000000e+00 : f32
    %31 = vector.broadcast %cst_23 : f32 to vector<144x64xf32>
    %32 = arith.maximumf %30, %31 : vector<144x64xf32>
    %33 = arith.truncf %32 : vector<144x64xf32> to vector<144x64xbf16>
    %c192 = arith.constant 192 : index
    %c0_24 = arith.constant 0 : index
    %34 = vector.load %arg4[%c192, %c0_24] : memref<352x128xbf16, #tpu.memory_space<vmem>>, vector<64x32xbf16>
    %cst_25 = arith.constant dense<0.000000e+00> : vector<144x32xf32>
    %35 = tpu.matmul %33, %34, %cst_25 {dimension_numbers = #tpu.dot_dimension_numbers<[1], [0], [0], [1], [0, 0, 1, 1], [], []>} : vector<144x64xbf16>, vector<64x32xbf16>, vector<144x32xf32> -> vector<144x32xf32>
    %36 = arith.truncf %35 : vector<144x32xf32> to vector<144x32xbf16>
    %c0_26 = arith.constant 0 : index
    %c0_27 = arith.constant 0 : index
    %c0_28 = arith.constant 0 : index
    %37 = vector.load %arg2[%c0_26, %c0_27, %c0_28] : memref<1x144x144xbf16, #tpu.memory_space<vmem>>, vector<1x144x144xbf16>
    %38 = vector.shape_cast %37 : vector<1x144x144xbf16> to vector<144x144xbf16>
    %cst_29 = arith.constant dense<0.000000e+00> : vector<144x32xf32>
    %39 = tpu.matmul %38, %36, %cst_29 {dimension_numbers = #tpu.dot_dimension_numbers<[1], [0], [0], [1], [0, 0, 1, 1], [], []>} : vector<144x144xbf16>, vector<144x32xbf16>, vector<144x32xf32> -> vector<144x32xf32>
    %c3 = arith.constant 3 : index
    %c0_30 = arith.constant 0 : index
    %40 = vector.load %arg5[%c3, %c0_30] : memref<8x128xf32, #tpu.memory_space<vmem>>, vector<1x32xf32>
    %41 = vector.broadcast %40 : vector<1x32xf32> to vector<144x32xf32>
    %42 = arith.addf %39, %41 : vector<144x32xf32>
    %cst_31 = arith.constant 0.000000e+00 : f32
    %43 = vector.broadcast %cst_31 : f32 to vector<144x32xf32>
    %44 = arith.maximumf %42, %43 : vector<144x32xf32>
    %45 = arith.truncf %44 : vector<144x32xf32> to vector<144x32xbf16>
    %c256 = arith.constant 256 : index
    %c0_32 = arith.constant 0 : index
    %46 = vector.load %arg4[%c256, %c0_32] : memref<352x128xbf16, #tpu.memory_space<vmem>>, vector<32x32xbf16>
    %cst_33 = arith.constant dense<0.000000e+00> : vector<144x32xf32>
    %47 = tpu.matmul %45, %46, %cst_33 {dimension_numbers = #tpu.dot_dimension_numbers<[1], [0], [0], [1], [0, 0, 1, 1], [], []>} : vector<144x32xbf16>, vector<32x32xbf16>, vector<144x32xf32> -> vector<144x32xf32>
    %48 = arith.truncf %47 : vector<144x32xf32> to vector<144x32xbf16>
    %c0_34 = arith.constant 0 : index
    %c0_35 = arith.constant 0 : index
    %c0_36 = arith.constant 0 : index
    %49 = vector.load %arg2[%c0_34, %c0_35, %c0_36] : memref<1x144x144xbf16, #tpu.memory_space<vmem>>, vector<1x144x144xbf16>
    %50 = vector.shape_cast %49 : vector<1x144x144xbf16> to vector<144x144xbf16>
    %cst_37 = arith.constant dense<0.000000e+00> : vector<144x32xf32>
    %51 = tpu.matmul %50, %48, %cst_37 {dimension_numbers = #tpu.dot_dimension_numbers<[1], [0], [0], [1], [0, 0, 1, 1], [], []>} : vector<144x144xbf16>, vector<144x32xbf16>, vector<144x32xf32> -> vector<144x32xf32>
    %c4 = arith.constant 4 : index
    %c0_38 = arith.constant 0 : index
    %52 = vector.load %arg5[%c4, %c0_38] : memref<8x128xf32, #tpu.memory_space<vmem>>, vector<1x32xf32>
    %53 = vector.broadcast %52 : vector<1x32xf32> to vector<144x32xf32>
    %54 = arith.addf %51, %53 : vector<144x32xf32>
    %cst_39 = arith.constant 0.000000e+00 : f32
    %55 = vector.broadcast %cst_39 : f32 to vector<144x32xf32>
    %56 = arith.maximumf %54, %55 : vector<144x32xf32>
    %57 = arith.truncf %56 : vector<144x32xf32> to vector<144x32xbf16>
    %c288 = arith.constant 288 : index
    %c0_40 = arith.constant 0 : index
    %58 = vector.load %arg4[%c288, %c0_40] : memref<352x128xbf16, #tpu.memory_space<vmem>>, vector<32x16xbf16>
    %cst_41 = arith.constant dense<0.000000e+00> : vector<144x16xf32>
    %59 = tpu.matmul %57, %58, %cst_41 {dimension_numbers = #tpu.dot_dimension_numbers<[1], [0], [0], [1], [0, 0, 1, 1], [], []>} : vector<144x32xbf16>, vector<32x16xbf16>, vector<144x16xf32> -> vector<144x16xf32>
    %60 = arith.truncf %59 : vector<144x16xf32> to vector<144x16xbf16>
    %c0_42 = arith.constant 0 : index
    %c0_43 = arith.constant 0 : index
    %c0_44 = arith.constant 0 : index
    %61 = vector.load %arg2[%c0_42, %c0_43, %c0_44] : memref<1x144x144xbf16, #tpu.memory_space<vmem>>, vector<1x144x144xbf16>
    %62 = vector.shape_cast %61 : vector<1x144x144xbf16> to vector<144x144xbf16>
    %cst_45 = arith.constant dense<0.000000e+00> : vector<144x16xf32>
    %63 = tpu.matmul %62, %60, %cst_45 {dimension_numbers = #tpu.dot_dimension_numbers<[1], [0], [0], [1], [0, 0, 1, 1], [], []>} : vector<144x144xbf16>, vector<144x16xbf16>, vector<144x16xf32> -> vector<144x16xf32>
    %c5 = arith.constant 5 : index
    %c0_46 = arith.constant 0 : index
    %64 = vector.load %arg5[%c5, %c0_46] : memref<8x128xf32, #tpu.memory_space<vmem>>, vector<1x16xf32>
    %65 = vector.broadcast %64 : vector<1x16xf32> to vector<144x16xf32>
    %66 = arith.addf %63, %65 : vector<144x16xf32>
    %cst_47 = arith.constant 0.000000e+00 : f32
    %67 = vector.broadcast %cst_47 : f32 to vector<144x16xf32>
    %68 = arith.maximumf %66, %67 : vector<144x16xf32>
    %69 = arith.truncf %68 : vector<144x16xf32> to vector<144x16xbf16>
    %c320 = arith.constant 320 : index
    %c0_48 = arith.constant 0 : index
    %70 = vector.load %arg4[%c320, %c0_48] : memref<352x128xbf16, #tpu.memory_space<vmem>>, vector<16x16xbf16>
    %cst_49 = arith.constant dense<0.000000e+00> : vector<144x16xf32>
    %71 = tpu.matmul %69, %70, %cst_49 {dimension_numbers = #tpu.dot_dimension_numbers<[1], [0], [0], [1], [0, 0, 1, 1], [], []>} : vector<144x16xbf16>, vector<16x16xbf16>, vector<144x16xf32> -> vector<144x16xf32>
    %72 = arith.truncf %71 : vector<144x16xf32> to vector<144x16xbf16>
    %c0_50 = arith.constant 0 : index
    %c0_51 = arith.constant 0 : index
    %c0_52 = arith.constant 0 : index
    %73 = vector.load %arg2[%c0_50, %c0_51, %c0_52] : memref<1x144x144xbf16, #tpu.memory_space<vmem>>, vector<1x144x144xbf16>
    %74 = vector.shape_cast %73 : vector<1x144x144xbf16> to vector<144x144xbf16>
    %cst_53 = arith.constant dense<0.000000e+00> : vector<144x16xf32>
    %75 = tpu.matmul %74, %72, %cst_53 {dimension_numbers = #tpu.dot_dimension_numbers<[1], [0], [0], [1], [0, 0, 1, 1], [], []>} : vector<144x144xbf16>, vector<144x16xbf16>, vector<144x16xf32> -> vector<144x16xf32>
    %c6 = arith.constant 6 : index
    %c0_54 = arith.constant 0 : index
    %76 = vector.load %arg5[%c6, %c0_54] : memref<8x128xf32, #tpu.memory_space<vmem>>, vector<1x16xf32>
    %77 = vector.broadcast %76 : vector<1x16xf32> to vector<144x16xf32>
    %78 = arith.addf %75, %77 : vector<144x16xf32>
    %cst_55 = arith.constant 0.000000e+00 : f32
    %79 = vector.broadcast %cst_55 : f32 to vector<144x16xf32>
    %80 = arith.maximumf %78, %79 : vector<144x16xf32>
    %81 = arith.truncf %80 : vector<144x16xf32> to vector<144x16xbf16>
    %c336 = arith.constant 336 : index
    %c0_56 = arith.constant 0 : index
    %82 = vector.load %arg4[%c336, %c0_56] : memref<352x128xbf16, #tpu.memory_space<vmem>>, vector<16x1xbf16>
    %cst_57 = arith.constant dense<0.000000e+00> : vector<144x1xf32>
    %83 = tpu.matmul %81, %82, %cst_57 {dimension_numbers = #tpu.dot_dimension_numbers<[1], [0], [0], [1], [0, 0, 1, 1], [], []>} : vector<144x16xbf16>, vector<16x1xbf16>, vector<144x1xf32> -> vector<144x1xf32>
    %84 = arith.truncf %83 : vector<144x1xf32> to vector<144x1xbf16>
    %c0_58 = arith.constant 0 : index
    %c0_59 = arith.constant 0 : index
    %c0_60 = arith.constant 0 : index
    %85 = vector.load %arg2[%c0_58, %c0_59, %c0_60] : memref<1x144x144xbf16, #tpu.memory_space<vmem>>, vector<1x144x144xbf16>
    %86 = vector.shape_cast %85 : vector<1x144x144xbf16> to vector<144x144xbf16>
    %cst_61 = arith.constant dense<0.000000e+00> : vector<144x1xf32>
    %87 = tpu.matmul %86, %84, %cst_61 {dimension_numbers = #tpu.dot_dimension_numbers<[1], [0], [0], [1], [0, 0, 1, 1], [], []>} : vector<144x144xbf16>, vector<144x1xbf16>, vector<144x1xf32> -> vector<144x1xf32>
    %c7 = arith.constant 7 : index
    %c0_62 = arith.constant 0 : index
    %88 = vector.load %arg5[%c7, %c0_62] : memref<8x128xf32, #tpu.memory_space<vmem>>, vector<1x1xf32>
    %89 = vector.broadcast %88 : vector<1x1xf32> to vector<144x1xf32>
    %90 = arith.addf %87, %89 : vector<144x1xf32>
    %c0_63 = arith.constant 0 : index
    %c0_64 = arith.constant 0 : index
    %91 = vector.load %arg3[%c0_63, %c0_64] : memref<144x1xf32, #tpu.memory_space<vmem>>, vector<144x1xf32>
    %92 = arith.mulf %90, %91 : vector<144x1xf32>
    %c0_65 = arith.constant 0 : index
    %c0_66 = arith.constant 0 : index
    %93 = vector.load %arg6[%c0_65, %c0_66] : memref<152x2xf32, #tpu.memory_space<vmem>>, vector<144x2xf32>
    %c144 = arith.constant 144 : index
    %c0_67 = arith.constant 0 : index
    %94 = vector.load %arg6[%c144, %c0_67] : memref<152x2xf32, #tpu.memory_space<vmem>>, vector<1x2xf32>
    %95 = vector.broadcast %92 : vector<144x1xf32> to vector<144x2xf32>
    %96 = arith.mulf %95, %93 : vector<144x2xf32>
    %cst_68 = arith.constant dense<0.000000e+00> : vector<2xf32>
    %97 = vector.multi_reduction <add>, %96, %cst_68 [0] : vector<144x2xf32> to vector<2xf32>
    %98 = vector.shape_cast %97 : vector<2xf32> to vector<1x2xf32>
    %99 = arith.addf %98, %94 : vector<1x2xf32>
    %cst_69 = arith.constant dense<0xFF800000> : vector<1xf32>
    %100 = vector.multi_reduction <maximumf>, %99, %cst_69 [1] : vector<1x2xf32> to vector<1xf32>
    %101 = vector.shape_cast %100 : vector<1xf32> to vector<1x1xf32>
    %102 = vector.broadcast %101 : vector<1x1xf32> to vector<1x2xf32>
    %103 = arith.subf %99, %102 : vector<1x2xf32>
    %104 = math.exp %103 : vector<1x2xf32>
    %cst_70 = arith.constant dense<0.000000e+00> : vector<1xf32>
    %105 = vector.multi_reduction <add>, %104, %cst_70 [1] : vector<1x2xf32> to vector<1xf32>
    %106 = vector.shape_cast %105 : vector<1xf32> to vector<1x1xf32>
    %107 = vector.broadcast %106 : vector<1x1xf32> to vector<1x2xf32>
    %108 = arith.divf %104, %107 : vector<1x2xf32>
    %c0_71 = arith.constant 0 : index
    %c0_72 = arith.constant 0 : index
    %c0_73 = arith.constant 0 : index
    %109 = vector.load %arg7[%c0_71, %c0_72, %c0_73] : memref<1x1x2xf32, #tpu.memory_space<vmem>>, vector<1x1x2xf32>
    %110 = vector.shape_cast %109 : vector<1x1x2xf32> to vector<1x2xf32>
    %111 = vector.shape_cast %108 : vector<1x2xf32> to vector<1x1x2xf32>
    tpu.vector_store %arg7[%c0_71, %c0_72, %c0_73], %111 {strides = array<i32>} : memref<1x1x2xf32, #tpu.memory_space<vmem>>, vector<1x1x2xf32>,
    return
  }
  func.func @transform_0(%arg0: i32) -> (i32, i32) {
    %c0_i32 = arith.constant 0 : i32
    %c0_i32_0 = arith.constant 0 : i32
    return %arg0, %c0_i32 : i32, i32
  }
  func.func @transform_1(%arg0: i32) -> (i32, i32, i32) {
    %c0_i32 = arith.constant 0 : i32
    %c0_i32_0 = arith.constant 0 : i32
    %c0_i32_1 = arith.constant 0 : i32
    return %arg0, %c0_i32, %c0_i32_0 : i32, i32, i32
  }
  func.func @transform_2(%arg0: i32) -> (i32, i32) {
    %c0_i32 = arith.constant 0 : i32
    %c0_i32_0 = arith.constant 0 : i32
    return %arg0, %c0_i32 : i32, i32
  }
  func.func @transform_3(%arg0: i32) -> (i32, i32) {
    %c0_i32 = arith.constant 0 : i32
    %c0_i32_0 = arith.constant 0 : i32
    %c0_i32_1 = arith.constant 0 : i32
    return %c0_i32, %c0_i32_0 : i32, i32
  }
  func.func @transform_4(%arg0: i32) -> (i32, i32) {
    %c0_i32 = arith.constant 0 : i32
    %c0_i32_0 = arith.constant 0 : i32
    %c0_i32_1 = arith.constant 0 : i32
    return %c0_i32, %c0_i32_0 : i32, i32
  }
  func.func @transform_5(%arg0: i32) -> (i32, i32) {
    %c0_i32 = arith.constant 0 : i32
    %c0_i32_0 = arith.constant 0 : i32
    %c0_i32_1 = arith.constant 0 : i32
    return %c0_i32, %c0_i32_0 : i32, i32
  }
  func.func @transform_6(%arg0: i32) -> (i32, i32, i32) {
    %c0_i32 = arith.constant 0 : i32
    %c0_i32_0 = arith.constant 0 : i32
    %c0_i32_1 = arith.constant 0 : i32
    return %arg0, %c0_i32, %c0_i32_0 : i32, i32, i32
  }
}

</mosaic_0001>

<bundles_post_ra>
// kernel: tpu_custom_call.1
= control target key start
LH: loop header
LB: loop body
LE: loop exit
PB: predicated region body
PF: predicated region fallthrough
CT: control target
= control target key end

     0   :  { %11 = vsyncpa [#allocation3], 0  ;;  %s5027_s0 = inlined_call_operand.vmem [shape: bf16[288,128], index: 0, kind: input, shape index: {}]   ;;  %s5028_s1 = inlined_call_operand.vmem [shape: bf16[2,144,144], index: 1, kind: input, shape index: {}]   ;;  %s5029_s2 = inlined_call_operand.vmem [shape: f32[288,1], index: 2, kind: input, shape index: {}]   ;;  %s5030_s3 = inlined_call_operand.hbm [shape: bf16[352,128], index: 3, kind: input, shape index: {}]   ;;  %s5031_s4 = inlined_call_operand.vmem [shape: f32[8,128], index: 4, kind: input, shape index: {}]   ;;  %s5032_s5 = inlined_call_operand.vmem [shape: f32[152,2], index: 5, kind: input, shape index: {}]   ;;  %s5033_s6 = inlined_call_operand.hbm [shape: f32[2,1,2], index: 6, kind: output, shape index: {}]  }
   0x1   :  { %12 = vsyncpa [#allocation4], 0 }
   0x2   :  { %14 = vsyncpa [#allocation4 + $0x1], 0  ;;  %s3924_s21 = smov 0   ;;  %s3926_s22 = smov 0  }
   0x3   :  { %s3928_s23 = smov 0   ;;  %s3930_s24 = smov 0  }
   0x4 LB: > { %s3945_s25 = sadd.s32 4294967295, %s3880_s24   ;;  %s3038_s26 = sadd.s32 4294967294, %s3880_s24   ;;  %s3880_s24 = sphi %s3930_s24, %s5049_s24   ;;  %s3876_s23 = sphi %s3928_s23, %s5048_s23   ;;  %s3872_s22 = sphi %s3926_s22, %s5047_s22   ;;  %s3868_s21 = sphi %s3924_s21, %s5046_s21  }
   0x5   : > { %s3949_s27 = sadd.s32 1, %s3880_s24   ;;  %s168_s28 = sadd.s32 1, %s3876_s23 }
   0x6   : > { %s165_s29 = ssub.s32 %s3880_s24, %s3949_s27  ;;  %p178_p0 = scmp.ne.s32.totalorder %s3876_s23, %s3872_s22 }
   0x7   : > { %p166_p1 = scmp.eq.s32.totalorder %s165_s29, 0  ;;  %p179_p2 = scmp.eq.s32.totalorder %s3945_s25, 1 }
   0x8   : > { %p184_p3 = scmp.ne.s32.totalorder %s3872_s22, %s3868_s21  ;;  %p185_p4 = scmp.eq.s32.totalorder %s3038_s26, 1 }
   0x9   : > { %s3960_s30 = scalar_select %p166_p1, %s3876_s23, %s168_s28  }
   0xa   : > { %p3962_p5 = por %p179_p2, %p178_p0  ;;  %p3966_p6 = por %p185_p4, %p184_p3 }
   0xb   : > { %p3039_p7 = scmp.ge.s32.totalorder %s3880_s24, 1  ;;  %p192_p8 = scmp.lt.s32.totalorder %s3880_s24, 3 }
   0xc   : > { %s5037_s7 = scalar_select %p3962_p5, 1, 0 }
   0xd   : > { %s5038_s8 = scalar_select %p3966_p6, 1, 0 }
   0xe   : > { %p5034_p9 = scmp.eq.s32.totalorder %s3945_s25, 0  ;;  %p3973_p10 = pnand %p3039_p7, %p192_p8 }
   0xf   : > { %s3882_s10 = smov [#allocation2]   ;;  %s3786_s15 = scalar_lea.hbm %s5030_s3, 2816 }
  0x10   : > { %s5039_s9 = scalar_select %p3973_p10, 1, 0 }
  0x11   : > { %s204_s11 = sshll.u32 %s3882_s10, 4  ;;  %p3637_p11 = pneg %p3973_p10  ;;  %s205_s11 = int_to_ptr.vmem [resolvable:$true] %s204_s11 }
  0x12   : > { %p3787_p13 = scmp.ne.s32.totalorder %s5030_s3, %s3786_s15  ;;  %p3793_p3 = scmp.lt.u32.totalorder %s3786_s15, %s5030_s3 }
  0x13   : > { %p3981_p12 = pnand %p5034_p9, %p3637_p11 }
  0x15   : > { %p3788_p0 = pneg %p3981_p12 }
  0x17   : > { %p3789_p1 = pnand %p3788_p0, %p3787_p13 }
  0x19   : > { %p3790_p2 = pneg %p3789_p1 }
  0x1b   : > { %p3795_p4 = pnand %p3793_p3, %p3790_p2 }
  0x1d   : > { %3798 = shalt.err (!%p3795_p4)
}
  0x1e   : > { %s3799_s20 = scalar_lea.vmem %s205_s11, 2816  ;;  %p3807_p9 = scmp.lt.s32.totalorder %s205_s11, %s205_s11 }
  0x1f   : > { %p3800_p7 = scmp.ne.s32.totalorder %s205_s11, %s3799_s20  ;;  %p3808_p6 = scmp.lt.s32.totalorder %s3799_s20, %s3799_s20 }
  0x21   : > { %p3802_p8 = pnand %p3800_p7, %p3788_p0  ;;  %p3809_p5 = por %p3808_p6, %p3807_p9 }
  0x23   : > { %p3803_p11 = pneg %p3802_p8 }
  0x25   : > { %p3810_p10 = pnand %p3809_p5, %p3803_p11 }
  0x27   : > { %3813 = shalt.err (!%p3810_p10)
}
  0x28   : > { %s3883_s26 = smov 64   ;;  %s3884_s28 = smov 4  }
  0x29   : > { %3640 = dma.hbm_to_vmem [thread:$0]  (!%p3981_p12), %s5030_s3, 2816, %s205_s11, [#allocation3], %s3883_s26, %s3883_s26, %s3884_s28  }
  0x2a   : > { %p5041_p13 = scmp.ne.s32.totalorder %s5039_s9, 0 }
  0x2b   : > { %p5042_p1 = scmp.eq.s32.totalorder (!%p5041_p13), %s3945_s25, 0 }
  0x2c   : > { %252 = sbr.rel (%p5041_p13) target bundleno = 4373 (0x1115), region = 44 }
  0x33   : > { %3859 = dma.done.wait (%p5042_p1), [#allocation3], 2816   ;;  %p5043_p0 = pmov %p5042_p1 }
  0x34   : > { %s291_s13 = smul.u32 18, %s3945_s25  ;;  %v3885_v0 = vmov 0   ;;  %p297_p5 = scmp.lt.s32.totalorder %s3945_s25, 1  ;;  %v3886_v1 = vmov 0.0   ;;  %v3724_v2 = vld [vmem:[#allocation2] sm:$0xff]   ;;  %vm485_vm0 = vcmask 130048  }
  0x35   : > { %3861 = vsyncadd (%p5043_p0), [#allocation3], 4294964480  ;;  %513 = vmatprep.subr.bf16.mxu0 %v3885_v0  ;;  %3686 = vset.pattern.permute.xlu0 %v3885_v0  ;;  %v3725_v10 = vld [vmem:[#allocation2 + $0x8] sm:$0xff]   ;;  %v3726_v12 = vld [vmem:[#allocation2 + $0x10] sm:$0xff]   ;;  %vm3887_vm1 = vmmov 0   ;;  %vm992_vm2 = vcmask 523264  }
  0x36   : > { %p292_p6 = scmp.lt.s32.totalorder %s291_s13, 35  ;;  %3614 = vmatprep.subr.bf16.mxu1 %v3886_v1  ;;  %3687 = vset.pattern.permute.xlu1 %v3885_v0  ;;  %v3727_v14 = vld [vmem:[#allocation2 + $0x18] sm:$0xff]   ;;  %v3728_v17 = vld [vmem:[#allocation2 + $0x20] sm:$0xff]   ;;  %v3729_v19 = vld [vmem:[#allocation2 + $0x28] sm:$0xff]   ;;  %vm1597_vm3 = vcmask 261120   ;;  %vm2878_vm4 = vcmask 15360  }
  0x37   : > { %s298_s9 = scalar_select %p297_p5, %s3945_s25, 1  ;;  %3622 = vmatpush3.bf16.msra.mxu1 %v3724_v2  ;;  %v3730_v35 = vld [vmem:[#allocation2 + $0x30] sm:$0xff]   ;;  %v3731_v36 = vld [vmem:[#allocation2 + $0x38] sm:$0xff]   ;;  %3350 = vmatprep.mubr.msk.bf16.mxu1 %vm3887_vm1, %v3886_v1  ;;  %v4149_v37 = vld [vmem:[%s5031_s4] ss:$0 sm:$0xff]  ;;  %vm2921_vm5 = vcmask 8192  }
  0x38   : > { %s5051_s13 = smov (!%p292_p6, %s291_s13), 35  ;;  %3615 = vmatprep.subr.bf16.mxu1 %v3886_v1  ;;  %s289_s20 = sand.u32 1, %s3872_s22  }
  0x39   : > { %s3044_s11 = sshll.u32 %s5051_s13, 2  ;;  %s3630_s16 = smul.u32 144, %s298_s9 }
  0x3a   : > { %s4020_s15 = scalar_lea.vmem %s5027_s0, %s3044_s11  ;;  %s290_s26 = scalar_lea.vmem [#allocation5], %s289_s20 }
  0x3b   : > { %v3688_v3 = vld [vmem:[%s4020_s15] sm:$0xff]   ;;  %v3689_v4 = vld [vmem:[%s4020_s15 + $0x8] sm:$0xff]   ;;  %v3690_v5 = vld [vmem:[%s4020_s15 + $0x10] sm:$0xff]   ;;  %s4030_s19 = scalar_lea.vmem %s5028_s1, %s3630_s16  ;;  %3623 = vmatpush3.bf16.msra.mxu1 %v3725_v10  ;;  %s2947_s28 = sshll.u32 %s290_s26, 4  ;;  %s4986_s28 = int_to_ptr.vmem [resolvable:$true] %s2947_s28 }
  0x3c   : > { %514 = vmatpush1.bf16.msra.mxu0 %v3688_v3  ;;  %v4034_v6 = vld [vmem:[%s4030_s19 + $0x4] ss:$8 sps:$4 sm:$0xff]   ;;  %v3691_v7 = vld [vmem:[%s4020_s15 + $0x18] sm:$0xff]   ;;  %v3694_v11 = vld [vmem:[%s4020_s15 + $0x30] sm:$0xff]   ;;  %3616 = vmatprep.subr.bf16.mxu1 %v3886_v1  ;;  %s3814_s11 = scalar_lea.vmem %s4986_s28, 16  ;;  %p5044_p10 = scmp.ne.s32.totalorder %s5037_s7, 0 }
  0x3d   : > { %515 = vmatprep.subr.bf16.mxu0 %v3885_v0  ;;  %3075 = vmatprep.mubr.msk.bf16.mxu0 %vm485_vm0, %v4034_v6  ;;  %v3692_v8 = vld [vmem:[%s4020_s15 + $0x20] sm:$0xff]   ;;  %v3693_v9 = vld [vmem:[%s4020_s15 + $0x28] sm:$0xff]   ;;  %v3695_v13 = vld [vmem:[%s4020_s15 + $0x38] sm:$0xff]   ;;  %p3815_p9 = scmp.ne.s32.totalorder %s4986_s28, %s3814_s11 }
  0x3e   : > { %v3696_v15 = vld [vmem:[%s4020_s15 + $0x40] sm:$0xff]   ;;  %v4056_v18 = vld [vmem:[%s4030_s19 + $0x14] ss:$8 sps:$4 sm:$0xff]   ;;  %v4067_v20 = vld [vmem:[%s4030_s19 + $0x10] ss:$8 sps:$4 sm:$0xff]  }
  0x3f   : > { %3624 = vmatpush3.bf16.msra.mxu1 %v3726_v12  ;;  %v4053_v16 = vld [vmem:[%s4030_s19] ss:$8 sps:$4 sm:$0xff]   ;;  %v4070_v21 = vld [vmem:[%s4030_s19 + $0x24] ss:$8 sps:$4 sm:$0xff]   ;;  %v4081_v23 = vld [vmem:[%s4030_s19 + $0x34] ss:$8 sps:$4 sm:$0xff]   ;;  %p3816_p12 = pnand %p3815_p9, %p5044_p10 }
  0x40   : > { %516 = vmatpush1.bf16.msra.mxu0 %v3689_v4  ;;  %3617 = vmatprep.subr.bf16.mxu1 %v3886_v1  ;;  %v4078_v22 = vld [vmem:[%s4030_s19 + $0x20] ss:$8 sps:$4 sm:$0xff]   ;;  %v4089_v24 = vld [vmem:[%s4030_s19 + $0x30] ss:$8 sps:$4 sm:$0xff]   ;;  %v4092_v25 = vld [vmem:[%s4030_s19 + $0x44] ss:$8 sps:$4 sm:$0xff]  }
  0x41   : > { %517 = vmatprep.subr.bf16.mxu0 %v3885_v0  ;;  %v4099_v26 = vld [vmem:[%s4030_s19 + $0x40] ss:$8 sps:$4 sm:$0xff]   ;;  %v4102_v27 = vld [vmem:[%s4030_s19 + $0x54] ss:$8 sps:$4 sm:$0xff]   ;;  %v4108_v28 = vld [vmem:[%s4030_s19 + $0x50] ss:$8 sps:$4 sm:$0xff]   ;;  %p3817_p2 = pneg %p3816_p12 }
  0x42   : > { %v4111_v29 = vld [vmem:[%s4030_s19 + $0x64] ss:$8 sps:$4 sm:$0xff]   ;;  %v4117_v30 = vld [vmem:[%s4030_s19 + $0x60] ss:$8 sps:$4 sm:$0xff]   ;;  %v4120_v31 = vld [vmem:[%s4030_s19 + $0x74] ss:$8 sps:$4 sm:$0xff]  }
  0x43   : > { %3625 = vmatpush3.bf16.msra.mxu1 %v3727_v14  ;;  %v4126_v32 = vld [vmem:[%s4030_s19 + $0x70] ss:$8 sps:$4 sm:$0xff]   ;;  %v4129_v33 = vld [vmem:[%s4030_s19 + $0x84] ss:$8 sps:$4 sm:$0xff]   ;;  %v4135_v34 = vld [vmem:[%s4030_s19 + $0x80] ss:$8 sps:$4 sm:$0xff]  }
  0x44   : > { %518 = vmatpush1.bf16.msra.mxu0 %v3690_v5  ;;  %3618 = vmatprep.subr.bf16.mxu1 %v3886_v1 }
  0x45   : > { %519 = vmatprep.subr.bf16.mxu0 %v3885_v0 }
  0x47   : > { %3626 = vmatpush3.bf16.msra.mxu1 %v3728_v17 }
  0x48   : > { %520 = vmatpush1.bf16.msra.mxu0 %v3691_v7  ;;  %3619 = vmatprep.subr.bf16.mxu1 %v3886_v1 }
  0x49   : > { %521 = vmatprep.subr.bf16.mxu0 %v3885_v0 }
  0x4b   : > { %3627 = vmatpush3.bf16.msra.mxu1 %v3729_v19 }
  0x4c   : > { %522 = vmatpush1.bf16.msra.mxu0 %v3692_v8  ;;  %3620 = vmatprep.subr.bf16.mxu1 %v3886_v1 }
  0x4d   : > { %523 = vmatprep.subr.bf16.mxu0 %v3885_v0 }
  0x4f   : > { %3628 = vmatpush3.bf16.msra.mxu1 %v3730_v35 }
  0x50   : > { %524 = vmatpush1.bf16.msra.mxu0 %v3693_v9  ;;  %3621 = vmatprep.subr.bf16.mxu1 %v3886_v1 }
  0x51   : > { %525 = vmatprep.subr.bf16.mxu0 %v3885_v0 }
  0x53   : > { %3629 = vmatpush3.bf16.msra.mxu1 %v3731_v36 }
  0x54   : > { %526 = vmatpush1.bf16.msra.mxu0 %v3694_v11  ;;  %828 = vmatprep.subr.bf16.mxu1 %v3885_v0 }
  0x55   : > { %527 = vmatprep.subr.bf16.mxu0 %v3885_v0 }
  0x58   : > { %528 = vmatpush1.bf16.msra.mxu0 %v3695_v13 }
  0x59   : > { %529 = vmatprep.subr.bf16.mxu0 %v3885_v0 }
  0x5c   : > { %530 = vmatpush1.bf16.msra.mxu0 %v3696_v15 }
  0x5d   : > { %3318 = vmatprep.subr.bf16.mxu0 %v3886_v1 }
  0x5f   : > { %546 = vmatmul.mubr.bf16.vlgmr.msra.gmra.mrb[0].mxu0 %v4053_v16 }
  0x60   : > { %3076 = vmatprep.mubr.msk.bf16.mxu0 %vm485_vm0, %v4056_v18  ;;  %3319 = vmatpush3.bf16.msra.mxu0 %v3724_v2 }
  0x61   : > { %3320 = vmatprep.subr.bf16.mxu0 %v3886_v1 }
  0x64   : > { %3321 = vmatpush3.bf16.msra.mxu0 %v3725_v10 }
  0x65   : > { %3322 = vmatprep.subr.bf16.mxu0 %v3886_v1 }
  0x67   : > { %554 = vmatmul.mubr.bf16.gmra.mrb[4].mxu0 %v4067_v20 }
  0x68   : > { %3077 = vmatprep.mubr.msk.bf16.mxu0 %vm485_vm0, %v4070_v21  ;;  %3323 = vmatpush3.bf16.msra.mxu0 %v3726_v12 }
  0x69   : > { %3324 = vmatprep.subr.bf16.mxu0 %v3886_v1 }
  0x6c   : > { %3325 = vmatpush3.bf16.msra.mxu0 %v3727_v14 }
  0x6d   : > { %3326 = vmatprep.subr.bf16.mxu0 %v3886_v1 }
  0x6f   : > { %562 = vmatmul.mubr.bf16.gmra.mrb[8].mxu0 %v4078_v22 }
  0x70   : > { %3078 = vmatprep.mubr.msk.bf16.mxu0 %vm485_vm0, %v4081_v23  ;;  %3327 = vmatpush3.bf16.msra.mxu0 %v3728_v17 }
  0x71   : > { %3328 = vmatprep.subr.bf16.mxu0 %v3886_v1 }
  0x74   : > { %3329 = vmatpush3.bf16.msra.mxu0 %v3729_v19 }
  0x75   : > { %3330 = vmatprep.subr.bf16.mxu0 %v3886_v1 }
  0x77   : > { %570 = vmatmul.mubr.bf16.gmra.mrb[12].mxu0 %v4089_v24 }
  0x78   : > { %3079 = vmatprep.mubr.msk.bf16.mxu0 %vm485_vm0, %v4092_v25  ;;  %3331 = vmatpush3.bf16.msra.mxu0 %v3730_v35 }
  0x79   : > { %3332 = vmatprep.subr.bf16.mxu0 %v3886_v1 }
  0x7c   : > { %3333 = vmatpush3.bf16.msra.mxu0 %v3731_v36 }
  0x7d   : > { %3370 = vmatprep.subr.bf16.mxu0 %v3886_v1 }
  0x7f   : > { %578 = vmatmul.mubr.bf16.gmra.mrb[16].mxu0 %v4099_v26 }
  0x80   : > { %3080 = vmatprep.mubr.msk.bf16.mxu0 %vm485_vm0, %v4102_v27 }
  0x87   : > { %586 = vmatmul.mubr.bf16.gmra.mrb[20].mxu0 %v4108_v28 }
  0x88   : > { %3081 = vmatprep.mubr.msk.bf16.mxu0 %vm485_vm0, %v4111_v29 }
  0x8f   : > { %594 = vmatmul.mubr.bf16.gmra.mrb[24].mxu0 %v4117_v30 }
  0x90   : > { %3082 = vmatprep.mubr.msk.bf16.mxu0 %vm485_vm0, %v4120_v31 }
  0x97   : > { %602 = vmatmul.mubr.bf16.gmra.mrb[28].mxu0 %v4126_v32 }
  0x98   : > { %3083 = vmatprep.mubr.msk.bf16.mxu0 %vm485_vm0, %v4129_v33 }
  0x9f   : > { %610 = vmatmul.mubr.bf16.gmra.mrb[32].mxu0 %v4135_v34 }
  0xa0   : > { %3334 = vmatprep.mubr.msk.bf16.mxu0 %vm3887_vm1, %v3886_v1 }
 0x132   : > { %v547_v38 = vpop.f32.mrb[0].mxu0 }
 0x133   : > { %v548_v39 = vadd.f32 %v4149_v37, %v547_v38  ;;  %v549_v40 = vpop.f32.mrb[1].mxu0 }
 0x134   : > { %v550_v41 = vpop.f32.mrb[2].mxu0 }
 0x135   : > { %v551_v42 = vadd.f32 %v4149_v37, %v550_v41  ;;  %v552_v43 = vpop.f32.mrb[3].mxu0  ;;  %v618_v44 = vmax.f32 %v548_v39, 0.0 }
 0x137   : > { %v619_v45 = vmax.f32 %v551_v42, 0.0 }
 0x139   : > { %v636_v46 = vpack.c.bf16 %v619_v45, %v618_v44 }
 0x13a   : > { %v555_v47 = vpop.f32.mrb[4].mxu0 }
 0x13b   : > { %v556_v48 = vadd.f32 %v4149_v37, %v555_v47  ;;  %v557_v49 = vpop.f32.mrb[5].mxu0  ;;  %3335 = vmatmul.mubr.bf16.vlgmr.msra.gmra.mrb[36].mxu0 %v636_v46 }
 0x13c   : > { %v558_v50 = vpop.f32.mrb[6].mxu0  ;;  %3338 = vmatprep.mubr.msk.bf16.mxu0 %vm3887_vm1, %v3886_v1 }
 0x13d   : > { %v559_v51 = vadd.f32 %v4149_v37, %v558_v50  ;;  %v560_v52 = vpop.f32.mrb[7].mxu0  ;;  %v620_v53 = vmax.f32 %v556_v48, 0.0 }
 0x13f   : > { %v621_v54 = vmax.f32 %v559_v51, 0.0 }
 0x141   : > { %v637_v55 = vpack.c.bf16 %v621_v54, %v620_v53 }
 0x142   : > { %v563_v56 = vpop.f32.mrb[8].mxu0 }
 0x143   : > { %v564_v57 = vadd.f32 %v4149_v37, %v563_v56  ;;  %v565_v58 = vpop.f32.mrb[9].mxu0  ;;  %3339 = vmatmul.mubr.bf16.gmra.mrb[40].mxu0 %v637_v55 }
 0x144   : > { %v566_v59 = vpop.f32.mrb[10].mxu0  ;;  %3342 = vmatprep.mubr.msk.bf16.mxu0 %vm3887_vm1, %v3886_v1 }
 0x145   : > { %v567_v60 = vadd.f32 %v4149_v37, %v566_v59  ;;  %v568_v61 = vpop.f32.mrb[11].mxu0  ;;  %v622_v62 = vmax.f32 %v564_v57, 0.0 }
 0x147   : > { %v623_v63 = vmax.f32 %v567_v60, 0.0 }
 0x149   : > { %v638_v2 = vpack.c.bf16 %v623_v63, %v622_v62 }
 0x14a   : > { %v571_v3 = vpop.f32.mrb[12].mxu0 }
 0x14b   : > { %v572_v4 = vadd.f32 %v4149_v37, %v571_v3  ;;  %v573_v5 = vpop.f32.mrb[13].mxu0  ;;  %3343 = vmatmul.mubr.bf16.gmra.mrb[44].mxu0 %v638_v2 }
 0x14c   : > { %v574_v7 = vpop.f32.mrb[14].mxu0  ;;  %3346 = vmatprep.mubr.msk.bf16.mxu0 %vm3887_vm1, %v3886_v1 }
 0x14d   : > { %v575_v8 = vadd.f32 %v4149_v37, %v574_v7  ;;  %v576_v9 = vpop.f32.mrb[15].mxu0  ;;  %v624_v10 = vmax.f32 %v572_v4, 0.0 }
 0x14f   : > { %v625_v11 = vmax.f32 %v575_v8, 0.0 }
 0x151   : > { %v639_v12 = vpack.c.bf16 %v625_v11, %v624_v10 }
 0x152   : > { %v579_v13 = vpop.f32.mrb[16].mxu0 }
 0x153   : > { %v580_v14 = vadd.f32 %v4149_v37, %v579_v13  ;;  %v581_v15 = vpop.f32.mrb[17].mxu0  ;;  %3347 = vmatmul.mubr.bf16.gmra.mrb[48].mxu0 %v639_v12 }
 0x154   : > { %v582_v17 = vpop.f32.mrb[18].mxu0  ;;  %3378 = vmatprep.mubr.msk.bf16.mxu0 %vm3887_vm1, %v3886_v1 }
 0x155   : > { %v583_v19 = vadd.f32 %v4149_v37, %v582_v17  ;;  %v584_v35 = vpop.f32.mrb[19].mxu0  ;;  %v626_v36 = vmax.f32 %v580_v14, 0.0 }
 0x157   : > { %v627_v38 = vmax.f32 %v583_v19, 0.0 }
 0x159   : > { %v640_v39 = vpack.c.bf16 %v627_v38, %v626_v36 }
 0x15a   : > { %v587_v40 = vpop.f32.mrb[20].mxu0 }
 0x15b   : > { %v588_v41 = vadd.f32 %v4149_v37, %v587_v40  ;;  %v589_v42 = vpop.f32.mrb[21].mxu0  ;;  %3351 = vmatmul.mubr.bf16.vlgmr.msra.gmra.mrb[0].mxu1 %v640_v39  ;;  %v3732_v39 = vld [vmem:[#allocation2 + $0x40] sm:$0xff]  }
 0x15c   : > { %v590_v43 = vpop.f32.mrb[22].mxu0  ;;  %3354 = vmatprep.mubr.msk.bf16.mxu1 %vm3887_vm1, %v3886_v1  ;;  %3371 = vmatpush3.bf16.msra.mxu0 %v3732_v39 }
 0x15d   : > { %v591_v44 = vadd.f32 %v4149_v37, %v590_v43  ;;  %v592_v45 = vpop.f32.mrb[23].mxu0  ;;  %v628_v46 = vmax.f32 %v588_v41, 0.0  ;;  %v3733_v41 = vld [vmem:[#allocation2 + $0x48] sm:$0xff]   ;;  %3372 = vmatprep.subr.bf16.mxu0 %v3886_v1 }
 0x15f   : > { %v629_v47 = vmax.f32 %v591_v44, 0.0  ;;  %v3734_v44 = vld [vmem:[#allocation2 + $0x50] sm:$0xff]  }
 0x160   : > { %3373 = vmatpush3.bf16.msra.mxu0 %v3733_v41 }
 0x161   : > { %v641_v48 = vpack.c.bf16 %v629_v47, %v628_v46  ;;  %3374 = vmatprep.subr.bf16.mxu0 %v3886_v1 }
 0x162   : > { %v595_v49 = vpop.f32.mrb[24].mxu0 }
 0x163   : > { %v596_v50 = vadd.f32 %v4149_v37, %v595_v49  ;;  %v597_v51 = vpop.f32.mrb[25].mxu0  ;;  %3355 = vmatmul.mubr.bf16.gmra.mrb[4].mxu1 %v641_v48 }
 0x164   : > { %v598_v52 = vpop.f32.mrb[26].mxu0  ;;  %3358 = vmatprep.mubr.msk.bf16.mxu1 %vm3887_vm1, %v3886_v1  ;;  %3375 = vmatpush3.bf16.msra.mxu0 %v3734_v44 }
 0x165   : > { %v599_v53 = vadd.f32 %v4149_v37, %v598_v52  ;;  %v600_v54 = vpop.f32.mrb[27].mxu0  ;;  %v630_v55 = vmax.f32 %v596_v50, 0.0  ;;  %3376 = vmatprep.subr.bf16.mxu0 %v3886_v1 }
 0x167   : > { %v631_v56 = vmax.f32 %v599_v53, 0.0 }
 0x169   : > { %v642_v57 = vpack.c.bf16 %v631_v56, %v630_v55 }
 0x16a   : > { %v603_v58 = vpop.f32.mrb[28].mxu0 }
 0x16b   : > { %v604_v59 = vadd.f32 %v4149_v37, %v603_v58  ;;  %v605_v60 = vpop.f32.mrb[29].mxu0  ;;  %3359 = vmatmul.mubr.bf16.gmra.mrb[8].mxu1 %v642_v57 }
 0x16c   : > { %v606_v61 = vpop.f32.mrb[30].mxu0  ;;  %3362 = vmatprep.mubr.msk.bf16.mxu1 %vm3887_vm1, %v3886_v1 }
 0x16d   : > { %v607_v62 = vadd.f32 %v4149_v37, %v606_v61  ;;  %v608_v63 = vpop.f32.mrb[31].mxu0  ;;  %v632_v2 = vmax.f32 %v604_v59, 0.0 }
 0x16f   : > { %v633_v3 = vmax.f32 %v607_v62, 0.0 }
 0x171   : > { %v643_v4 = vpack.c.bf16 %v633_v3, %v632_v2 }
 0x172   : > { %v611_v5 = vpop.f32.mrb[32].mxu0 }
 0x173   : > { %v612_v7 = vadd.f32 %v4149_v37, %v611_v5  ;;  %v613_v8 = vpop.f32.mrb[33].mxu0  ;;  %3363 = vmatmul.mubr.bf16.gmra.mrb[12].mxu1 %v643_v4 }
 0x174   : > { %v614_v9 = vpop.f32.mrb[34].mxu0  ;;  %3366 = vmatprep.mubr.msk.bf16.mxu1 %vm3887_vm1, %v3886_v1 }
 0x175   : > { %v615_v10 = vadd.f32 %v4149_v37, %v614_v9  ;;  %v616_v11 = vpop.f32.mrb[35].mxu0  ;;  %v634_v12 = vmax.f32 %v612_v7, 0.0 }
 0x177   : > { %v635_v13 = vmax.f32 %v615_v10, 0.0 }
 0x179   : > { %v644_v14 = vpack.c.bf16 %v635_v13, %v634_v12 }
 0x17b   : > { %3367 = vmatmul.mubr.bf16.gmra.mrb[16].mxu1 %v644_v14 }
 0x17c   : > { %3093 = vmatprep.mubr.msk.bf16.mxu1 %vm485_vm0, %v4034_v6 }
 0x20e   : > { %v743_v15 = vpop.f32.mrb[36].mxu0 }
 0x20f   : > { %v3336_v17 = vpop.f32.mrb[37].mxu0 }
 0x210   : > { %v746_v19 = vpop.f32.mrb[38].mxu0 }
 0x211   : > { %v814_v35 = vpack.c.bf16 %v746_v19, %v743_v15  ;;  %v3337_v36 = vpop.f32.mrb[39].mxu0 }
 0x212   : > { %v3735_v36 = vld [vmem:[#allocation2 + $0x58] sm:$0xff]  }
 0x213   : > { %829 = vmatpush1.bf16.msra.mxu1 %v814_v35  ;;  %3377 = vmatpush3.bf16.msra.mxu0 %v3735_v36 }
 0x214   : > { %830 = vmatprep.subr.bf16.mxu1 %v3885_v0  ;;  %3414 = vmatprep.subr.bf16.mxu0 %v3886_v1 }
 0x216   : > { %v751_v38 = vpop.f32.mrb[40].mxu0 }
 0x217   : > { %v3340_v40 = vpop.f32.mrb[41].mxu0 }
 0x218   : > { %v754_v37 = vpop.f32.mrb[42].mxu0 }
 0x219   : > { %v815_v42 = vpack.c.bf16 %v754_v37, %v751_v38  ;;  %v3341_v43 = vpop.f32.mrb[43].mxu0  ;;  %v4230_v38 = vld [vmem:[%s5031_s4 + $0x1] ss:$0 sm:$0xff] }
 0x21b   : > { %831 = vmatpush1.bf16.msra.mxu1 %v815_v42 }
 0x21c   : > { %832 = vmatprep.subr.bf16.mxu1 %v3885_v0 }
 0x21e   : > { %v759_v45 = vpop.f32.mrb[44].mxu0 }
 0x21f   : > { %v3344_v46 = vpop.f32.mrb[45].mxu0 }
 0x220   : > { %v762_v47 = vpop.f32.mrb[46].mxu0 }
 0x221   : > { %v816_v48 = vpack.c.bf16 %v762_v47, %v759_v45  ;;  %v3345_v49 = vpop.f32.mrb[47].mxu0 }
 0x223   : > { %833 = vmatpush1.bf16.msra.mxu1 %v816_v48 }
 0x224   : > { %834 = vmatprep.subr.bf16.mxu1 %v3885_v0 }
 0x226   : > { %v767_v50 = vpop.f32.mrb[48].mxu0 }
 0x227   : > { %v3348_v51 = vpop.f32.mrb[49].mxu0 }
 0x228   : > { %v770_v52 = vpop.f32.mrb[50].mxu0 }
 0x229   : > { %v817_v53 = vpack.c.bf16 %v770_v52, %v767_v50  ;;  %v3349_v54 = vpop.f32.mrb[51].mxu0 }
 0x22b   : > { %835 = vmatpush1.bf16.msra.mxu1 %v817_v53 }
 0x22c   : > { %836 = vmatprep.subr.bf16.mxu1 %v3885_v0 }
 0x22e   : > { %v775_v55 = vpop.f32.mrb[0].mxu1 }
 0x22f   : > { %v3352_v56 = vpop.f32.mrb[1].mxu1 }
 0x230   : > { %v778_v57 = vpop.f32.mrb[2].mxu1 }
 0x231   : > { %v818_v58 = vpack.c.bf16 %v778_v57, %v775_v55  ;;  %v3353_v59 = vpop.f32.mrb[3].mxu1 }
 0x233   : > { %837 = vmatpush1.bf16.msra.mxu1 %v818_v58 }
 0x234   : > { %838 = vmatprep.subr.bf16.mxu1 %v3885_v0 }
 0x236   : > { %v783_v60 = vpop.f32.mrb[4].mxu1 }
 0x237   : > { %v3356_v61 = vpop.f32.mrb[5].mxu1 }
 0x238   : > { %v786_v62 = vpop.f32.mrb[6].mxu1 }
 0x239   : > { %v819_v63 = vpack.c.bf16 %v786_v62, %v783_v60  ;;  %v3357_v2 = vpop.f32.mrb[7].mxu1 }
 0x23b   : > { %839 = vmatpush1.bf16.msra.mxu1 %v819_v63 }
 0x23c   : > { %840 = vmatprep.subr.bf16.mxu1 %v3885_v0 }
 0x23e   : > { %v791_v3 = vpop.f32.mrb[8].mxu1 }
 0x23f   : > { %v3360_v4 = vpop.f32.mrb[9].mxu1 }
 0x240   : > { %v794_v5 = vpop.f32.mrb[10].mxu1 }
 0x241   : > { %v820_v7 = vpack.c.bf16 %v794_v5, %v791_v3  ;;  %v3361_v8 = vpop.f32.mrb[11].mxu1 }
 0x243   : > { %841 = vmatpush1.bf16.msra.mxu1 %v820_v7 }
 0x244   : > { %842 = vmatprep.subr.bf16.mxu1 %v3885_v0 }
 0x246   : > { %v799_v9 = vpop.f32.mrb[12].mxu1 }
 0x247   : > { %v3364_v10 = vpop.f32.mrb[13].mxu1 }
 0x248   : > { %v802_v11 = vpop.f32.mrb[14].mxu1 }
 0x249   : > { %v821_v12 = vpack.c.bf16 %v802_v11, %v799_v9  ;;  %v3365_v13 = vpop.f32.mrb[15].mxu1 }
 0x24b   : > { %843 = vmatpush1.bf16.msra.mxu1 %v821_v12 }
 0x24c   : > { %844 = vmatprep.subr.bf16.mxu1 %v3885_v0 }
 0x24e   : > { %v807_v14 = vpop.f32.mrb[16].mxu1 }
 0x24f   : > { %v3368_v15 = vpop.f32.mrb[17].mxu1 }
 0x250   : > { %v810_v17 = vpop.f32.mrb[18].mxu1 }
 0x251   : > { %v822_v19 = vpack.c.bf16 %v810_v17, %v807_v14  ;;  %v3369_v35 = vpop.f32.mrb[19].mxu1 }
 0x253   : > { %845 = vmatpush1.bf16.msra.mxu1 %v822_v19 }
 0x254   : > { %1139 = vmatprep.subr.bf16.mxu1 %v3885_v0 }
 0x256   : > { %861 = vmatmul.mubr.bf16.vlgmr.msra.gmra.mrb[20].mxu1 %v4053_v16 }
 0x257   : > { %3094 = vmatprep.mubr.msk.bf16.mxu1 %vm485_vm0, %v4056_v18 }
 0x25e   : > { %869 = vmatmul.mubr.bf16.gmra.mrb[24].mxu1 %v4067_v20 }
 0x25f   : > { %3095 = vmatprep.mubr.msk.bf16.mxu1 %vm485_vm0, %v4070_v21 }
 0x266   : > { %877 = vmatmul.mubr.bf16.gmra.mrb[28].mxu1 %v4078_v22 }
 0x267   : > { %3096 = vmatprep.mubr.msk.bf16.mxu1 %vm485_vm0, %v4081_v23 }
 0x26e   : > { %885 = vmatmul.mubr.bf16.gmra.mrb[32].mxu1 %v4089_v24 }
 0x26f   : > { %3097 = vmatprep.mubr.msk.bf16.mxu1 %vm485_vm0, %v4092_v25 }
 0x276   : > { %893 = vmatmul.mubr.bf16.gmra.mrb[36].mxu1 %v4099_v26 }
 0x277   : > { %3098 = vmatprep.mubr.msk.bf16.mxu1 %vm485_vm0, %v4102_v27 }
 0x27e   : > { %901 = vmatmul.mubr.bf16.gmra.mrb[40].mxu1 %v4108_v28 }
 0x27f   : > { %3099 = vmatprep.mubr.msk.bf16.mxu1 %vm485_vm0, %v4111_v29 }
 0x286   : > { %909 = vmatmul.mubr.bf16.gmra.mrb[44].mxu1 %v4117_v30 }
 0x287   : > { %3100 = vmatprep.mubr.msk.bf16.mxu1 %vm485_vm0, %v4120_v31 }
 0x28e   : > { %917 = vmatmul.mubr.bf16.gmra.mrb[48].mxu1 %v4126_v32 }
 0x28f   : > { %3101 = vmatprep.mubr.msk.bf16.mxu1 %vm485_vm0, %v4129_v33 }
 0x296   : > { %925 = vmatmul.mubr.bf16.gmra.mrb[52].mxu1 %v4135_v34 }
 0x297   : > { %3116 = vmatprep.mubr.msk.bf16.mxu1 %vm485_vm0, %v4034_v6 }
 0x329   : > { %v862_v39 = vpop.f32.mrb[20].mxu1 }
 0x32a   : > { %v863_v40 = vadd.f32 %v4230_v38, %v862_v39  ;;  %v864_v37 = vpop.f32.mrb[21].mxu1 }
 0x32b   : > { %v865_v41 = vpop.f32.mrb[22].mxu1 }
 0x32c   : > { %v866_v42 = vadd.f32 %v4230_v38, %v865_v41  ;;  %v867_v43 = vpop.f32.mrb[23].mxu1  ;;  %v933_v44 = vmax.f32 %v863_v40, 0.0 }
 0x32e   : > { %v934_v45 = vmax.f32 %v866_v42, 0.0 }
 0x330   : > { %v951_v6 = vpack.c.bf16 %v934_v45, %v933_v44 }
 0x331   : > { %v870_v46 = vpop.f32.mrb[24].mxu1 }
 0x332   : > { %v871_v47 = vadd.f32 %v4230_v38, %v870_v46  ;;  %v872_v48 = vpop.f32.mrb[25].mxu1  ;;  %3379 = vmatmul.mubr.msk.bf16.vlgmr.msra.gmra.mrb[52].mxu0 %vm992_vm2, %v951_v6 }
 0x333   : > { %v873_v49 = vpop.f32.mrb[26].mxu1  ;;  %3382 = vmatprep.mubr.msk.bf16.mxu0 %vm3887_vm1, %v3886_v1 }
 0x334   : > { %v874_v50 = vadd.f32 %v4230_v38, %v873_v49  ;;  %v875_v51 = vpop.f32.mrb[27].mxu1  ;;  %v935_v52 = vmax.f32 %v871_v47, 0.0 }
 0x336   : > { %v936_v53 = vmax.f32 %v874_v50, 0.0 }
 0x338   : > { %v952_v54 = vpack.c.bf16 %v936_v53, %v935_v52 }
 0x339   : > { %v878_v55 = vpop.f32.mrb[28].mxu1 }
 0x33a   : > { %v879_v56 = vadd.f32 %v4230_v38, %v878_v55  ;;  %v880_v57 = vpop.f32.mrb[29].mxu1  ;;  %3383 = vmatmul.mubr.msk.bf16.gmra.mrb[56].mxu0 %vm992_vm2, %v952_v54 }
 0x33b   : > { %v881_v58 = vpop.f32.mrb[30].mxu1  ;;  %3386 = vmatprep.mubr.msk.bf16.mxu0 %vm3887_vm1, %v3886_v1 }
 0x33c   : > { %v882_v59 = vadd.f32 %v4230_v38, %v881_v58  ;;  %v883_v60 = vpop.f32.mrb[31].mxu1  ;;  %v937_v61 = vmax.f32 %v879_v56, 0.0 }
 0x33e   : > { %v938_v62 = vmax.f32 %v882_v59, 0.0 }
 0x340   : > { %v953_v63 = vpack.c.bf16 %v938_v62, %v937_v61 }
 0x341   : > { %v886_v2 = vpop.f32.mrb[32].mxu1 }
 0x342   : > { %v887_v3 = vadd.f32 %v4230_v38, %v886_v2  ;;  %v888_v4 = vpop.f32.mrb[33].mxu1  ;;  %3387 = vmatmul.mubr.msk.bf16.gmra.mrb[60].mxu0 %vm992_vm2, %v953_v63 }
 0x343   : > { %v889_v5 = vpop.f32.mrb[34].mxu1  ;;  %3390 = vmatprep.mubr.msk.bf16.mxu0 %vm3887_vm1, %v3886_v1 }
 0x344   : > { %v890_v7 = vadd.f32 %v4230_v38, %v889_v5  ;;  %v891_v8 = vpop.f32.mrb[35].mxu1  ;;  %v939_v9 = vmax.f32 %v887_v3, 0.0 }
 0x346   : > { %v940_v10 = vmax.f32 %v890_v7, 0.0 }
 0x348   : > { %v954_v11 = vpack.c.bf16 %v940_v10, %v939_v9 }
 0x349   : > { %v894_v12 = vpop.f32.mrb[36].mxu1 }
 0x34a   : > { %v895_v13 = vadd.f32 %v4230_v38, %v894_v12  ;;  %v896_v14 = vpop.f32.mrb[37].mxu1  ;;  %3391 = vmatmul.mubr.msk.bf16.gmra.mrb[64].mxu0 %vm992_vm2, %v954_v11 }
 0x34b   : > { %v897_v15 = vpop.f32.mrb[38].mxu1  ;;  %3394 = vmatprep.mubr.msk.bf16.mxu0 %vm3887_vm1, %v3886_v1 }
 0x34c   : > { %v898_v17 = vadd.f32 %v4230_v38, %v897_v15  ;;  %v899_v19 = vpop.f32.mrb[39].mxu1  ;;  %v941_v35 = vmax.f32 %v895_v13, 0.0 }
 0x34e   : > { %v942_v36 = vmax.f32 %v898_v17, 0.0 }
 0x350   : > { %v955_v39 = vpack.c.bf16 %v942_v36, %v941_v35  ;;  %v3736_v36 = vld [vmem:[#allocation2 + $0x60] sm:$0xff]  }
 0x351   : > { %v902_v40 = vpop.f32.mrb[40].mxu1  ;;  %3415 = vmatpush3.bf16.msra.mxu0 %v3736_v36 }
 0x352   : > { %v903_v37 = vadd.f32 %v4230_v38, %v902_v40  ;;  %v904_v41 = vpop.f32.mrb[41].mxu1  ;;  %3395 = vmatmul.mubr.msk.bf16.gmra.mrb[68].mxu0 %vm992_vm2, %v955_v39  ;;  %v3737_v40 = vld [vmem:[#allocation2 + $0x68] sm:$0xff]   ;;  %3416 = vmatprep.subr.bf16.mxu0 %v3886_v1 }
 0x353   : > { %v905_v42 = vpop.f32.mrb[42].mxu1  ;;  %3398 = vmatprep.mubr.msk.bf16.mxu0 %vm3887_vm1, %v3886_v1 }
 0x354   : > { %v906_v43 = vadd.f32 %v4230_v38, %v905_v42  ;;  %v907_v44 = vpop.f32.mrb[43].mxu1  ;;  %v943_v45 = vmax.f32 %v903_v37, 0.0  ;;  %v3738_v42 = vld [vmem:[#allocation2 + $0x70] sm:$0xff]  }
 0x355   : > { %3417 = vmatpush3.bf16.msra.mxu0 %v3737_v40 }
 0x356   : > { %v944_v6 = vmax.f32 %v906_v43, 0.0  ;;  %3418 = vmatprep.subr.bf16.mxu0 %v3886_v1 }
 0x358   : > { %v956_v46 = vpack.c.bf16 %v944_v6, %v943_v45  ;;  %v3739_v6 = vld [vmem:[#allocation2 + $0x78] sm:$0xff]  }
 0x359   : > { %v910_v47 = vpop.f32.mrb[44].mxu1  ;;  %3419 = vmatpush3.bf16.msra.mxu0 %v3738_v42 }
 0x35a   : > { %v911_v48 = vadd.f32 %v4230_v38, %v910_v47  ;;  %v912_v49 = vpop.f32.mrb[45].mxu1  ;;  %3399 = vmatmul.mubr.msk.bf16.gmra.mrb[72].mxu0 %vm992_vm2, %v956_v46  ;;  %3420 = vmatprep.subr.bf16.mxu0 %v3886_v1 }
 0x35b   : > { %v913_v50 = vpop.f32.mrb[46].mxu1  ;;  %3402 = vmatprep.mubr.msk.bf16.mxu0 %vm3887_vm1, %v3886_v1 }
 0x35c   : > { %v914_v51 = vadd.f32 %v4230_v38, %v913_v50  ;;  %v915_v52 = vpop.f32.mrb[47].mxu1  ;;  %v945_v53 = vmax.f32 %v911_v48, 0.0 }
 0x35d   : > { %3421 = vmatpush3.bf16.msra.mxu0 %v3739_v6 }
 0x35e   : > { %v946_v54 = vmax.f32 %v914_v51, 0.0  ;;  %3458 = vmatprep.subr.bf16.mxu0 %v3886_v1 }
 0x360   : > { %v957_v55 = vpack.c.bf16 %v946_v54, %v945_v53 }
 0x361   : > { %v918_v56 = vpop.f32.mrb[48].mxu1 }
 0x362   : > { %v919_v57 = vadd.f32 %v4230_v38, %v918_v56  ;;  %v920_v58 = vpop.f32.mrb[49].mxu1  ;;  %3403 = vmatmul.mubr.msk.bf16.gmra.mrb[76].mxu0 %vm992_vm2, %v957_v55 }
 0x363   : > { %v921_v59 = vpop.f32.mrb[50].mxu1  ;;  %3406 = vmatprep.mubr.msk.bf16.mxu0 %vm3887_vm1, %v3886_v1 }
 0x364   : > { %v922_v60 = vadd.f32 %v4230_v38, %v921_v59  ;;  %v923_v61 = vpop.f32.mrb[51].mxu1  ;;  %v947_v62 = vmax.f32 %v919_v57, 0.0 }
 0x366   : > { %v948_v63 = vmax.f32 %v922_v60, 0.0 }
 0x368   : > { %v958_v2 = vpack.c.bf16 %v948_v63, %v947_v62 }
 0x369   : > { %v926_v3 = vpop.f32.mrb[52].mxu1 }
 0x36a   : > { %v927_v4 = vadd.f32 %v4230_v38, %v926_v3  ;;  %v928_v5 = vpop.f32.mrb[53].mxu1  ;;  %3407 = vmatmul.mubr.msk.bf16.gmra.mrb[80].mxu0 %vm992_vm2, %v958_v2 }
 0x36b   : > { %v929_v7 = vpop.f32.mrb[54].mxu1  ;;  %3410 = vmatprep.mubr.msk.bf16.mxu0 %vm3887_vm1, %v3886_v1 }
 0x36c   : > { %v930_v8 = vadd.f32 %v4230_v38, %v929_v7  ;;  %v931_v9 = vpop.f32.mrb[55].mxu1  ;;  %v949_v10 = vmax.f32 %v927_v4, 0.0 }
 0x36e   : > { %v950_v11 = vmax.f32 %v930_v8, 0.0 }
 0x370   : > { %v959_v12 = vpack.c.bf16 %v950_v11, %v949_v10 }
 0x372   : > { %3411 = vmatmul.mubr.msk.bf16.gmra.mrb[84].mxu0 %vm992_vm2, %v959_v12 }
 0x373   : > { %3422 = vmatprep.mubr.msk.bf16.mxu0 %vm3887_vm1, %v3886_v1 }
 0x405   : > { %v1054_v13 = vpop.f32.mrb[52].mxu0 }
 0x406   : > { %v3380_v14 = vpop.f32.mrb[53].mxu0 }
 0x407   : > { %v1057_v15 = vpop.f32.mrb[54].mxu0 }
 0x408   : > { %v1125_v17 = vpack.c.bf16 %v1057_v15, %v1054_v13  ;;  %v3381_v19 = vpop.f32.mrb[55].mxu0 }
 0x40a   : > { %1140 = vmatpush1.bf16.msra.mxu1 %v1125_v17 }
 0x40b   : > { %1141 = vmatprep.subr.bf16.mxu1 %v3885_v0 }
 0x40d   : > { %v1062_v35 = vpop.f32.mrb[56].mxu0 }
 0x40e   : > { %v3384_v38 = vpop.f32.mrb[57].mxu0 }
 0x40f   : > { %v1065_v39 = vpop.f32.mrb[58].mxu0 }
 0x410   : > { %v1126_v37 = vpack.c.bf16 %v1065_v39, %v1062_v35  ;;  %v3385_v41 = vpop.f32.mrb[59].mxu0 }
 0x412   : > { %1142 = vmatpush1.bf16.msra.mxu1 %v1126_v37 }
 0x413   : > { %1143 = vmatprep.subr.bf16.mxu1 %v3885_v0 }
 0x415   : > { %v1070_v43 = vpop.f32.mrb[60].mxu0 }
 0x416   : > { %v3388_v44 = vpop.f32.mrb[61].mxu0 }
 0x417   : > { %v1073_v45 = vpop.f32.mrb[62].mxu0 }
 0x418   : > { %v1127_v46 = vpack.c.bf16 %v1073_v45, %v1070_v43  ;;  %v3389_v47 = vpop.f32.mrb[63].mxu0 }
 0x41a   : > { %1144 = vmatpush1.bf16.msra.mxu1 %v1127_v46 }
 0x41b   : > { %1145 = vmatprep.subr.bf16.mxu1 %v3885_v0 }
 0x41d   : > { %v1078_v48 = vpop.f32.mrb[64].mxu0 }
 0x41e   : > { %v3392_v49 = vpop.f32.mrb[65].mxu0 }
 0x41f   : > { %v1081_v50 = vpop.f32.mrb[66].mxu0 }
 0x420   : > { %v1128_v51 = vpack.c.bf16 %v1081_v50, %v1078_v48  ;;  %v3393_v52 = vpop.f32.mrb[67].mxu0 }
 0x422   : > { %1146 = vmatpush1.bf16.msra.mxu1 %v1128_v51 }
 0x423   : > { %1147 = vmatprep.subr.bf16.mxu1 %v3885_v0 }
 0x425   : > { %v1086_v53 = vpop.f32.mrb[68].mxu0 }
 0x426   : > { %v3396_v54 = vpop.f32.mrb[69].mxu0 }
 0x427   : > { %v1089_v55 = vpop.f32.mrb[70].mxu0 }
 0x428   : > { %v1129_v56 = vpack.c.bf16 %v1089_v55, %v1086_v53  ;;  %v3397_v57 = vpop.f32.mrb[71].mxu0 }
 0x42a   : > { %1148 = vmatpush1.bf16.msra.mxu1 %v1129_v56 }
 0x42b   : > { %1149 = vmatprep.subr.bf16.mxu1 %v3885_v0 }
 0x42d   : > { %v1094_v58 = vpop.f32.mrb[72].mxu0 }
 0x42e   : > { %v3400_v59 = vpop.f32.mrb[73].mxu0 }
 0x42f   : > { %v1097_v60 = vpop.f32.mrb[74].mxu0 }
 0x430   : > { %v1130_v61 = vpack.c.bf16 %v1097_v60, %v1094_v58  ;;  %v3401_v62 = vpop.f32.mrb[75].mxu0 }
 0x432   : > { %1150 = vmatpush1.bf16.msra.mxu1 %v1130_v61 }
 0x433   : > { %1151 = vmatprep.subr.bf16.mxu1 %v3885_v0 }
 0x435   : > { %v1102_v63 = vpop.f32.mrb[76].mxu0 }
 0x436   : > { %v3404_v2 = vpop.f32.mrb[77].mxu0 }
 0x437   : > { %v1105_v3 = vpop.f32.mrb[78].mxu0 }
 0x438   : > { %v1131_v4 = vpack.c.bf16 %v1105_v3, %v1102_v63  ;;  %v3405_v5 = vpop.f32.mrb[79].mxu0 }
 0x43a   : > { %1152 = vmatpush1.bf16.msra.mxu1 %v1131_v4 }
 0x43b   : > { %1153 = vmatprep.subr.bf16.mxu1 %v3885_v0 }
 0x43d   : > { %v1110_v7 = vpop.f32.mrb[80].mxu0 }
 0x43e   : > { %v3408_v8 = vpop.f32.mrb[81].mxu0 }
 0x43f   : > { %v1113_v9 = vpop.f32.mrb[82].mxu0 }
 0x440   : > { %v1132_v10 = vpack.c.bf16 %v1113_v9, %v1110_v7  ;;  %v3409_v11 = vpop.f32.mrb[83].mxu0 }
 0x442   : > { %1154 = vmatpush1.bf16.msra.mxu1 %v1132_v10 }
 0x443   : > { %1155 = vmatprep.subr.bf16.mxu1 %v3885_v0 }
 0x445   : > { %v1118_v12 = vpop.f32.mrb[84].mxu0 }
 0x446   : > { %v3412_v13 = vpop.f32.mrb[85].mxu0 }
 0x447   : > { %v1121_v14 = vpop.f32.mrb[86].mxu0 }
 0x448   : > { %v1133_v15 = vpack.c.bf16 %v1121_v14, %v1118_v12  ;;  %v3413_v17 = vpop.f32.mrb[87].mxu0 }
 0x44a   : > { %1156 = vmatpush1.bf16.msra.mxu1 %v1133_v15 }
 0x44b   : > { %1449 = vmatprep.subr.bf16.mxu1 %v3885_v0 }
 0x44d   : > { %1172 = vmatmul.mubr.bf16.vlgmr.msra.gmra.mrb[56].mxu1 %v4053_v16  ;;  %v4316_v16 = vld [vmem:[%s4030_s19 + $0x4] ss:$8 sps:$4 sm:$0xff]  }
 0x44e   : > { %3117 = vmatprep.mubr.msk.bf16.mxu1 %vm485_vm0, %v4056_v18  ;;  %v4323_v18 = vld [vmem:[%s5031_s4 + $0x2] ss:$0 sm:$0xff] }
 0x455   : > { %1180 = vmatmul.mubr.bf16.gmra.mrb[60].mxu1 %v4067_v20 }
 0x456   : > { %3118 = vmatprep.mubr.msk.bf16.mxu1 %vm485_vm0, %v4070_v21 }
 0x45d   : > { %1188 = vmatmul.mubr.bf16.gmra.mrb[64].mxu1 %v4078_v22 }
 0x45e   : > { %3119 = vmatprep.mubr.msk.bf16.mxu1 %vm485_vm0, %v4081_v23 }
 0x465   : > { %1196 = vmatmul.mubr.bf16.gmra.mrb[68].mxu1 %v4089_v24 }
 0x466   : > { %3120 = vmatprep.mubr.msk.bf16.mxu1 %vm485_vm0, %v4092_v25 }
 0x46d   : > { %1204 = vmatmul.mubr.bf16.gmra.mrb[72].mxu1 %v4099_v26 }
 0x46e   : > { %3121 = vmatprep.mubr.msk.bf16.mxu1 %vm485_vm0, %v4102_v27 }
 0x475   : > { %1212 = vmatmul.mubr.bf16.gmra.mrb[76].mxu1 %v4108_v28 }
 0x476   : > { %3122 = vmatprep.mubr.msk.bf16.mxu1 %vm485_vm0, %v4111_v29 }
 0x47d   : > { %1220 = vmatmul.mubr.bf16.gmra.mrb[80].mxu1 %v4117_v30 }
 0x47e   : > { %3123 = vmatprep.mubr.msk.bf16.mxu1 %vm485_vm0, %v4120_v31 }
 0x485   : > { %1228 = vmatmul.mubr.bf16.gmra.mrb[84].mxu1 %v4126_v32 }
 0x486   : > { %3124 = vmatprep.mubr.msk.bf16.mxu1 %vm485_vm0, %v4129_v33 }
 0x48d   : > { %1236 = vmatmul.mubr.bf16.gmra.mrb[88].mxu1 %v4135_v34 }
 0x48e   : > { %3139 = vmatprep.mubr.msk.bf16.mxu1 %vm485_vm0, %v4316_v16 }
 0x520   : > { %v1173_v20 = vpop.f32.mrb[56].mxu1 }
 0x521   : > { %v1174_v21 = vadd.f32 %v4323_v18, %v1173_v20  ;;  %v1175_v22 = vpop.f32.mrb[57].mxu1 }
 0x522   : > { %v1176_v23 = vpop.f32.mrb[58].mxu1 }
 0x523   : > { %v1177_v24 = vadd.f32 %v4323_v18, %v1176_v23  ;;  %v1178_v25 = vpop.f32.mrb[59].mxu1  ;;  %v1244_v26 = vmax.f32 %v1174_v21, 0.0 }
 0x525   : > { %v1245_v27 = vmax.f32 %v1177_v24, 0.0 }
 0x527   : > { %v1262_v28 = vpack.c.bf16 %v1245_v27, %v1244_v26 }
 0x528   : > { %v1181_v29 = vpop.f32.mrb[60].mxu1 }
 0x529   : > { %v1182_v30 = vadd.f32 %v4323_v18, %v1181_v29  ;;  %v1183_v31 = vpop.f32.mrb[61].mxu1  ;;  %3423 = vmatmul.mubr.msk.bf16.vlgmr.msra.gmra.mrb[88].mxu0 %vm992_vm2, %v1262_v28 }
 0x52a   : > { %v1184_v32 = vpop.f32.mrb[62].mxu1  ;;  %3426 = vmatprep.mubr.msk.bf16.mxu0 %vm3887_vm1, %v3886_v1 }
 0x52b   : > { %v1185_v33 = vadd.f32 %v4323_v18, %v1184_v32  ;;  %v1186_v34 = vpop.f32.mrb[63].mxu1  ;;  %v1246_v19 = vmax.f32 %v1182_v30, 0.0 }
 0x52d   : > { %v1247_v35 = vmax.f32 %v1185_v33, 0.0 }
 0x52f   : > { %v1263_v36 = vpack.c.bf16 %v1247_v35, %v1246_v19 }
 0x530   : > { %v1189_v38 = vpop.f32.mrb[64].mxu1 }
 0x531   : > { %v1190_v39 = vadd.f32 %v4323_v18, %v1189_v38  ;;  %v1191_v40 = vpop.f32.mrb[65].mxu1  ;;  %3427 = vmatmul.mubr.msk.bf16.gmra.mrb[92].mxu0 %vm992_vm2, %v1263_v36 }
 0x532   : > { %v1192_v37 = vpop.f32.mrb[66].mxu1  ;;  %3430 = vmatprep.mubr.msk.bf16.mxu0 %vm3887_vm1, %v3886_v1 }
 0x533   : > { %v1193_v41 = vadd.f32 %v4323_v18, %v1192_v37  ;;  %v1194_v42 = vpop.f32.mrb[67].mxu1  ;;  %v1248_v43 = vmax.f32 %v1190_v39, 0.0 }
 0x535   : > { %v1249_v44 = vmax.f32 %v1193_v41, 0.0 }
 0x537   : > { %v1264_v45 = vpack.c.bf16 %v1249_v44, %v1248_v43 }
 0x538   : > { %v1197_v6 = vpop.f32.mrb[68].mxu1 }
 0x539   : > { %v1198_v46 = vadd.f32 %v4323_v18, %v1197_v6  ;;  %v1199_v47 = vpop.f32.mrb[69].mxu1  ;;  %3431 = vmatmul.mubr.msk.bf16.gmra.mrb[96].mxu0 %vm992_vm2, %v1264_v45  ;;  %v3740_v6 = vld [vmem:[#allocation2 + $0x80] sm:$0xff]  }
 0x53a   : > { %v1200_v48 = vpop.f32.mrb[70].mxu1  ;;  %3434 = vmatprep.mubr.msk.bf16.mxu0 %vm3887_vm1, %v3886_v1  ;;  %3459 = vmatpush3.bf16.msra.mxu0 %v3740_v6  ;;  %v3741_v47 = vld [vmem:[#allocation2 + $0x88] sm:$0xff]  }
 0x53b   : > { %v1201_v49 = vadd.f32 %v4323_v18, %v1200_v48  ;;  %v1202_v50 = vpop.f32.mrb[71].mxu1  ;;  %v1250_v51 = vmax.f32 %v1198_v46, 0.0  ;;  %3460 = vmatprep.subr.bf16.mxu0 %v3886_v1 }
 0x53d   : > { %v1251_v52 = vmax.f32 %v1201_v49, 0.0 }
 0x53e   : > { %3461 = vmatpush3.bf16.msra.mxu0 %v3741_v47 }
 0x53f   : > { %v1265_v53 = vpack.c.bf16 %v1251_v52, %v1250_v51  ;;  %3498 = vmatprep.subr.bf16.mxu0 %v3886_v1 }
 0x540   : > { %v1205_v54 = vpop.f32.mrb[72].mxu1 }
 0x541   : > { %v1206_v55 = vadd.f32 %v4323_v18, %v1205_v54  ;;  %v1207_v56 = vpop.f32.mrb[73].mxu1  ;;  %3435 = vmatmul.mubr.msk.bf16.gmra.mrb[100].mxu0 %vm992_vm2, %v1265_v53 }
 0x542   : > { %v1208_v57 = vpop.f32.mrb[74].mxu1  ;;  %3438 = vmatprep.mubr.msk.bf16.mxu0 %vm3887_vm1, %v3886_v1 }
 0x543   : > { %v1209_v58 = vadd.f32 %v4323_v18, %v1208_v57  ;;  %v1210_v59 = vpop.f32.mrb[75].mxu1  ;;  %v1252_v60 = vmax.f32 %v1206_v55, 0.0 }
 0x545   : > { %v1253_v61 = vmax.f32 %v1209_v58, 0.0 }
 0x547   : > { %v1266_v62 = vpack.c.bf16 %v1253_v61, %v1252_v60 }
 0x548   : > { %v1213_v63 = vpop.f32.mrb[76].mxu1 }
 0x549   : > { %v1214_v2 = vadd.f32 %v4323_v18, %v1213_v63  ;;  %v1215_v3 = vpop.f32.mrb[77].mxu1  ;;  %3439 = vmatmul.mubr.msk.bf16.gmra.mrb[104].mxu0 %vm992_vm2, %v1266_v62 }
 0x54a   : > { %v1216_v4 = vpop.f32.mrb[78].mxu1  ;;  %3442 = vmatprep.mubr.msk.bf16.mxu0 %vm3887_vm1, %v3886_v1 }
 0x54b   : > { %v1217_v5 = vadd.f32 %v4323_v18, %v1216_v4  ;;  %v1218_v7 = vpop.f32.mrb[79].mxu1  ;;  %v1254_v8 = vmax.f32 %v1214_v2, 0.0 }
 0x54d   : > { %v1255_v9 = vmax.f32 %v1217_v5, 0.0 }
 0x54f   : > { %v1267_v10 = vpack.c.bf16 %v1255_v9, %v1254_v8 }
 0x550   : > { %v1221_v11 = vpop.f32.mrb[80].mxu1 }
 0x551   : > { %v1222_v12 = vadd.f32 %v4323_v18, %v1221_v11  ;;  %v1223_v13 = vpop.f32.mrb[81].mxu1  ;;  %3443 = vmatmul.mubr.msk.bf16.gmra.mrb[108].mxu0 %vm992_vm2, %v1267_v10 }
 0x552   : > { %v1224_v14 = vpop.f32.mrb[82].mxu1  ;;  %3446 = vmatprep.mubr.msk.bf16.mxu0 %vm3887_vm1, %v3886_v1 }
 0x553   : > { %v1225_v15 = vadd.f32 %v4323_v18, %v1224_v14  ;;  %v1226_v17 = vpop.f32.mrb[83].mxu1  ;;  %v1256_v20 = vmax.f32 %v1222_v12, 0.0 }
 0x555   : > { %v1257_v21 = vmax.f32 %v1225_v15, 0.0 }
 0x557   : > { %v1268_v22 = vpack.c.bf16 %v1257_v21, %v1256_v20 }
 0x558   : > { %v1229_v23 = vpop.f32.mrb[84].mxu1 }
 0x559   : > { %v1230_v24 = vadd.f32 %v4323_v18, %v1229_v23  ;;  %v1231_v25 = vpop.f32.mrb[85].mxu1  ;;  %3447 = vmatmul.mubr.msk.bf16.gmra.mrb[112].mxu0 %vm992_vm2, %v1268_v22 }
 0x55a   : > { %v1232_v26 = vpop.f32.mrb[86].mxu1  ;;  %3450 = vmatprep.mubr.msk.bf16.mxu0 %vm3887_vm1, %v3886_v1 }
 0x55b   : > { %v1233_v27 = vadd.f32 %v4323_v18, %v1232_v26  ;;  %v1234_v28 = vpop.f32.mrb[87].mxu1  ;;  %v1258_v29 = vmax.f32 %v1230_v24, 0.0 }
 0x55c   : > { %v4386_v28 = vld [vmem:[%s4030_s19 + $0x14] ss:$8 sps:$4 sm:$0xff]  }
 0x55d   : > { %v1259_v30 = vmax.f32 %v1233_v27, 0.0  ;;  %v4382_v27 = vld [vmem:[%s4030_s19] ss:$8 sps:$4 sm:$0xff]  }
 0x55f   : > { %v1269_v31 = vpack.c.bf16 %v1259_v30, %v1258_v29  ;;  %v4391_v29 = vld [vmem:[%s4030_s19 + $0x10] ss:$8 sps:$4 sm:$0xff]   ;;  %v4395_v30 = vld [vmem:[%s4030_s19 + $0x24] ss:$8 sps:$4 sm:$0xff]  }
 0x560   : > { %v1237_v32 = vpop.f32.mrb[88].mxu1 }
 0x561   : > { %v1238_v33 = vadd.f32 %v4323_v18, %v1237_v32  ;;  %v1239_v34 = vpop.f32.mrb[89].mxu1  ;;  %3451 = vmatmul.mubr.msk.bf16.gmra.mrb[116].mxu0 %vm992_vm2, %v1269_v31  ;;  %v4400_v31 = vld [vmem:[%s4030_s19 + $0x20] ss:$8 sps:$4 sm:$0xff]   ;;  %v4404_v32 = vld [vmem:[%s4030_s19 + $0x34] ss:$8 sps:$4 sm:$0xff]  }
 0x562   : > { %v1240_v19 = vpop.f32.mrb[90].mxu1  ;;  %3454 = vmatprep.mubr.msk.bf16.mxu0 %vm3887_vm1, %v3886_v1  ;;  %v4413_v34 = vld [vmem:[%s4030_s19 + $0x44] ss:$8 sps:$4 sm:$0xff]  }
 0x563   : > { %v1241_v35 = vadd.f32 %v4323_v18, %v1240_v19  ;;  %v1242_v36 = vpop.f32.mrb[91].mxu1  ;;  %v1260_v38 = vmax.f32 %v1238_v33, 0.0  ;;  %v4409_v33 = vld [vmem:[%s4030_s19 + $0x30] ss:$8 sps:$4 sm:$0xff]   ;;  %v4418_v19 = vld [vmem:[%s4030_s19 + $0x40] ss:$8 sps:$4 sm:$0xff]  }
 0x564   : > { %v4427_v36 = vld [vmem:[%s4030_s19 + $0x50] ss:$8 sps:$4 sm:$0xff]  }
 0x565   : > { %v1261_v39 = vmax.f32 %v1241_v35, 0.0  ;;  %v4422_v35 = vld [vmem:[%s4030_s19 + $0x54] ss:$8 sps:$4 sm:$0xff]  }
 0x567   : > { %v1270_v40 = vpack.c.bf16 %v1261_v39, %v1260_v38  ;;  %v4431_v38 = vld [vmem:[%s4030_s19 + $0x64] ss:$8 sps:$4 sm:$0xff]   ;;  %v4436_v39 = vld [vmem:[%s4030_s19 + $0x60] ss:$8 sps:$4 sm:$0xff]  }
 0x569   : > { %3455 = vmatmul.mubr.msk.bf16.gmra.mrb[120].mxu0 %vm992_vm2, %v1270_v40  ;;  %v4440_v40 = vld [vmem:[%s4030_s19 + $0x74] ss:$8 sps:$4 sm:$0xff]  }
 0x56a   : > { %3462 = vmatprep.mubr.msk.bf16.mxu0 %vm3887_vm1, %v3886_v1 }
 0x5fc   : > { %v1364_v37 = vpop.f32.mrb[88].mxu0 }
 0x5fd   : > { %v3424_v41 = vpop.f32.mrb[89].mxu0 }
 0x5fe   : > { %v1367_v42 = vpop.f32.mrb[90].mxu0  ;;  %v4449_v41 = vld [vmem:[%s4030_s19 + $0x84] ss:$8 sps:$4 sm:$0xff]  }
 0x5ff   : > { %v1435_v43 = vpack.c.bf16 %v1367_v42, %v1364_v37  ;;  %v3425_v44 = vpop.f32.mrb[91].mxu0  ;;  %v4445_v37 = vld [vmem:[%s4030_s19 + $0x70] ss:$8 sps:$4 sm:$0xff]   ;;  %v4454_v42 = vld [vmem:[%s4030_s19 + $0x80] ss:$8 sps:$4 sm:$0xff]  }
 0x601   : > { %1450 = vmatpush1.bf16.msra.mxu1 %v1435_v43  ;;  %v4462_v43 = vld [vmem:[%s5031_s4 + $0x3] ss:$0 sm:$0xff] }
 0x602   : > { %1451 = vmatprep.subr.bf16.mxu1 %v3885_v0 }
 0x604   : > { %v1372_v45 = vpop.f32.mrb[92].mxu0 }
 0x605   : > { %v3428_v18 = vpop.f32.mrb[93].mxu0 }
 0x606   : > { %v1375_v46 = vpop.f32.mrb[94].mxu0 }
 0x607   : > { %v1436_v48 = vpack.c.bf16 %v1375_v46, %v1372_v45  ;;  %v3429_v49 = vpop.f32.mrb[95].mxu0 }
 0x609   : > { %1452 = vmatpush1.bf16.msra.mxu1 %v1436_v48 }
 0x60a   : > { %1453 = vmatprep.subr.bf16.mxu1 %v3885_v0 }
 0x60c   : > { %v1380_v50 = vpop.f32.mrb[96].mxu0 }
 0x60d   : > { %v3432_v51 = vpop.f32.mrb[97].mxu0 }
 0x60e   : > { %v1383_v52 = vpop.f32.mrb[98].mxu0 }
 0x60f   : > { %v1437_v53 = vpack.c.bf16 %v1383_v52, %v1380_v50  ;;  %v3433_v54 = vpop.f32.mrb[99].mxu0 }
 0x611   : > { %1454 = vmatpush1.bf16.msra.mxu1 %v1437_v53 }
 0x612   : > { %1455 = vmatprep.subr.bf16.mxu1 %v3885_v0 }
 0x614   : > { %v1388_v55 = vpop.f32.mrb[100].mxu0 }
 0x615   : > { %v3436_v56 = vpop.f32.mrb[101].mxu0 }
 0x616   : > { %v1391_v57 = vpop.f32.mrb[102].mxu0 }
 0x617   : > { %v1438_v58 = vpack.c.bf16 %v1391_v57, %v1388_v55  ;;  %v3437_v59 = vpop.f32.mrb[103].mxu0 }
 0x619   : > { %1456 = vmatpush1.bf16.msra.mxu1 %v1438_v58 }
 0x61a   : > { %1457 = vmatprep.subr.bf16.mxu1 %v3885_v0 }
 0x61c   : > { %v1396_v60 = vpop.f32.mrb[104].mxu0 }
 0x61d   : > { %v3440_v61 = vpop.f32.mrb[105].mxu0 }
 0x61e   : > { %v1399_v62 = vpop.f32.mrb[106].mxu0 }
 0x61f   : > { %v1439_v63 = vpack.c.bf16 %v1399_v62, %v1396_v60  ;;  %v3441_v2 = vpop.f32.mrb[107].mxu0 }
 0x621   : > { %1458 = vmatpush1.bf16.msra.mxu1 %v1439_v63 }
 0x622   : > { %1459 = vmatprep.subr.bf16.mxu1 %v3885_v0 }
 0x624   : > { %v1404_v3 = vpop.f32.mrb[108].mxu0 }
 0x625   : > { %v3444_v4 = vpop.f32.mrb[109].mxu0 }
 0x626   : > { %v1407_v5 = vpop.f32.mrb[110].mxu0 }
 0x627   : > { %v1440_v7 = vpack.c.bf16 %v1407_v5, %v1404_v3  ;;  %v3445_v8 = vpop.f32.mrb[111].mxu0 }
 0x629   : > { %1460 = vmatpush1.bf16.msra.mxu1 %v1440_v7 }
 0x62a   : > { %1461 = vmatprep.subr.bf16.mxu1 %v3885_v0 }
 0x62c   : > { %v1412_v9 = vpop.f32.mrb[112].mxu0 }
 0x62d   : > { %v3448_v10 = vpop.f32.mrb[113].mxu0 }
 0x62e   : > { %v1415_v11 = vpop.f32.mrb[114].mxu0 }
 0x62f   : > { %v1441_v12 = vpack.c.bf16 %v1415_v11, %v1412_v9  ;;  %v3449_v13 = vpop.f32.mrb[115].mxu0 }
 0x631   : > { %1462 = vmatpush1.bf16.msra.mxu1 %v1441_v12 }
 0x632   : > { %1463 = vmatprep.subr.bf16.mxu1 %v3885_v0 }
 0x634   : > { %v1420_v14 = vpop.f32.mrb[116].mxu0 }
 0x635   : > { %v3452_v15 = vpop.f32.mrb[117].mxu0 }
 0x636   : > { %v1423_v17 = vpop.f32.mrb[118].mxu0 }
 0x637   : > { %v1442_v20 = vpack.c.bf16 %v1423_v17, %v1420_v14  ;;  %v3453_v21 = vpop.f32.mrb[119].mxu0 }
 0x639   : > { %1464 = vmatpush1.bf16.msra.mxu1 %v1442_v20 }
 0x63a   : > { %1465 = vmatprep.subr.bf16.mxu1 %v3885_v0 }
 0x63c   : > { %v1428_v22 = vpop.f32.mrb[120].mxu0 }
 0x63d   : > { %v3456_v23 = vpop.f32.mrb[121].mxu0 }
 0x63e   : > { %v1431_v24 = vpop.f32.mrb[122].mxu0 }
 0x63f   : > { %v1443_v25 = vpack.c.bf16 %v1431_v24, %v1428_v22  ;;  %v3457_v26 = vpop.f32.mrb[123].mxu0 }
 0x641   : > { %1466 = vmatpush1.bf16.msra.mxu1 %v1443_v25 }
 0x642   : > { %1744 = vmatprep.subr.bf16.mxu1 %v3885_v0 }
 0x644   : > { %1482 = vmatmul.mubr.bf16.vlgmr.msra.gmra.mrb[92].mxu1 %v4382_v27 }
 0x645   : > { %3140 = vmatprep.mubr.msk.bf16.mxu1 %vm485_vm0, %v4386_v28 }
 0x64c   : > { %1490 = vmatmul.mubr.bf16.gmra.mrb[96].mxu1 %v4391_v29 }
 0x64d   : > { %3141 = vmatprep.mubr.msk.bf16.mxu1 %vm485_vm0, %v4395_v30 }
 0x654   : > { %1498 = vmatmul.mubr.bf16.gmra.mrb[100].mxu1 %v4400_v31 }
 0x655   : > { %3142 = vmatprep.mubr.msk.bf16.mxu1 %vm485_vm0, %v4404_v32 }
 0x65c   : > { %1506 = vmatmul.mubr.bf16.gmra.mrb[104].mxu1 %v4409_v33 }
 0x65d   : > { %3143 = vmatprep.mubr.msk.bf16.mxu1 %vm485_vm0, %v4413_v34 }
 0x664   : > { %1514 = vmatmul.mubr.bf16.gmra.mrb[108].mxu1 %v4418_v19 }
 0x665   : > { %3144 = vmatprep.mubr.msk.bf16.mxu1 %vm485_vm0, %v4422_v35 }
 0x66c   : > { %1522 = vmatmul.mubr.bf16.gmra.mrb[112].mxu1 %v4427_v36 }
 0x66d   : > { %3145 = vmatprep.mubr.msk.bf16.mxu1 %vm485_vm0, %v4431_v38 }
 0x674   : > { %1530 = vmatmul.mubr.bf16.gmra.mrb[116].mxu1 %v4436_v39 }
 0x675   : > { %3146 = vmatprep.mubr.msk.bf16.mxu1 %vm485_vm0, %v4440_v40 }
 0x67c   : > { %1538 = vmatmul.mubr.bf16.gmra.mrb[120].mxu1 %v4445_v37 }
 0x67d   : > { %3147 = vmatprep.mubr.msk.bf16.mxu1 %vm485_vm0, %v4449_v41 }
 0x684   : > { %1546 = vmatmul.mubr.bf16.gmra.mrb[124].mxu1 %v4454_v42 }
 0x685   : > { %3160 = vmatprep.mubr.msk.bf16.mxu1 %vm485_vm0, %v4316_v16 }
 0x717   : > { %v1483_v44 = vpop.f32.mrb[92].mxu1 }
 0x718   : > { %v1484_v45 = vadd.f32 %v4462_v43, %v1483_v44  ;;  %v1485_v6 = vpop.f32.mrb[93].mxu1 }
 0x719   : > { %v1486_v18 = vpop.f32.mrb[94].mxu1 }
 0x71a   : > { %v1487_v46 = vadd.f32 %v4462_v43, %v1486_v18  ;;  %v1488_v47 = vpop.f32.mrb[95].mxu1  ;;  %v1554_v48 = vmax.f32 %v1484_v45, 0.0 }
 0x71c   : > { %v1555_v49 = vmax.f32 %v1487_v46, 0.0 }
 0x71e   : > { %v1572_v50 = vpack.c.bf16 %v1555_v49, %v1554_v48 }
 0x71f   : > { %v1491_v51 = vpop.f32.mrb[96].mxu1 }
 0x720   : > { %v1492_v52 = vadd.f32 %v4462_v43, %v1491_v51  ;;  %v1493_v53 = vpop.f32.mrb[97].mxu1  ;;  %3463 = vmatmul.mubr.msk.bf16.vlgmr.msra.gmra.mrb[124].mxu0 %vm1597_vm3, %v1572_v50 }
 0x721   : > { %v1494_v54 = vpop.f32.mrb[98].mxu1  ;;  %3466 = vmatprep.mubr.msk.bf16.mxu0 %vm3887_vm1, %v3886_v1 }
 0x722   : > { %v1495_v55 = vadd.f32 %v4462_v43, %v1494_v54  ;;  %v1496_v56 = vpop.f32.mrb[99].mxu1  ;;  %v1556_v57 = vmax.f32 %v1492_v52, 0.0 }
 0x724   : > { %v1557_v58 = vmax.f32 %v1495_v55, 0.0 }
 0x726   : > { %v1573_v59 = vpack.c.bf16 %v1557_v58, %v1556_v57 }
 0x727   : > { %v1499_v60 = vpop.f32.mrb[100].mxu1 }
 0x728   : > { %v1500_v61 = vadd.f32 %v4462_v43, %v1499_v60  ;;  %v1501_v62 = vpop.f32.mrb[101].mxu1  ;;  %3467 = vmatmul.mubr.msk.bf16.gmra.mrb[128].mxu0 %vm1597_vm3, %v1573_v59 }
 0x729   : > { %v1502_v63 = vpop.f32.mrb[102].mxu1  ;;  %3470 = vmatprep.mubr.msk.bf16.mxu0 %vm3887_vm1, %v3886_v1 }
 0x72a   : > { %v1503_v2 = vadd.f32 %v4462_v43, %v1502_v63  ;;  %v1504_v3 = vpop.f32.mrb[103].mxu1  ;;  %v1558_v4 = vmax.f32 %v1500_v61, 0.0 }
 0x72c   : > { %v1559_v5 = vmax.f32 %v1503_v2, 0.0 }
 0x72e   : > { %v1574_v7 = vpack.c.bf16 %v1559_v5, %v1558_v4 }
 0x72f   : > { %v1507_v8 = vpop.f32.mrb[104].mxu1 }
 0x730   : > { %v1508_v9 = vadd.f32 %v4462_v43, %v1507_v8  ;;  %v1509_v10 = vpop.f32.mrb[105].mxu1  ;;  %3471 = vmatmul.mubr.msk.bf16.gmra.mrb[132].mxu0 %vm1597_vm3, %v1574_v7 }
 0x731   : > { %v1510_v11 = vpop.f32.mrb[106].mxu1  ;;  %3474 = vmatprep.mubr.msk.bf16.mxu0 %vm3887_vm1, %v3886_v1 }
 0x732   : > { %v1511_v12 = vadd.f32 %v4462_v43, %v1510_v11  ;;  %v1512_v13 = vpop.f32.mrb[107].mxu1  ;;  %v1560_v14 = vmax.f32 %v1508_v9, 0.0 }
 0x734   : > { %v1561_v15 = vmax.f32 %v1511_v12, 0.0 }
 0x736   : > { %v1575_v17 = vpack.c.bf16 %v1561_v15, %v1560_v14 }
 0x737   : > { %v1515_v20 = vpop.f32.mrb[108].mxu1 }
 0x738   : > { %v1516_v21 = vadd.f32 %v4462_v43, %v1515_v20  ;;  %v1517_v22 = vpop.f32.mrb[109].mxu1  ;;  %3475 = vmatmul.mubr.msk.bf16.gmra.mrb[136].mxu0 %vm1597_vm3, %v1575_v17 }
 0x739   : > { %v1518_v23 = vpop.f32.mrb[110].mxu1  ;;  %3478 = vmatprep.mubr.msk.bf16.mxu0 %vm3887_vm1, %v3886_v1 }
 0x73a   : > { %v1519_v24 = vadd.f32 %v4462_v43, %v1518_v23  ;;  %v1520_v25 = vpop.f32.mrb[111].mxu1  ;;  %v1562_v26 = vmax.f32 %v1516_v21, 0.0 }
 0x73c   : > { %v1563_v44 = vmax.f32 %v1519_v24, 0.0 }
 0x73e   : > { %v1576_v45 = vpack.c.bf16 %v1563_v44, %v1562_v26 }
 0x73f   : > { %v1523_v6 = vpop.f32.mrb[112].mxu1 }
 0x740   : > { %v1524_v18 = vadd.f32 %v4462_v43, %v1523_v6  ;;  %v1525_v46 = vpop.f32.mrb[113].mxu1  ;;  %3479 = vmatmul.mubr.msk.bf16.gmra.mrb[140].mxu0 %vm1597_vm3, %v1576_v45  ;;  %v3742_v45 = vld [vmem:[#allocation2 + $0x90] sm:$0xff]  }
 0x741   : > { %v1526_v47 = vpop.f32.mrb[114].mxu1  ;;  %3482 = vmatprep.mubr.msk.bf16.mxu0 %vm3887_vm1, %v3886_v1  ;;  %3499 = vmatpush3.bf16.msra.mxu0 %v3742_v45 }
 0x742   : > { %v1527_v48 = vadd.f32 %v4462_v43, %v1526_v47  ;;  %v1528_v49 = vpop.f32.mrb[115].mxu1  ;;  %v1564_v50 = vmax.f32 %v1524_v18, 0.0  ;;  %v3743_v18 = vld [vmem:[#allocation2 + $0x98] sm:$0xff]   ;;  %3500 = vmatprep.subr.bf16.mxu0 %v3886_v1 }
 0x744   : > { %v1565_v51 = vmax.f32 %v1527_v48, 0.0 }
 0x745   : > { %3501 = vmatpush3.bf16.msra.mxu0 %v3743_v18 }
 0x746   : > { %v1577_v52 = vpack.c.bf16 %v1565_v51, %v1564_v50  ;;  %3538 = vmatprep.subr.bf16.mxu0 %v3886_v1 }
 0x747   : > { %v1531_v53 = vpop.f32.mrb[116].mxu1 }
 0x748   : > { %v1532_v54 = vadd.f32 %v4462_v43, %v1531_v53  ;;  %v1533_v55 = vpop.f32.mrb[117].mxu1  ;;  %3483 = vmatmul.mubr.msk.bf16.gmra.mrb[144].mxu0 %vm1597_vm3, %v1577_v52 }
 0x749   : > { %v1534_v56 = vpop.f32.mrb[118].mxu1  ;;  %3486 = vmatprep.mubr.msk.bf16.mxu0 %vm3887_vm1, %v3886_v1 }
 0x74a   : > { %v1535_v57 = vadd.f32 %v4462_v43, %v1534_v56  ;;  %v1536_v58 = vpop.f32.mrb[119].mxu1  ;;  %v1566_v59 = vmax.f32 %v1532_v54, 0.0 }
 0x74c   : > { %v1567_v60 = vmax.f32 %v1535_v57, 0.0 }
 0x74e   : > { %v1578_v61 = vpack.c.bf16 %v1567_v60, %v1566_v59 }
 0x74f   : > { %v1539_v62 = vpop.f32.mrb[120].mxu1 }
 0x750   : > { %v1540_v63 = vadd.f32 %v4462_v43, %v1539_v62  ;;  %v1541_v2 = vpop.f32.mrb[121].mxu1  ;;  %3487 = vmatmul.mubr.msk.bf16.gmra.mrb[148].mxu0 %vm1597_vm3, %v1578_v61 }
 0x751   : > { %v1542_v3 = vpop.f32.mrb[122].mxu1  ;;  %3490 = vmatprep.mubr.msk.bf16.mxu0 %vm3887_vm1, %v3886_v1 }
 0x752   : > { %v1543_v4 = vadd.f32 %v4462_v43, %v1542_v3  ;;  %v1544_v5 = vpop.f32.mrb[123].mxu1  ;;  %v1568_v7 = vmax.f32 %v1540_v63, 0.0 }
 0x754   : > { %v1569_v8 = vmax.f32 %v1543_v4, 0.0 }
 0x756   : > { %v1579_v9 = vpack.c.bf16 %v1569_v8, %v1568_v7 }
 0x757   : > { %v1547_v10 = vpop.f32.mrb[124].mxu1 }
 0x758   : > { %v1548_v11 = vadd.f32 %v4462_v43, %v1547_v10  ;;  %v1549_v12 = vpop.f32.mrb[125].mxu1  ;;  %3491 = vmatmul.mubr.msk.bf16.gmra.mrb[152].mxu0 %vm1597_vm3, %v1579_v9 }
 0x759   : > { %v1550_v13 = vpop.f32.mrb[126].mxu1  ;;  %3494 = vmatprep.mubr.msk.bf16.mxu0 %vm3887_vm1, %v3886_v1 }
 0x75a   : > { %v1551_v14 = vadd.f32 %v4462_v43, %v1550_v13  ;;  %v1552_v15 = vpop.f32.mrb[127].mxu1  ;;  %v1570_v17 = vmax.f32 %v1548_v11, 0.0 }
 0x75c   : > { %v1571_v20 = vmax.f32 %v1551_v14, 0.0 }
 0x75e   : > { %v1580_v21 = vpack.c.bf16 %v1571_v20, %v1570_v17 }
 0x760   : > { %3495 = vmatmul.mubr.msk.bf16.gmra.mrb[156].mxu0 %vm1597_vm3, %v1580_v21 }
 0x761   : > { %3502 = vmatprep.mubr.msk.bf16.mxu0 %vm3887_vm1, %v3886_v1 }
 0x7f3   : > { %v1659_v22 = vpop.f32.mrb[124].mxu0 }
 0x7f4   : > { %v3464_v23 = vpop.f32.mrb[125].mxu0 }
 0x7f5   : > { %v1662_v24 = vpop.f32.mrb[126].mxu0 }
 0x7f6   : > { %v1730_v25 = vpack.c.bf16 %v1662_v24, %v1659_v22  ;;  %v3465_v26 = vpop.f32.mrb[127].mxu0 }
 0x7f8   : > { %1745 = vmatpush1.bf16.msra.mxu1 %v1730_v25  ;;  %v4550_v25 = vld [vmem:[%s5031_s4 + $0x4] ss:$0 sm:$0xff] }
 0x7f9   : > { %1746 = vmatprep.subr.bf16.mxu1 %v3885_v0 }
 0x7fb   : > { %v1667_v44 = vpop.f32.mrb[128].mxu0 }
 0x7fc   : > { %v3468_v43 = vpop.f32.mrb[129].mxu0 }
 0x7fd   : > { %v1670_v6 = vpop.f32.mrb[130].mxu0 }
 0x7fe   : > { %v1731_v46 = vpack.c.bf16 %v1670_v6, %v1667_v44  ;;  %v3469_v47 = vpop.f32.mrb[131].mxu0 }
 0x800   : > { %1747 = vmatpush1.bf16.msra.mxu1 %v1731_v46 }
 0x801   : > { %1748 = vmatprep.subr.bf16.mxu1 %v3885_v0 }
 0x803   : > { %v1675_v48 = vpop.f32.mrb[132].mxu0 }
 0x804   : > { %v3472_v49 = vpop.f32.mrb[133].mxu0 }
 0x805   : > { %v1678_v50 = vpop.f32.mrb[134].mxu0 }
 0x806   : > { %v1732_v51 = vpack.c.bf16 %v1678_v50, %v1675_v48  ;;  %v3473_v52 = vpop.f32.mrb[135].mxu0 }
 0x808   : > { %1749 = vmatpush1.bf16.msra.mxu1 %v1732_v51 }
 0x809   : > { %1750 = vmatprep.subr.bf16.mxu1 %v3885_v0 }
 0x80b   : > { %v1683_v53 = vpop.f32.mrb[136].mxu0 }
 0x80c   : > { %v3476_v54 = vpop.f32.mrb[137].mxu0 }
 0x80d   : > { %v1686_v55 = vpop.f32.mrb[138].mxu0 }
 0x80e   : > { %v1733_v56 = vpack.c.bf16 %v1686_v55, %v1683_v53  ;;  %v3477_v57 = vpop.f32.mrb[139].mxu0 }
 0x810   : > { %1751 = vmatpush1.bf16.msra.mxu1 %v1733_v56 }
 0x811   : > { %1752 = vmatprep.subr.bf16.mxu1 %v3885_v0 }
 0x813   : > { %v1691_v58 = vpop.f32.mrb[140].mxu0 }
 0x814   : > { %v3480_v59 = vpop.f32.mrb[141].mxu0 }
 0x815   : > { %v1694_v60 = vpop.f32.mrb[142].mxu0 }
 0x816   : > { %v1734_v61 = vpack.c.bf16 %v1694_v60, %v1691_v58  ;;  %v3481_v62 = vpop.f32.mrb[143].mxu0 }
 0x818   : > { %1753 = vmatpush1.bf16.msra.mxu1 %v1734_v61 }
 0x819   : > { %1754 = vmatprep.subr.bf16.mxu1 %v3885_v0 }
 0x81b   : > { %v1699_v63 = vpop.f32.mrb[144].mxu0 }
 0x81c   : > { %v3484_v2 = vpop.f32.mrb[145].mxu0 }
 0x81d   : > { %v1702_v3 = vpop.f32.mrb[146].mxu0 }
 0x81e   : > { %v1735_v4 = vpack.c.bf16 %v1702_v3, %v1699_v63  ;;  %v3485_v5 = vpop.f32.mrb[147].mxu0 }
 0x820   : > { %1755 = vmatpush1.bf16.msra.mxu1 %v1735_v4 }
 0x821   : > { %1756 = vmatprep.subr.bf16.mxu1 %v3885_v0 }
 0x823   : > { %v1707_v7 = vpop.f32.mrb[148].mxu0 }
 0x824   : > { %v3488_v8 = vpop.f32.mrb[149].mxu0 }
 0x825   : > { %v1710_v9 = vpop.f32.mrb[150].mxu0 }
 0x826   : > { %v1736_v10 = vpack.c.bf16 %v1710_v9, %v1707_v7  ;;  %v3489_v11 = vpop.f32.mrb[151].mxu0 }
 0x828   : > { %1757 = vmatpush1.bf16.msra.mxu1 %v1736_v10 }
 0x829   : > { %1758 = vmatprep.subr.bf16.mxu1 %v3885_v0 }
 0x82b   : > { %v1715_v12 = vpop.f32.mrb[152].mxu0 }
 0x82c   : > { %v3492_v13 = vpop.f32.mrb[153].mxu0 }
 0x82d   : > { %v1718_v14 = vpop.f32.mrb[154].mxu0 }
 0x82e   : > { %v1737_v15 = vpack.c.bf16 %v1718_v14, %v1715_v12  ;;  %v3493_v17 = vpop.f32.mrb[155].mxu0 }
 0x830   : > { %1759 = vmatpush1.bf16.msra.mxu1 %v1737_v15 }
 0x831   : > { %1760 = vmatprep.subr.bf16.mxu1 %v3885_v0 }
 0x833   : > { %v1723_v20 = vpop.f32.mrb[156].mxu0 }
 0x834   : > { %v3496_v21 = vpop.f32.mrb[157].mxu0 }
 0x835   : > { %v1726_v22 = vpop.f32.mrb[158].mxu0 }
 0x836   : > { %v1738_v23 = vpack.c.bf16 %v1726_v22, %v1723_v20  ;;  %v3497_v24 = vpop.f32.mrb[159].mxu0 }
 0x838   : > { %1761 = vmatpush1.bf16.msra.mxu1 %v1738_v23 }
 0x839   : > { %2038 = vmatprep.subr.bf16.mxu1 %v3885_v0 }
 0x83b   : > { %1777 = vmatmul.mubr.bf16.vlgmr.msra.gmra.mrb[128].mxu1 %v4382_v27 }
 0x83c   : > { %3161 = vmatprep.mubr.msk.bf16.mxu1 %vm485_vm0, %v4386_v28 }
 0x843   : > { %1785 = vmatmul.mubr.bf16.gmra.mrb[132].mxu1 %v4391_v29 }
 0x844   : > { %3162 = vmatprep.mubr.msk.bf16.mxu1 %vm485_vm0, %v4395_v30 }
 0x84b   : > { %1793 = vmatmul.mubr.bf16.gmra.mrb[136].mxu1 %v4400_v31 }
 0x84c   : > { %3163 = vmatprep.mubr.msk.bf16.mxu1 %vm485_vm0, %v4404_v32 }
 0x853   : > { %1801 = vmatmul.mubr.bf16.gmra.mrb[140].mxu1 %v4409_v33 }
 0x854   : > { %3164 = vmatprep.mubr.msk.bf16.mxu1 %vm485_vm0, %v4413_v34 }
 0x85b   : > { %1809 = vmatmul.mubr.bf16.gmra.mrb[144].mxu1 %v4418_v19 }
 0x85c   : > { %3165 = vmatprep.mubr.msk.bf16.mxu1 %vm485_vm0, %v4422_v35 }
 0x863   : > { %1817 = vmatmul.mubr.bf16.gmra.mrb[148].mxu1 %v4427_v36 }
 0x864   : > { %3166 = vmatprep.mubr.msk.bf16.mxu1 %vm485_vm0, %v4431_v38 }
 0x86b   : > { %1825 = vmatmul.mubr.bf16.gmra.mrb[152].mxu1 %v4436_v39 }
 0x86c   : > { %3167 = vmatprep.mubr.msk.bf16.mxu1 %vm485_vm0, %v4440_v40 }
 0x873   : > { %1833 = vmatmul.mubr.bf16.gmra.mrb[156].mxu1 %v4445_v37 }
 0x874   : > { %3168 = vmatprep.mubr.msk.bf16.mxu1 %vm485_vm0, %v4449_v41 }
 0x87b   : > { %1841 = vmatmul.mubr.bf16.gmra.mrb[160].mxu1 %v4454_v42 }
 0x87c   : > { %3181 = vmatprep.mubr.msk.bf16.mxu1 %vm485_vm0, %v4316_v16 }
 0x90e   : > { %v1778_v26 = vpop.f32.mrb[128].mxu1 }
 0x90f   : > { %v1779_v44 = vadd.f32 %v4550_v25, %v1778_v26  ;;  %v1780_v45 = vpop.f32.mrb[129].mxu1 }
 0x910   : > { %v1781_v43 = vpop.f32.mrb[130].mxu1 }
 0x911   : > { %v1782_v6 = vadd.f32 %v4550_v25, %v1781_v43  ;;  %v1783_v18 = vpop.f32.mrb[131].mxu1  ;;  %v1849_v46 = vmax.f32 %v1779_v44, 0.0 }
 0x913   : > { %v1850_v47 = vmax.f32 %v1782_v6, 0.0 }
 0x915   : > { %v1867_v48 = vpack.c.bf16 %v1850_v47, %v1849_v46 }
 0x916   : > { %v1786_v49 = vpop.f32.mrb[132].mxu1 }
 0x917   : > { %v1787_v50 = vadd.f32 %v4550_v25, %v1786_v49  ;;  %v1788_v16 = vpop.f32.mrb[133].mxu1  ;;  %3503 = vmatmul.mubr.msk.bf16.vlgmr.msra.gmra.mrb[160].mxu0 %vm1597_vm3, %v1867_v48 }
 0x918   : > { %v1789_v51 = vpop.f32.mrb[134].mxu1  ;;  %3506 = vmatprep.mubr.msk.bf16.mxu0 %vm3887_vm1, %v3886_v1 }
 0x919   : > { %v1790_v52 = vadd.f32 %v4550_v25, %v1789_v51  ;;  %v1791_v53 = vpop.f32.mrb[135].mxu1  ;;  %v1851_v54 = vmax.f32 %v1787_v50, 0.0 }
 0x91b   : > { %v1852_v55 = vmax.f32 %v1790_v52, 0.0 }
 0x91d   : > { %v1868_v56 = vpack.c.bf16 %v1852_v55, %v1851_v54 }
 0x91e   : > { %v1794_v57 = vpop.f32.mrb[136].mxu1 }
 0x91f   : > { %v1795_v58 = vadd.f32 %v4550_v25, %v1794_v57  ;;  %v1796_v59 = vpop.f32.mrb[137].mxu1  ;;  %3507 = vmatmul.mubr.msk.bf16.gmra.mrb[164].mxu0 %vm1597_vm3, %v1868_v56 }
 0x920   : > { %v1797_v60 = vpop.f32.mrb[138].mxu1  ;;  %3510 = vmatprep.mubr.msk.bf16.mxu0 %vm3887_vm1, %v3886_v1 }
 0x921   : > { %v1798_v61 = vadd.f32 %v4550_v25, %v1797_v60  ;;  %v1799_v62 = vpop.f32.mrb[139].mxu1  ;;  %v1853_v63 = vmax.f32 %v1795_v58, 0.0 }
 0x923   : > { %v1854_v2 = vmax.f32 %v1798_v61, 0.0 }
 0x925   : > { %v1869_v3 = vpack.c.bf16 %v1854_v2, %v1853_v63 }
 0x926   : > { %v1802_v4 = vpop.f32.mrb[140].mxu1 }
 0x927   : > { %v1803_v5 = vadd.f32 %v4550_v25, %v1802_v4  ;;  %v1804_v7 = vpop.f32.mrb[141].mxu1  ;;  %3511 = vmatmul.mubr.msk.bf16.gmra.mrb[168].mxu0 %vm1597_vm3, %v1869_v3 }
 0x928   : > { %v1805_v8 = vpop.f32.mrb[142].mxu1  ;;  %3514 = vmatprep.mubr.msk.bf16.mxu0 %vm3887_vm1, %v3886_v1 }
 0x929   : > { %v1806_v9 = vadd.f32 %v4550_v25, %v1805_v8  ;;  %v1807_v10 = vpop.f32.mrb[143].mxu1  ;;  %v1855_v11 = vmax.f32 %v1803_v5, 0.0 }
 0x92b   : > { %v1856_v12 = vmax.f32 %v1806_v9, 0.0 }
 0x92d   : > { %v1870_v13 = vpack.c.bf16 %v1856_v12, %v1855_v11 }
 0x92e   : > { %v1810_v14 = vpop.f32.mrb[144].mxu1 }
 0x92f   : > { %v1811_v15 = vadd.f32 %v4550_v25, %v1810_v14  ;;  %v1812_v17 = vpop.f32.mrb[145].mxu1  ;;  %3515 = vmatmul.mubr.msk.bf16.gmra.mrb[172].mxu0 %vm1597_vm3, %v1870_v13 }
 0x930   : > { %v1813_v20 = vpop.f32.mrb[146].mxu1  ;;  %3518 = vmatprep.mubr.msk.bf16.mxu0 %vm3887_vm1, %v3886_v1 }
 0x931   : > { %v1814_v21 = vadd.f32 %v4550_v25, %v1813_v20  ;;  %v1815_v22 = vpop.f32.mrb[147].mxu1  ;;  %v1857_v23 = vmax.f32 %v1811_v15, 0.0 }
 0x933   : > { %v1858_v24 = vmax.f32 %v1814_v21, 0.0 }
 0x935   : > { %v1871_v26 = vpack.c.bf16 %v1858_v24, %v1857_v23  ;;  %v3744_v24 = vld [vmem:[#allocation2 + $0xa0] sm:$0xff]  }
 0x936   : > { %v1818_v44 = vpop.f32.mrb[148].mxu1  ;;  %3539 = vmatpush3.bf16.msra.mxu0 %v3744_v24 }
 0x937   : > { %v1819_v45 = vadd.f32 %v4550_v25, %v1818_v44  ;;  %v1820_v43 = vpop.f32.mrb[149].mxu1  ;;  %3519 = vmatmul.mubr.msk.bf16.gmra.mrb[176].mxu0 %vm1597_vm3, %v1871_v26  ;;  %3576 = vmatprep.subr.bf16.mxu0 %v3886_v1 }
 0x938   : > { %v1821_v6 = vpop.f32.mrb[150].mxu1  ;;  %3522 = vmatprep.mubr.msk.bf16.mxu0 %vm3887_vm1, %v3886_v1 }
 0x939   : > { %v1822_v18 = vadd.f32 %v4550_v25, %v1821_v6  ;;  %v1823_v46 = vpop.f32.mrb[151].mxu1  ;;  %v1859_v47 = vmax.f32 %v1819_v45, 0.0 }
 0x93b   : > { %v1860_v48 = vmax.f32 %v1822_v18, 0.0 }
 0x93d   : > { %v1872_v49 = vpack.c.bf16 %v1860_v48, %v1859_v47 }
 0x93e   : > { %v1826_v50 = vpop.f32.mrb[152].mxu1 }
 0x93f   : > { %v1827_v16 = vadd.f32 %v4550_v25, %v1826_v50  ;;  %v1828_v51 = vpop.f32.mrb[153].mxu1  ;;  %3523 = vmatmul.mubr.msk.bf16.gmra.mrb[180].mxu0 %vm1597_vm3, %v1872_v49 }
 0x940   : > { %v1829_v52 = vpop.f32.mrb[154].mxu1  ;;  %3526 = vmatprep.mubr.msk.bf16.mxu0 %vm3887_vm1, %v3886_v1 }
 0x941   : > { %v1830_v53 = vadd.f32 %v4550_v25, %v1829_v52  ;;  %v1831_v54 = vpop.f32.mrb[155].mxu1  ;;  %v1861_v55 = vmax.f32 %v1827_v16, 0.0 }
 0x943   : > { %v1862_v56 = vmax.f32 %v1830_v53, 0.0 }
 0x945   : > { %v1873_v57 = vpack.c.bf16 %v1862_v56, %v1861_v55 }
 0x946   : > { %v1834_v58 = vpop.f32.mrb[156].mxu1 }
 0x947   : > { %v1835_v59 = vadd.f32 %v4550_v25, %v1834_v58  ;;  %v1836_v60 = vpop.f32.mrb[157].mxu1  ;;  %3527 = vmatmul.mubr.msk.bf16.gmra.mrb[184].mxu0 %vm1597_vm3, %v1873_v57 }
 0x948   : > { %v1837_v61 = vpop.f32.mrb[158].mxu1  ;;  %3530 = vmatprep.mubr.msk.bf16.mxu0 %vm3887_vm1, %v3886_v1 }
 0x949   : > { %v1838_v62 = vadd.f32 %v4550_v25, %v1837_v61  ;;  %v1839_v63 = vpop.f32.mrb[159].mxu1  ;;  %v1863_v2 = vmax.f32 %v1835_v59, 0.0 }
 0x94b   : > { %v1864_v3 = vmax.f32 %v1838_v62, 0.0 }
 0x94d   : > { %v1874_v4 = vpack.c.bf16 %v1864_v3, %v1863_v2 }
 0x94e   : > { %v1842_v5 = vpop.f32.mrb[160].mxu1 }
 0x94f   : > { %v1843_v7 = vadd.f32 %v4550_v25, %v1842_v5  ;;  %v1844_v8 = vpop.f32.mrb[161].mxu1  ;;  %3531 = vmatmul.mubr.msk.bf16.gmra.mrb[188].mxu0 %vm1597_vm3, %v1874_v4 }
 0x950   : > { %v1845_v9 = vpop.f32.mrb[162].mxu1  ;;  %3534 = vmatprep.mubr.msk.bf16.mxu0 %vm3887_vm1, %v3886_v1 }
 0x951   : > { %v1846_v10 = vadd.f32 %v4550_v25, %v1845_v9  ;;  %v1847_v11 = vpop.f32.mrb[163].mxu1  ;;  %v1865_v12 = vmax.f32 %v1843_v7, 0.0 }
 0x953   : > { %v1866_v13 = vmax.f32 %v1846_v10, 0.0 }
 0x955   : > { %v1875_v14 = vpack.c.bf16 %v1866_v13, %v1865_v12 }
 0x957   : > { %3535 = vmatmul.mubr.msk.bf16.gmra.mrb[192].mxu0 %vm1597_vm3, %v1875_v14 }
 0x958   : > { %3540 = vmatprep.mubr.msk.bf16.mxu0 %vm3887_vm1, %v3886_v1 }
 0x9ea   : > { %v1953_v15 = vpop.f32.mrb[160].mxu0 }
 0x9eb   : > { %v3504_v17 = vpop.f32.mrb[161].mxu0 }
 0x9ec   : > { %v1956_v20 = vpop.f32.mrb[162].mxu0 }
 0x9ed   : > { %v2024_v21 = vpack.c.bf16 %v1956_v20, %v1953_v15  ;;  %v3505_v22 = vpop.f32.mrb[163].mxu0 }
 0x9ef   : > { %2039 = vmatpush1.bf16.msra.mxu1 %v2024_v21 }
 0x9f0   : > { %2040 = vmatprep.subr.bf16.mxu1 %v3885_v0 }
 0x9f2   : > { %v1961_v23 = vpop.f32.mrb[164].mxu0 }
 0x9f3   : > { %v3508_v25 = vpop.f32.mrb[165].mxu0 }
 0x9f4   : > { %v1964_v26 = vpop.f32.mrb[166].mxu0 }
 0x9f5   : > { %v2025_v44 = vpack.c.bf16 %v1964_v26, %v1961_v23  ;;  %v3509_v45 = vpop.f32.mrb[167].mxu0 }
 0x9f7   : > { %2041 = vmatpush1.bf16.msra.mxu1 %v2025_v44 }
 0x9f8   : > { %2042 = vmatprep.subr.bf16.mxu1 %v3885_v0 }
 0x9fa   : > { %v1969_v43 = vpop.f32.mrb[168].mxu0 }
 0x9fb   : > { %v3512_v6 = vpop.f32.mrb[169].mxu0 }
 0x9fc   : > { %v1972_v18 = vpop.f32.mrb[170].mxu0 }
 0x9fd   : > { %v2026_v46 = vpack.c.bf16 %v1972_v18, %v1969_v43  ;;  %v3513_v47 = vpop.f32.mrb[171].mxu0 }
 0x9ff   : > { %2043 = vmatpush1.bf16.msra.mxu1 %v2026_v46 }
 0xa00   : > { %2044 = vmatprep.subr.bf16.mxu1 %v3885_v0 }
 0xa02   : > { %v1977_v48 = vpop.f32.mrb[172].mxu0 }
 0xa03   : > { %v3516_v49 = vpop.f32.mrb[173].mxu0 }
 0xa04   : > { %v1980_v50 = vpop.f32.mrb[174].mxu0 }
 0xa05   : > { %v2027_v16 = vpack.c.bf16 %v1980_v50, %v1977_v48  ;;  %v3517_v51 = vpop.f32.mrb[175].mxu0 }
 0xa07   : > { %2045 = vmatpush1.bf16.msra.mxu1 %v2027_v16 }
 0xa08   : > { %2046 = vmatprep.subr.bf16.mxu1 %v3885_v0 }
 0xa0a   : > { %v1985_v52 = vpop.f32.mrb[176].mxu0 }
 0xa0b   : > { %v3520_v53 = vpop.f32.mrb[177].mxu0 }
 0xa0c   : > { %v1988_v54 = vpop.f32.mrb[178].mxu0 }
 0xa0d   : > { %v2028_v55 = vpack.c.bf16 %v1988_v54, %v1985_v52  ;;  %v3521_v56 = vpop.f32.mrb[179].mxu0 }
 0xa0f   : > { %2047 = vmatpush1.bf16.msra.mxu1 %v2028_v55 }
 0xa10   : > { %2048 = vmatprep.subr.bf16.mxu1 %v3885_v0 }
 0xa12   : > { %v1993_v57 = vpop.f32.mrb[180].mxu0 }
 0xa13   : > { %v3524_v58 = vpop.f32.mrb[181].mxu0 }
 0xa14   : > { %v1996_v59 = vpop.f32.mrb[182].mxu0 }
 0xa15   : > { %v2029_v60 = vpack.c.bf16 %v1996_v59, %v1993_v57  ;;  %v3525_v61 = vpop.f32.mrb[183].mxu0 }
 0xa17   : > { %2049 = vmatpush1.bf16.msra.mxu1 %v2029_v60 }
 0xa18   : > { %2050 = vmatprep.subr.bf16.mxu1 %v3885_v0 }
 0xa1a   : > { %v2001_v62 = vpop.f32.mrb[184].mxu0 }
 0xa1b   : > { %v3528_v63 = vpop.f32.mrb[185].mxu0 }
 0xa1c   : > { %v2004_v2 = vpop.f32.mrb[186].mxu0 }
 0xa1d   : > { %v2030_v3 = vpack.c.bf16 %v2004_v2, %v2001_v62  ;;  %v3529_v4 = vpop.f32.mrb[187].mxu0 }
 0xa1f   : > { %2051 = vmatpush1.bf16.msra.mxu1 %v2030_v3 }
 0xa20   : > { %2052 = vmatprep.subr.bf16.mxu1 %v3885_v0 }
 0xa22   : > { %v2009_v5 = vpop.f32.mrb[188].mxu0 }
 0xa23   : > { %v3532_v7 = vpop.f32.mrb[189].mxu0 }
 0xa24   : > { %v2012_v8 = vpop.f32.mrb[190].mxu0 }
 0xa25   : > { %v2031_v9 = vpack.c.bf16 %v2012_v8, %v2009_v5  ;;  %v3533_v10 = vpop.f32.mrb[191].mxu0 }
 0xa27   : > { %2053 = vmatpush1.bf16.msra.mxu1 %v2031_v9 }
 0xa28   : > { %2054 = vmatprep.subr.bf16.mxu1 %v3885_v0 }
 0xa2a   : > { %v2017_v11 = vpop.f32.mrb[192].mxu0 }
 0xa2b   : > { %v3536_v12 = vpop.f32.mrb[193].mxu0 }
 0xa2c   : > { %v2020_v13 = vpop.f32.mrb[194].mxu0 }
 0xa2d   : > { %v2032_v14 = vpack.c.bf16 %v2020_v13, %v2017_v11  ;;  %v3537_v15 = vpop.f32.mrb[195].mxu0 }
 0xa2f   : > { %2055 = vmatpush1.bf16.msra.mxu1 %v2032_v14 }
 0xa30   : > { %2324 = vmatprep.subr.bf16.mxu1 %v3885_v0 }
 0xa32   : > { %2071 = vmatmul.mubr.bf16.vlgmr.msra.gmra.mrb[164].mxu1 %v4382_v27  ;;  %v4633_v27 = vld [vmem:[%s4030_s19 + $0x4] ss:$8 sps:$4 sm:$0xff]  }
 0xa33   : > { %3182 = vmatprep.mubr.msk.bf16.mxu1 %vm485_vm0, %v4386_v28  ;;  %v4640_v28 = vld [vmem:[%s5031_s4 + $0x5] ss:$0 sm:$0xff] }
 0xa3a   : > { %2079 = vmatmul.mubr.bf16.gmra.mrb[168].mxu1 %v4391_v29 }
 0xa3b   : > { %3183 = vmatprep.mubr.msk.bf16.mxu1 %vm485_vm0, %v4395_v30 }
 0xa42   : > { %2087 = vmatmul.mubr.bf16.gmra.mrb[172].mxu1 %v4400_v31 }
 0xa43   : > { %3184 = vmatprep.mubr.msk.bf16.mxu1 %vm485_vm0, %v4404_v32 }
 0xa4a   : > { %2095 = vmatmul.mubr.bf16.gmra.mrb[176].mxu1 %v4409_v33 }
 0xa4b   : > { %3185 = vmatprep.mubr.msk.bf16.mxu1 %vm485_vm0, %v4413_v34 }
 0xa52   : > { %2103 = vmatmul.mubr.bf16.gmra.mrb[180].mxu1 %v4418_v19 }
 0xa53   : > { %3186 = vmatprep.mubr.msk.bf16.mxu1 %vm485_vm0, %v4422_v35 }
 0xa5a   : > { %2111 = vmatmul.mubr.bf16.gmra.mrb[184].mxu1 %v4427_v36 }
 0xa5b   : > { %3187 = vmatprep.mubr.msk.bf16.mxu1 %vm485_vm0, %v4431_v38 }
 0xa62   : > { %2119 = vmatmul.mubr.bf16.gmra.mrb[188].mxu1 %v4436_v39 }
 0xa63   : > { %3188 = vmatprep.mubr.msk.bf16.mxu1 %vm485_vm0, %v4440_v40 }
 0xa6a   : > { %2127 = vmatmul.mubr.bf16.gmra.mrb[192].mxu1 %v4445_v37 }
 0xa6b   : > { %3189 = vmatprep.mubr.msk.bf16.mxu1 %vm485_vm0, %v4449_v41 }
 0xa72   : > { %2135 = vmatmul.mubr.bf16.gmra.mrb[196].mxu1 %v4454_v42 }
 0xa73   : > { %3201 = vmatprep.mubr.msk.bf16.mxu1 %vm485_vm0, %v4633_v27 }
 0xb05   : > { %v2072_v29 = vpop.f32.mrb[164].mxu1 }
 0xb06   : > { %v2073_v30 = vadd.f32 %v4640_v28, %v2072_v29  ;;  %v2074_v31 = vpop.f32.mrb[165].mxu1 }
 0xb07   : > { %v2075_v32 = vpop.f32.mrb[166].mxu1 }
 0xb08   : > { %v2076_v33 = vadd.f32 %v4640_v28, %v2075_v32  ;;  %v2077_v34 = vpop.f32.mrb[167].mxu1  ;;  %v2143_v19 = vmax.f32 %v2073_v30, 0.0 }
 0xb0a   : > { %v2144_v35 = vmax.f32 %v2076_v33, 0.0 }
 0xb0c   : > { %v2161_v36 = vpack.c.bf16 %v2144_v35, %v2143_v19 }
 0xb0d   : > { %v2080_v38 = vpop.f32.mrb[168].mxu1 }
 0xb0e   : > { %v2081_v39 = vadd.f32 %v4640_v28, %v2080_v38  ;;  %v2082_v40 = vpop.f32.mrb[169].mxu1  ;;  %3541 = vmatmul.mubr.msk.bf16.vlgmr.msra.gmra.mrb[196].mxu0 %vm485_vm0, %v2161_v36 }
 0xb0f   : > { %v2083_v37 = vpop.f32.mrb[170].mxu1  ;;  %3544 = vmatprep.mubr.msk.bf16.mxu0 %vm3887_vm1, %v3886_v1 }
 0xb10   : > { %v2084_v41 = vadd.f32 %v4640_v28, %v2083_v37  ;;  %v2085_v42 = vpop.f32.mrb[171].mxu1  ;;  %v2145_v17 = vmax.f32 %v2081_v39, 0.0 }
 0xb12   : > { %v2146_v20 = vmax.f32 %v2084_v41, 0.0 }
 0xb14   : > { %v2162_v21 = vpack.c.bf16 %v2146_v20, %v2145_v17 }
 0xb15   : > { %v2088_v22 = vpop.f32.mrb[172].mxu1 }
 0xb16   : > { %v2089_v23 = vadd.f32 %v4640_v28, %v2088_v22  ;;  %v2090_v24 = vpop.f32.mrb[173].mxu1  ;;  %3545 = vmatmul.mubr.msk.bf16.gmra.mrb[200].mxu0 %vm485_vm0, %v2162_v21 }
 0xb17   : > { %v2091_v25 = vpop.f32.mrb[174].mxu1  ;;  %3548 = vmatprep.mubr.msk.bf16.mxu0 %vm3887_vm1, %v3886_v1 }
 0xb18   : > { %v2092_v26 = vadd.f32 %v4640_v28, %v2091_v25  ;;  %v2093_v44 = vpop.f32.mrb[175].mxu1  ;;  %v2147_v45 = vmax.f32 %v2089_v23, 0.0 }
 0xb1a   : > { %v2148_v43 = vmax.f32 %v2092_v26, 0.0 }
 0xb1c   : > { %v2163_v6 = vpack.c.bf16 %v2148_v43, %v2147_v45 }
 0xb1d   : > { %v2096_v18 = vpop.f32.mrb[176].mxu1 }
 0xb1e   : > { %v2097_v46 = vadd.f32 %v4640_v28, %v2096_v18  ;;  %v2098_v47 = vpop.f32.mrb[177].mxu1  ;;  %3549 = vmatmul.mubr.msk.bf16.gmra.mrb[204].mxu0 %vm485_vm0, %v2163_v6  ;;  %v3745_v18 = vld [vmem:[#allocation2 + $0xa8] sm:$0xff]  }
 0xb1f   : > { %v2099_v48 = vpop.f32.mrb[178].mxu1  ;;  %3552 = vmatprep.mubr.msk.bf16.mxu0 %vm3887_vm1, %v3886_v1  ;;  %3577 = vmatpush3.bf16.msra.mxu0 %v3745_v18 }
 0xb20   : > { %v2100_v49 = vadd.f32 %v4640_v28, %v2099_v48  ;;  %v2101_v50 = vpop.f32.mrb[179].mxu1  ;;  %v2149_v16 = vmax.f32 %v2097_v46, 0.0 }
 0xb22   : > { %v2150_v51 = vmax.f32 %v2100_v49, 0.0 }
 0xb24   : > { %v2164_v52 = vpack.c.bf16 %v2150_v51, %v2149_v16 }
 0xb25   : > { %v2104_v53 = vpop.f32.mrb[180].mxu1 }
 0xb26   : > { %v2105_v54 = vadd.f32 %v4640_v28, %v2104_v53  ;;  %v2106_v55 = vpop.f32.mrb[181].mxu1  ;;  %3553 = vmatmul.mubr.msk.bf16.gmra.mrb[208].mxu0 %vm485_vm0, %v2164_v52 }
 0xb27   : > { %v2107_v56 = vpop.f32.mrb[182].mxu1  ;;  %3556 = vmatprep.mubr.msk.bf16.mxu0 %vm3887_vm1, %v3886_v1 }
 0xb28   : > { %v2108_v57 = vadd.f32 %v4640_v28, %v2107_v56  ;;  %v2109_v58 = vpop.f32.mrb[183].mxu1  ;;  %v2151_v59 = vmax.f32 %v2105_v54, 0.0 }
 0xb2a   : > { %v2152_v60 = vmax.f32 %v2108_v57, 0.0 }
 0xb2c   : > { %v2165_v61 = vpack.c.bf16 %v2152_v60, %v2151_v59 }
 0xb2d   : > { %v2112_v62 = vpop.f32.mrb[184].mxu1 }
 0xb2e   : > { %v2113_v63 = vadd.f32 %v4640_v28, %v2112_v62  ;;  %v2114_v2 = vpop.f32.mrb[185].mxu1  ;;  %3557 = vmatmul.mubr.msk.bf16.gmra.mrb[212].mxu0 %vm485_vm0, %v2165_v61 }
 0xb2f   : > { %v2115_v3 = vpop.f32.mrb[186].mxu1  ;;  %3560 = vmatprep.mubr.msk.bf16.mxu0 %vm3887_vm1, %v3886_v1 }
 0xb30   : > { %v2116_v4 = vadd.f32 %v4640_v28, %v2115_v3  ;;  %v2117_v5 = vpop.f32.mrb[187].mxu1  ;;  %v2153_v7 = vmax.f32 %v2113_v63, 0.0 }
 0xb32   : > { %v2154_v8 = vmax.f32 %v2116_v4, 0.0 }
 0xb34   : > { %v2166_v9 = vpack.c.bf16 %v2154_v8, %v2153_v7 }
 0xb35   : > { %v2120_v10 = vpop.f32.mrb[188].mxu1 }
 0xb36   : > { %v2121_v11 = vadd.f32 %v4640_v28, %v2120_v10  ;;  %v2122_v12 = vpop.f32.mrb[189].mxu1  ;;  %3561 = vmatmul.mubr.msk.bf16.gmra.mrb[216].mxu0 %vm485_vm0, %v2166_v9 }
 0xb37   : > { %v2123_v13 = vpop.f32.mrb[190].mxu1  ;;  %3564 = vmatprep.mubr.msk.bf16.mxu0 %vm3887_vm1, %v3886_v1 }
 0xb38   : > { %v2124_v14 = vadd.f32 %v4640_v28, %v2123_v13  ;;  %v2125_v15 = vpop.f32.mrb[191].mxu1  ;;  %v2155_v29 = vmax.f32 %v2121_v11, 0.0 }
 0xb3a   : > { %v2156_v30 = vmax.f32 %v2124_v14, 0.0 }
 0xb3c   : > { %v2167_v31 = vpack.c.bf16 %v2156_v30, %v2155_v29 }
 0xb3d   : > { %v2128_v32 = vpop.f32.mrb[192].mxu1 }
 0xb3e   : > { %v2129_v33 = vadd.f32 %v4640_v28, %v2128_v32  ;;  %v2130_v34 = vpop.f32.mrb[193].mxu1  ;;  %3565 = vmatmul.mubr.msk.bf16.gmra.mrb[220].mxu0 %vm485_vm0, %v2167_v31 }
 0xb3f   : > { %v2131_v19 = vpop.f32.mrb[194].mxu1  ;;  %3568 = vmatprep.mubr.msk.bf16.mxu0 %vm3887_vm1, %v3886_v1 }
 0xb40   : > { %v2132_v35 = vadd.f32 %v4640_v28, %v2131_v19  ;;  %v2133_v36 = vpop.f32.mrb[195].mxu1  ;;  %v2157_v38 = vmax.f32 %v2129_v33, 0.0  ;;  %v4697_v19 = vld [vmem:[%s4030_s19] ss:$8 sps:$4 sm:$0xff]  }
 0xb41   : > { %v4706_v36 = vld [vmem:[%s4030_s19 + $0x10] ss:$8 sps:$4 sm:$0xff]  }
 0xb42   : > { %v2158_v39 = vmax.f32 %v2132_v35, 0.0  ;;  %v4701_v35 = vld [vmem:[%s4030_s19 + $0x14] ss:$8 sps:$4 sm:$0xff]  }
 0xb44   : > { %v2168_v40 = vpack.c.bf16 %v2158_v39, %v2157_v38  ;;  %v4710_v38 = vld [vmem:[%s4030_s19 + $0x24] ss:$8 sps:$4 sm:$0xff]   ;;  %v4715_v39 = vld [vmem:[%s4030_s19 + $0x20] ss:$8 sps:$4 sm:$0xff]  }
 0xb45   : > { %v2136_v37 = vpop.f32.mrb[196].mxu1 }
 0xb46   : > { %v2137_v41 = vadd.f32 %v4640_v28, %v2136_v37  ;;  %v2138_v42 = vpop.f32.mrb[197].mxu1  ;;  %3569 = vmatmul.mubr.msk.bf16.gmra.mrb[224].mxu0 %vm485_vm0, %v2168_v40  ;;  %v4719_v40 = vld [vmem:[%s4030_s19 + $0x34] ss:$8 sps:$4 sm:$0xff]   ;;  %v4724_v37 = vld [vmem:[%s4030_s19 + $0x30] ss:$8 sps:$4 sm:$0xff]  }
 0xb47   : > { %v2139_v17 = vpop.f32.mrb[198].mxu1  ;;  %3572 = vmatprep.mubr.msk.bf16.mxu0 %vm3887_vm1, %v3886_v1  ;;  %v4733_v42 = vld [vmem:[%s4030_s19 + $0x40] ss:$8 sps:$4 sm:$0xff]  }
 0xb48   : > { %v2140_v20 = vadd.f32 %v4640_v28, %v2139_v17  ;;  %v2141_v21 = vpop.f32.mrb[199].mxu1  ;;  %v2159_v22 = vmax.f32 %v2137_v41, 0.0  ;;  %v4728_v41 = vld [vmem:[%s4030_s19 + $0x44] ss:$8 sps:$4 sm:$0xff]   ;;  %v4737_v17 = vld [vmem:[%s4030_s19 + $0x54] ss:$8 sps:$4 sm:$0xff]  }
 0xb49   : > { %v4746_v21 = vld [vmem:[%s4030_s19 + $0x64] ss:$8 sps:$4 sm:$0xff]  }
 0xb4a   : > { %v2160_v23 = vmax.f32 %v2140_v20, 0.0  ;;  %v4742_v20 = vld [vmem:[%s4030_s19 + $0x50] ss:$8 sps:$4 sm:$0xff]  }
 0xb4c   : > { %v2169_v24 = vpack.c.bf16 %v2160_v23, %v2159_v22  ;;  %v4751_v22 = vld [vmem:[%s4030_s19 + $0x60] ss:$8 sps:$4 sm:$0xff]   ;;  %v4755_v23 = vld [vmem:[%s4030_s19 + $0x74] ss:$8 sps:$4 sm:$0xff]  }
 0xb4e   : > { %3573 = vmatmul.mubr.msk.bf16.gmra.mrb[228].mxu0 %vm485_vm0, %v2169_v24  ;;  %v4760_v24 = vld [vmem:[%s4030_s19 + $0x70] ss:$8 sps:$4 sm:$0xff]  }
 0xb4f   : > { %3578 = vmatprep.mubr.msk.bf16.mxu0 %vm3887_vm1, %v3886_v1 }
 0xbe1   : > { %v2239_v25 = vpop.f32.mrb[196].mxu0 }
 0xbe2   : > { %v3542_v26 = vpop.f32.mrb[197].mxu0 }
 0xbe3   : > { %v2242_v44 = vpop.f32.mrb[198].mxu0  ;;  %v4769_v26 = vld [vmem:[%s4030_s19 + $0x80] ss:$8 sps:$4 sm:$0xff]  }
 0xbe4   : > { %v2310_v45 = vpack.c.bf16 %v2242_v44, %v2239_v25  ;;  %v3543_v43 = vpop.f32.mrb[199].mxu0  ;;  %v4764_v25 = vld [vmem:[%s4030_s19 + $0x84] ss:$8 sps:$4 sm:$0xff]   ;;  %s3046_s19 = sshll.u32 %s5051_s13, 3  ;;  %s2935_s13 = scalar_lea.sflag [#allocation4], %s289_s20 }
 0xbe5   : > { %v4777_v44 = vld [vmem:[%s5031_s4 + $0x6] ss:$0 sm:$0xff]  ;;  %s4859_s29 = scalar_lea.vmem %s5029_s2, %s3046_s19  ;;  %s3230_s19 = sshll.u32 %s3945_s25, 4 }
 0xbe6   : > { %2325 = vmatpush1.bf16.msra.mxu1 %v2310_v45  ;;  %s4984_s9 = scalar_lea.hbm %s5033_s6, %s3230_s19  ;;  %s3888_s25 = smov [#allocation5]  }
 0xbe7   : > { %2326 = vmatprep.subr.bf16.mxu1 %v3885_v0  ;;  %s3818_s12 = sshll.u32 %s3888_s25, 4  ;;  %s3819_s12 = int_to_ptr.vmem [resolvable:$false] %s3818_s12 }
 0xbe8   : > { %s3820_s14 = scalar_lea.vmem %s3819_s12, 32  ;;  %p3821_p3 = scmp.lt.s32.totalorder %s4986_s28, %s3819_s12 }
 0xbe9   : > { %v2247_v6 = vpop.f32.mrb[200].mxu0  ;;  %p3822_p4 = scmp.lt.s32.totalorder %s3820_s14, %s3814_s11 }
 0xbea   : > { %v3546_v28 = vpop.f32.mrb[201].mxu0 }
 0xbeb   : > { %v2250_v46 = vpop.f32.mrb[202].mxu0  ;;  %p3823_p7 = por %p3822_p4, %p3821_p3 }
 0xbec   : > { %v2311_v47 = vpack.c.bf16 %v2250_v46, %v2247_v6  ;;  %v3547_v48 = vpop.f32.mrb[203].mxu0 }
 0xbed   : > { %p3824_p8 = pnand %p3823_p7, %p3817_p2 }
 0xbee   : > { %2327 = vmatpush1.bf16.msra.mxu1 %v2311_v47 }
 0xbef   : > { %2328 = vmatprep.subr.bf16.mxu1 %v3885_v0 }
 0xbf1   : > { %v2255_v49 = vpop.f32.mrb[204].mxu0 }
 0xbf2   : > { %v3550_v50 = vpop.f32.mrb[205].mxu0 }
 0xbf3   : > { %v2258_v16 = vpop.f32.mrb[206].mxu0 }
 0xbf4   : > { %v2312_v51 = vpack.c.bf16 %v2258_v16, %v2255_v49  ;;  %v3551_v52 = vpop.f32.mrb[207].mxu0 }
 0xbf6   : > { %2329 = vmatpush1.bf16.msra.mxu1 %v2312_v51 }
 0xbf7   : > { %2330 = vmatprep.subr.bf16.mxu1 %v3885_v0 }
 0xbf9   : > { %v2263_v53 = vpop.f32.mrb[208].mxu0 }
 0xbfa   : > { %v3554_v54 = vpop.f32.mrb[209].mxu0 }
 0xbfb   : > { %v2266_v55 = vpop.f32.mrb[210].mxu0 }
 0xbfc   : > { %v2313_v56 = vpack.c.bf16 %v2266_v55, %v2263_v53  ;;  %v3555_v57 = vpop.f32.mrb[211].mxu0 }
 0xbfe   : > { %2331 = vmatpush1.bf16.msra.mxu1 %v2313_v56 }
 0xbff   : > { %2332 = vmatprep.subr.bf16.mxu1 %v3885_v0 }
 0xc01   : > { %v2271_v58 = vpop.f32.mrb[212].mxu0 }
 0xc02   : > { %v3558_v59 = vpop.f32.mrb[213].mxu0 }
 0xc03   : > { %v2274_v60 = vpop.f32.mrb[214].mxu0 }
 0xc04   : > { %v2314_v61 = vpack.c.bf16 %v2274_v60, %v2271_v58  ;;  %v3559_v62 = vpop.f32.mrb[215].mxu0 }
 0xc06   : > { %2333 = vmatpush1.bf16.msra.mxu1 %v2314_v61 }
 0xc07   : > { %2334 = vmatprep.subr.bf16.mxu1 %v3885_v0 }
 0xc09   : > { %v2279_v63 = vpop.f32.mrb[216].mxu0 }
 0xc0a   : > { %v3562_v2 = vpop.f32.mrb[217].mxu0 }
 0xc0b   : > { %v2282_v3 = vpop.f32.mrb[218].mxu0 }
 0xc0c   : > { %v2315_v4 = vpack.c.bf16 %v2282_v3, %v2279_v63  ;;  %v3563_v5 = vpop.f32.mrb[219].mxu0 }
 0xc0e   : > { %2335 = vmatpush1.bf16.msra.mxu1 %v2315_v4 }
 0xc0f   : > { %2336 = vmatprep.subr.bf16.mxu1 %v3885_v0 }
 0xc11   : > { %v2287_v7 = vpop.f32.mrb[220].mxu0 }
 0xc12   : > { %v3566_v8 = vpop.f32.mrb[221].mxu0 }
 0xc13   : > { %v2290_v9 = vpop.f32.mrb[222].mxu0 }
 0xc14   : > { %v2316_v10 = vpack.c.bf16 %v2290_v9, %v2287_v7  ;;  %v3567_v11 = vpop.f32.mrb[223].mxu0 }
 0xc16   : > { %2337 = vmatpush1.bf16.msra.mxu1 %v2316_v10 }
 0xc17   : > { %2338 = vmatprep.subr.bf16.mxu1 %v3885_v0 }
 0xc19   : > { %v2295_v12 = vpop.f32.mrb[224].mxu0 }
 0xc1a   : > { %v3570_v13 = vpop.f32.mrb[225].mxu0 }
 0xc1b   : > { %v2298_v14 = vpop.f32.mrb[226].mxu0 }
 0xc1c   : > { %v2317_v15 = vpack.c.bf16 %v2298_v14, %v2295_v12  ;;  %v3571_v29 = vpop.f32.mrb[227].mxu0 }
 0xc1e   : > { %2339 = vmatpush1.bf16.msra.mxu1 %v2317_v15 }
 0xc1f   : > { %2340 = vmatprep.subr.bf16.mxu1 %v3885_v0 }
 0xc21   : > { %v2303_v30 = vpop.f32.mrb[228].mxu0 }
 0xc22   : > { %v3574_v31 = vpop.f32.mrb[229].mxu0 }
 0xc23   : > { %v2306_v32 = vpop.f32.mrb[230].mxu0 }
 0xc24   : > { %v2318_v33 = vpack.c.bf16 %v2306_v32, %v2303_v30  ;;  %v3575_v34 = vpop.f32.mrb[231].mxu0 }
 0xc26   : > { %2341 = vmatpush1.bf16.msra.mxu1 %v2318_v33 }
 0xc27   : > { %2610 = vmatprep.subr.bf16.mxu1 %v3885_v0 }
 0xc29   : > { %2357 = vmatmul.mubr.bf16.vlgmr.msra.gmra.mrb[200].mxu1 %v4697_v19 }
 0xc2a   : > { %3202 = vmatprep.mubr.msk.bf16.mxu1 %vm485_vm0, %v4701_v35 }
 0xc31   : > { %2365 = vmatmul.mubr.bf16.gmra.mrb[204].mxu1 %v4706_v36 }
 0xc32   : > { %3203 = vmatprep.mubr.msk.bf16.mxu1 %vm485_vm0, %v4710_v38 }
 0xc39   : > { %2373 = vmatmul.mubr.bf16.gmra.mrb[208].mxu1 %v4715_v39 }
 0xc3a   : > { %3204 = vmatprep.mubr.msk.bf16.mxu1 %vm485_vm0, %v4719_v40 }
 0xc41   : > { %2381 = vmatmul.mubr.bf16.gmra.mrb[212].mxu1 %v4724_v37 }
 0xc42   : > { %3205 = vmatprep.mubr.msk.bf16.mxu1 %vm485_vm0, %v4728_v41 }
 0xc49   : > { %2389 = vmatmul.mubr.bf16.gmra.mrb[216].mxu1 %v4733_v42 }
 0xc4a   : > { %3206 = vmatprep.mubr.msk.bf16.mxu1 %vm485_vm0, %v4737_v17 }
 0xc51   : > { %2397 = vmatmul.mubr.bf16.gmra.mrb[220].mxu1 %v4742_v20 }
 0xc52   : > { %3207 = vmatprep.mubr.msk.bf16.mxu1 %vm485_vm0, %v4746_v21 }
 0xc59   : > { %2405 = vmatmul.mubr.bf16.gmra.mrb[224].mxu1 %v4751_v22 }
 0xc5a   : > { %3208 = vmatprep.mubr.msk.bf16.mxu1 %vm485_vm0, %v4755_v23 }
 0xc61   : > { %2413 = vmatmul.mubr.bf16.gmra.mrb[228].mxu1 %v4760_v24 }
 0xc62   : > { %3209 = vmatprep.mubr.msk.bf16.mxu1 %vm485_vm0, %v4764_v25 }
 0xc69   : > { %2421 = vmatmul.mubr.bf16.gmra.mrb[232].mxu1 %v4769_v26 }
 0xc6a   : > { %3221 = vmatprep.mubr.msk.bf16.mxu1 %vm485_vm0, %v4633_v27 }
 0xcfc   : > { %v2358_v45 = vpop.f32.mrb[200].mxu1 }
 0xcfd   : > { %v2359_v43 = vadd.f32 %v4777_v44, %v2358_v45  ;;  %v2360_v6 = vpop.f32.mrb[201].mxu1 }
 0xcfe   : > { %v2361_v18 = vpop.f32.mrb[202].mxu1 }
 0xcff   : > { %v2362_v28 = vadd.f32 %v4777_v44, %v2361_v18  ;;  %v2363_v46 = vpop.f32.mrb[203].mxu1  ;;  %v2429_v47 = vmax.f32 %v2359_v43, 0.0 }
 0xd01   : > { %v2430_v48 = vmax.f32 %v2362_v28, 0.0 }
 0xd03   : > { %v2447_v49 = vpack.c.bf16 %v2430_v48, %v2429_v47 }
 0xd04   : > { %v2366_v50 = vpop.f32.mrb[204].mxu1 }
 0xd05   : > { %v2367_v16 = vadd.f32 %v4777_v44, %v2366_v50  ;;  %v2368_v27 = vpop.f32.mrb[205].mxu1  ;;  %3579 = vmatmul.mubr.msk.bf16.vlgmr.msra.gmra.mrb[232].mxu0 %vm485_vm0, %v2447_v49 }
 0xd06   : > { %v2369_v51 = vpop.f32.mrb[206].mxu1  ;;  %3582 = vmatprep.mubr.msk.bf16.mxu0 %vm3887_vm1, %v3886_v1 }
 0xd07   : > { %v2370_v52 = vadd.f32 %v4777_v44, %v2369_v51  ;;  %v2371_v53 = vpop.f32.mrb[207].mxu1  ;;  %v2431_v54 = vmax.f32 %v2367_v16, 0.0 }
 0xd09   : > { %v2432_v55 = vmax.f32 %v2370_v52, 0.0 }
 0xd0b   : > { %v2448_v56 = vpack.c.bf16 %v2432_v55, %v2431_v54 }
 0xd0c   : > { %v2374_v57 = vpop.f32.mrb[208].mxu1 }
 0xd0d   : > { %v2375_v58 = vadd.f32 %v4777_v44, %v2374_v57  ;;  %v2376_v59 = vpop.f32.mrb[209].mxu1  ;;  %3583 = vmatmul.mubr.msk.bf16.gmra.mrb[236].mxu0 %vm485_vm0, %v2448_v56 }
 0xd0e   : > { %v2377_v60 = vpop.f32.mrb[210].mxu1  ;;  %3586 = vmatprep.mubr.msk.bf16.mxu0 %vm3887_vm1, %v3886_v1 }
 0xd0f   : > { %v2378_v61 = vadd.f32 %v4777_v44, %v2377_v60  ;;  %v2379_v62 = vpop.f32.mrb[211].mxu1  ;;  %v2433_v63 = vmax.f32 %v2375_v58, 0.0 }
 0xd11   : > { %v2434_v2 = vmax.f32 %v2378_v61, 0.0 }
 0xd13   : > { %v2449_v3 = vpack.c.bf16 %v2434_v2, %v2433_v63 }
 0xd14   : > { %v2382_v4 = vpop.f32.mrb[212].mxu1 }
 0xd15   : > { %v2383_v5 = vadd.f32 %v4777_v44, %v2382_v4  ;;  %v2384_v7 = vpop.f32.mrb[213].mxu1  ;;  %3587 = vmatmul.mubr.msk.bf16.gmra.mrb[240].mxu0 %vm485_vm0, %v2449_v3 }
 0xd16   : > { %v2385_v8 = vpop.f32.mrb[214].mxu1  ;;  %3590 = vmatprep.mubr.msk.bf16.mxu0 %vm3887_vm1, %v3886_v1 }
 0xd17   : > { %v2386_v9 = vadd.f32 %v4777_v44, %v2385_v8  ;;  %v2387_v10 = vpop.f32.mrb[215].mxu1  ;;  %v2435_v11 = vmax.f32 %v2383_v5, 0.0 }
 0xd19   : > { %v2436_v12 = vmax.f32 %v2386_v9, 0.0 }
 0xd1b   : > { %v2450_v13 = vpack.c.bf16 %v2436_v12, %v2435_v11 }
 0xd1c   : > { %v2390_v14 = vpop.f32.mrb[216].mxu1 }
 0xd1d   : > { %v2391_v15 = vadd.f32 %v4777_v44, %v2390_v14  ;;  %v2392_v29 = vpop.f32.mrb[217].mxu1  ;;  %3591 = vmatmul.mubr.msk.bf16.gmra.mrb[244].mxu0 %vm485_vm0, %v2450_v13 }
 0xd1e   : > { %v2393_v30 = vpop.f32.mrb[218].mxu1  ;;  %3594 = vmatprep.mubr.msk.bf16.mxu0 %vm3887_vm1, %v3886_v1 }
 0xd1f   : > { %v2394_v31 = vadd.f32 %v4777_v44, %v2393_v30  ;;  %v2395_v32 = vpop.f32.mrb[219].mxu1  ;;  %v2437_v33 = vmax.f32 %v2391_v15, 0.0 }
 0xd21   : > { %v2438_v34 = vmax.f32 %v2394_v31, 0.0 }
 0xd23   : > { %v2451_v45 = vpack.c.bf16 %v2438_v34, %v2437_v33 }
 0xd24   : > { %v2398_v43 = vpop.f32.mrb[220].mxu1 }
 0xd25   : > { %v2399_v6 = vadd.f32 %v4777_v44, %v2398_v43  ;;  %v2400_v18 = vpop.f32.mrb[221].mxu1  ;;  %3595 = vmatmul.mubr.msk.bf16.gmra.mrb[248].mxu0 %vm485_vm0, %v2451_v45 }
 0xd26   : > { %v2401_v28 = vpop.f32.mrb[222].mxu1  ;;  %3598 = vmatprep.mubr.msk.bf16.mxu0 %vm3887_vm1, %v3886_v1 }
 0xd27   : > { %v2402_v46 = vadd.f32 %v4777_v44, %v2401_v28  ;;  %v2403_v47 = vpop.f32.mrb[223].mxu1  ;;  %v2439_v48 = vmax.f32 %v2399_v6, 0.0 }
 0xd29   : > { %v2440_v49 = vmax.f32 %v2402_v46, 0.0 }
 0xd2b   : > { %v2452_v50 = vpack.c.bf16 %v2440_v49, %v2439_v48 }
 0xd2c   : > { %v2406_v16 = vpop.f32.mrb[224].mxu1 }
 0xd2d   : > { %v2407_v27 = vadd.f32 %v4777_v44, %v2406_v16  ;;  %v2408_v51 = vpop.f32.mrb[225].mxu1  ;;  %3599 = vmatmul.mubr.msk.bf16.gmra.mrb[252].mxu0 %vm485_vm0, %v2452_v50 }
 0xd2e   : > { %v2409_v52 = vpop.f32.mrb[226].mxu1  ;;  %3602 = vmatprep.mubr.msk.bf16.mxu0 %vm3887_vm1, %v3886_v1 }
 0xd2f   : > { %v2410_v53 = vadd.f32 %v4777_v44, %v2409_v52  ;;  %v2411_v54 = vpop.f32.mrb[227].mxu1  ;;  %v2441_v55 = vmax.f32 %v2407_v27, 0.0 }
 0xd31   : > { %v2442_v56 = vmax.f32 %v2410_v53, 0.0 }
 0xd33   : > { %v2453_v57 = vpack.c.bf16 %v2442_v56, %v2441_v55 }
 0xd34   : > { %v2414_v58 = vpop.f32.mrb[228].mxu1 }
 0xd35   : > { %v2415_v59 = vadd.f32 %v4777_v44, %v2414_v58  ;;  %v2416_v60 = vpop.f32.mrb[229].mxu1  ;;  %3603 = vmatmul.mubr.msk.bf16.gmra.mrb[0].mxu0 %vm485_vm0, %v2453_v57 }
 0xd36   : > { %v2417_v61 = vpop.f32.mrb[230].mxu1  ;;  %3606 = vmatprep.mubr.msk.bf16.mxu0 %vm3887_vm1, %v3886_v1 }
 0xd37   : > { %v2418_v62 = vadd.f32 %v4777_v44, %v2417_v61  ;;  %v2419_v63 = vpop.f32.mrb[231].mxu1  ;;  %v2443_v2 = vmax.f32 %v2415_v59, 0.0 }
 0xd39   : > { %v2444_v3 = vmax.f32 %v2418_v62, 0.0 }
 0xd3b   : > { %v2454_v4 = vpack.c.bf16 %v2444_v3, %v2443_v2 }
 0xd3c   : > { %v2422_v5 = vpop.f32.mrb[232].mxu1 }
 0xd3d   : > { %v2423_v7 = vadd.f32 %v4777_v44, %v2422_v5  ;;  %v2424_v8 = vpop.f32.mrb[233].mxu1  ;;  %3607 = vmatmul.mubr.msk.bf16.gmra.mrb[4].mxu0 %vm485_vm0, %v2454_v4 }
 0xd3e   : > { %v2425_v9 = vpop.f32.mrb[234].mxu1  ;;  %3610 = vmatprep.mubr.msk.bf16.mxu0 %vm3887_vm1, %v3886_v1 }
 0xd3f   : > { %v2426_v10 = vadd.f32 %v4777_v44, %v2425_v9  ;;  %v2427_v11 = vpop.f32.mrb[235].mxu1  ;;  %v2445_v12 = vmax.f32 %v2423_v7, 0.0 }
 0xd41   : > { %v2446_v13 = vmax.f32 %v2426_v10, 0.0 }
 0xd43   : > { %v2455_v14 = vpack.c.bf16 %v2446_v13, %v2445_v12 }
 0xd45   : > { %3611 = vmatmul.mubr.msk.bf16.gmra.mrb[8].mxu0 %vm485_vm0, %v2455_v14 }
 0xdd8   : > { %v2525_v15 = vpop.f32.mrb[232].mxu0 }
 0xdd9   : > { %v3580_v29 = vpop.f32.mrb[233].mxu0 }
 0xdda   : > { %v2528_v30 = vpop.f32.mrb[234].mxu0 }
 0xddb   : > { %v2596_v31 = vpack.c.bf16 %v2528_v30, %v2525_v15  ;;  %v3581_v32 = vpop.f32.mrb[235].mxu0  ;;  %v2718_v15 = vld [vmem:[%s4859_s29 + $0x18] sm:$0xff] }
 0xddd   : > { %2611 = vmatpush1.bf16.msra.mxu1 %v2596_v31  ;;  %v2719_v31 = vld [vmem:[%s4859_s29 + $0x20] sm:$0xff] }
 0xdde   : > { %2612 = vmatprep.subr.bf16.mxu1 %v3885_v0 }
 0xde0   : > { %v2533_v33 = vpop.f32.mrb[236].mxu0 }
 0xde1   : > { %v3584_v34 = vpop.f32.mrb[237].mxu0 }
 0xde2   : > { %v2536_v45 = vpop.f32.mrb[238].mxu0 }
 0xde3   : > { %v2597_v1 = vpack.c.bf16 %v2536_v45, %v2533_v33  ;;  %v3585_v43 = vpop.f32.mrb[239].mxu0  ;;  %v2720_v45 = vld [vmem:[%s4859_s29 + $0x28] sm:$0xff] }
 0xde5   : > { %2613 = vmatpush1.bf16.msra.mxu1 %v2597_v1 }
 0xde6   : > { %2614 = vmatprep.subr.bf16.mxu1 %v3885_v0 }
 0xde8   : > { %v2541_v44 = vpop.f32.mrb[240].mxu0 }
 0xde9   : > { %v3588_v6 = vpop.f32.mrb[241].mxu0 }
 0xdea   : > { %v2544_v18 = vpop.f32.mrb[242].mxu0 }
 0xdeb   : > { %v2598_v28 = vpack.c.bf16 %v2544_v18, %v2541_v44  ;;  %v3589_v46 = vpop.f32.mrb[243].mxu0 }
 0xded   : > { %2615 = vmatpush1.bf16.msra.mxu1 %v2598_v28  ;;  %v2721_v28 = vld [vmem:[%s4859_s29 + $0x30] sm:$0xff] }
 0xdee   : > { %2616 = vmatprep.subr.bf16.mxu1 %v3885_v0 }
 0xdf0   : > { %v2549_v47 = vpop.f32.mrb[244].mxu0 }
 0xdf1   : > { %v3592_v48 = vpop.f32.mrb[245].mxu0 }
 0xdf2   : > { %v2552_v49 = vpop.f32.mrb[246].mxu0 }
 0xdf3   : > { %v2599_v50 = vpack.c.bf16 %v2552_v49, %v2549_v47  ;;  %v3593_v16 = vpop.f32.mrb[247].mxu0  ;;  %v2722_v49 = vld [vmem:[%s4859_s29 + $0x38] sm:$0xff] }
 0xdf5   : > { %2617 = vmatpush1.bf16.msra.mxu1 %v2599_v50 }
 0xdf6   : > { %2618 = vmatprep.subr.bf16.mxu1 %v3885_v0 }
 0xdf8   : > { %v2557_v27 = vpop.f32.mrb[248].mxu0 }
 0xdf9   : > { %v3596_v51 = vpop.f32.mrb[249].mxu0 }
 0xdfa   : > { %v2560_v52 = vpop.f32.mrb[250].mxu0 }
 0xdfb   : > { %v2600_v53 = vpack.c.bf16 %v2560_v52, %v2557_v27  ;;  %v3597_v54 = vpop.f32.mrb[251].mxu0 }
 0xdfd   : > { %2619 = vmatpush1.bf16.msra.mxu1 %v2600_v53  ;;  %v2723_v53 = vld [vmem:[%s4859_s29 + $0x40] sm:$0xff] }
 0xdfe   : > { %2620 = vmatprep.subr.bf16.mxu1 %v3885_v0 }
 0xe00   : > { %v2565_v55 = vpop.f32.mrb[252].mxu0 }
 0xe01   : > { %v3600_v56 = vpop.f32.mrb[253].mxu0 }
 0xe02   : > { %v2568_v57 = vpop.f32.mrb[254].mxu0 }
 0xe03   : > { %v2601_v58 = vpack.c.bf16 %v2568_v57, %v2565_v55  ;;  %v3601_v59 = vpop.f32.mrb[255].mxu0  ;;  %v2724_v57 = vld [vmem:[%s4859_s29 + $0x48] sm:$0xff] }
 0xe05   : > { %2621 = vmatpush1.bf16.msra.mxu1 %v2601_v58 }
 0xe06   : > { %2622 = vmatprep.subr.bf16.mxu1 %v3885_v0 }
 0xe08   : > { %v2573_v60 = vpop.f32.mrb[0].mxu0 }
 0xe09   : > { %v3604_v61 = vpop.f32.mrb[1].mxu0 }
 0xe0a   : > { %v2576_v62 = vpop.f32.mrb[2].mxu0 }
 0xe0b   : > { %v2602_v63 = vpack.c.bf16 %v2576_v62, %v2573_v60  ;;  %v3605_v2 = vpop.f32.mrb[3].mxu0 }
 0xe0d   : > { %2623 = vmatpush1.bf16.msra.mxu1 %v2602_v63  ;;  %v2725_v63 = vld [vmem:[%s4859_s29 + $0x50] sm:$0xff] }
 0xe0e   : > { %2624 = vmatprep.subr.bf16.mxu1 %v3885_v0 }
 0xe10   : > { %v2581_v3 = vpop.f32.mrb[4].mxu0 }
 0xe11   : > { %v3608_v4 = vpop.f32.mrb[5].mxu0 }
 0xe12   : > { %v2584_v5 = vpop.f32.mrb[6].mxu0 }
 0xe13   : > { %v2603_v7 = vpack.c.bf16 %v2584_v5, %v2581_v3  ;;  %v3609_v8 = vpop.f32.mrb[7].mxu0  ;;  %v2726_v5 = vld [vmem:[%s4859_s29 + $0x58] sm:$0xff] }
 0xe15   : > { %2625 = vmatpush1.bf16.msra.mxu1 %v2603_v7 }
 0xe16   : > { %2626 = vmatprep.subr.bf16.mxu1 %v3885_v0  ;;  %v4864_v0 = vld [vmem:[%s5031_s4 + $0x7] ss:$0 sm:$0xff] }
 0xe18   : > { %v2589_v9 = vpop.f32.mrb[8].mxu0 }
 0xe19   : > { %v3612_v10 = vpop.f32.mrb[9].mxu0 }
 0xe1a   : > { %v2592_v11 = vpop.f32.mrb[10].mxu0 }
 0xe1b   : > { %v2604_v12 = vpack.c.bf16 %v2592_v11, %v2589_v9  ;;  %v3613_v13 = vpop.f32.mrb[11].mxu0 }
 0xe1d   : > { %2627 = vmatpush1.bf16.msra.mxu1 %v2604_v12  ;;  %v2727_v12 = vld [vmem:[%s4859_s29 + $0x60] sm:$0xff] }
 0xe20   : > { %2643 = vmatmul.mubr.bf16.vlgmr.msra.gmra.mrb[236].mxu1 %v4697_v19 }
 0xe21   : > { %3222 = vmatprep.mubr.msk.bf16.mxu1 %vm485_vm0, %v4701_v35  ;;  %v2715_v35 = vld [vmem:[%s4859_s29] sm:$0xff] }
 0xe28   : > { %2651 = vmatmul.mubr.bf16.gmra.mrb[240].mxu1 %v4706_v36 }
 0xe29   : > { %3223 = vmatprep.mubr.msk.bf16.mxu1 %vm485_vm0, %v4710_v38 }
 0xe30   : > { %2659 = vmatmul.mubr.bf16.gmra.mrb[244].mxu1 %v4715_v39 }
 0xe31   : > { %3224 = vmatprep.mubr.msk.bf16.mxu1 %vm485_vm0, %v4719_v40 }
 0xe38   : > { %2667 = vmatmul.mubr.bf16.gmra.mrb[248].mxu1 %v4724_v37 }
 0xe39   : > { %3225 = vmatprep.mubr.msk.bf16.mxu1 %vm485_vm0, %v4728_v41 }
 0xe40   : > { %2675 = vmatmul.mubr.bf16.gmra.mrb[252].mxu1 %v4733_v42  ;;  %v2716_v42 = vld [vmem:[%s4859_s29 + $0x8] sm:$0xff] }
 0xe41   : > { %3226 = vmatprep.mubr.msk.bf16.mxu1 %vm485_vm0, %v4737_v17 }
 0xe48   : > { %2683 = vmatmul.mubr.bf16.gmra.mrb[0].mxu1 %v4742_v20 }
 0xe49   : > { %3227 = vmatprep.mubr.msk.bf16.mxu1 %vm485_vm0, %v4746_v21  ;;  %v2717_v21 = vld [vmem:[%s4859_s29 + $0x10] sm:$0xff] }
 0xe50   : > { %2691 = vmatmul.mubr.bf16.gmra.mrb[4].mxu1 %v4751_v22 }
 0xe51   : > { %3228 = vmatprep.mubr.msk.bf16.mxu1 %vm485_vm0, %v4755_v23 }
 0xe58   : > { %2699 = vmatmul.mubr.bf16.gmra.mrb[8].mxu1 %v4760_v24 }
 0xe59   : > { %3229 = vmatprep.mubr.msk.bf16.mxu1 %vm485_vm0, %v4764_v25 }
 0xe60   : > { %2707 = vmatmul.mubr.bf16.gmra.mrb[12].mxu1 %v4769_v26 }
 0xef3   : > { %v2644_v19 = vpop.f32.mrb[236].mxu1 }
 0xef4   : > { %v2645_v36 = vadd.f32 %v4864_v0, %v2644_v19  ;;  %v2646_v38 = vpop.f32.mrb[237].mxu1 }
 0xef5   : > { %v2647_v39 = vpop.f32.mrb[238].mxu1 }
 0xef6   : > { %v2648_v40 = vadd.f32 %v4864_v0, %v2647_v39  ;;  %v2649_v37 = vpop.f32.mrb[239].mxu1  ;;  %v2733_v41 = vmul.f32 %v2715_v35, %v2645_v36  ;;  %v2728_v36 = vld [vmem:[%s4859_s29 + $0x68] sm:$0xff] }
 0xef8   : > { %2772 = vperm.xlu0 %3686, %v2733_v41   ;;  %v2734_v17 = vmul.f32 %v2716_v42, %v2648_v40  ;;  %v2729_v42 = vld [vmem:[%s4859_s29 + $0x70] sm:$0xff] }
 0xefb   : > { %v2652_v20 = vpop.f32.mrb[240].mxu1 }
 0xefc   : > { %v2653_v22 = vadd.f32 %v4864_v0, %v2652_v20  ;;  %2777 = vperm.xlu0 %3686, %v2734_v17   ;;  %v2654_v23 = vpop.f32.mrb[241].mxu1 }
 0xefd   : > { %v2655_v24 = vpop.f32.mrb[242].mxu1 }
 0xefe   : > { %v2656_v25 = vadd.f32 %v4864_v0, %v2655_v24  ;;  %v2657_v26 = vpop.f32.mrb[243].mxu1  ;;  %v2735_v14 = vmul.f32 %v2717_v21, %v2653_v22  ;;  %v2730_v22 = vld [vmem:[%s4859_s29 + $0x78] sm:$0xff] }
 0xf00   : > { %2782 = vperm.xlu1 %3687, %v2735_v14   ;;  %v2736_v29 = vmul.f32 %v2718_v15, %v2656_v25  ;;  %v2731_v15 = vld [vmem:[%s4859_s29 + $0x80] sm:$0xff] }
 0xf03   : > { %v2660_v30 = vpop.f32.mrb[244].mxu1 }
 0xf04   : > { %v2661_v32 = vadd.f32 %v4864_v0, %v2660_v30  ;;  %v2662_v33 = vpop.f32.mrb[245].mxu1  ;;  %2787 = vperm.xlu1 %3687, %v2736_v29  }
 0xf05   : > { %v2663_v34 = vpop.f32.mrb[246].mxu1 }
 0xf06   : > { %v2737_v1 = vmul.f32 %v2719_v31, %v2661_v32  ;;  %v2664_v43 = vadd.f32 %v4864_v0, %v2663_v34  ;;  %v2665_v44 = vpop.f32.mrb[247].mxu1  ;;  %v2732_v32 = vld [vmem:[%s4859_s29 + $0x88] sm:$0xff] }
 0xf08   : > { %v2738_v6 = vmul.f32 %v2720_v45, %v2664_v43  ;;  %2792 = vperm.xlu0 %3686, %v2737_v1  }
 0xf0a   : > { %2797 = vperm.xlu1 %3687, %v2738_v6   ;;  %v2752_v6 = vld [vmem:[%s5032_s5 + $0x8] sm:$0xff] }
 0xf0b   : > { %v2668_v18 = vpop.f32.mrb[248].mxu1 }
 0xf0c   : > { %v2669_v46 = vadd.f32 %v4864_v0, %v2668_v18  ;;  %v2670_v47 = vpop.f32.mrb[249].mxu1 }
 0xf0d   : > { %v2671_v48 = vpop.f32.mrb[250].mxu1  ;;  %v2754_v47 = vld [vmem:[%s5032_s5 + $0x18] sm:$0xff] }
 0xf0e   : > { %v2739_v50 = vmul.f32 %v2721_v28, %v2669_v46  ;;  %v2672_v16 = vadd.f32 %v4864_v0, %v2671_v48  ;;  %v2673_v27 = vpop.f32.mrb[251].mxu1  ;;  %v2751_v28 = vld [vmem:[%s5032_s5] sm:$0xff]  ;;  %v2753_v46 = vld [vmem:[%s5032_s5 + $0x10] sm:$0xff] }
 0xf10   : > { %v2740_v51 = vmul.f32 %v2722_v49, %v2672_v16  ;;  %2802 = vperm.xlu0 %3686, %v2739_v50   ;;  %v2755_v16 = vld [vmem:[%s5032_s5 + $0x20] sm:$0xff] }
 0xf12   : > { %2807 = vperm.xlu1 %3687, %v2740_v51  }
 0xf13   : > { %v2676_v52 = vpop.f32.mrb[252].mxu1 }
 0xf14   : > { %v2677_v54 = vadd.f32 %v4864_v0, %v2676_v52  ;;  %v2678_v55 = vpop.f32.mrb[253].mxu1 }
 0xf15   : > { %v2679_v56 = vpop.f32.mrb[254].mxu1 }
 0xf16   : > { %v2741_v58 = vmul.f32 %v2723_v53, %v2677_v54  ;;  %v2680_v59 = vadd.f32 %v4864_v0, %v2679_v56  ;;  %v2681_v60 = vpop.f32.mrb[255].mxu1 }
 0xf18   : > { %v2742_v61 = vmul.f32 %v2724_v57, %v2680_v59  ;;  %2812 = vperm.xlu0 %3686, %v2741_v58   ;;  %v2756_v57 = vld [vmem:[%s5032_s5 + $0x28] sm:$0xff] }
 0xf1a   : > { %2817 = vperm.xlu1 %3687, %v2742_v61   ;;  %v2757_v61 = vld [vmem:[%s5032_s5 + $0x30] sm:$0xff] }
 0xf1b   : > { %v2684_v62 = vpop.f32.mrb[0].mxu1 }
 0xf1c   : > { %v2685_v2 = vadd.f32 %v4864_v0, %v2684_v62  ;;  %v2686_v3 = vpop.f32.mrb[1].mxu1 }
 0xf1d   : > { %v2687_v4 = vpop.f32.mrb[2].mxu1 }
 0xf1e   : > { %v2743_v7 = vmul.f32 %v2725_v63, %v2685_v2  ;;  %v2688_v8 = vadd.f32 %v4864_v0, %v2687_v4  ;;  %v2689_v9 = vpop.f32.mrb[3].mxu1 }
 0xf20   : > { %v2744_v10 = vmul.f32 %v2726_v5, %v2688_v8  ;;  %2822 = vperm.xlu0 %3686, %v2743_v7   ;;  %v2758_v7 = vld [vmem:[%s5032_s5 + $0x38] sm:$0xff] }
 0xf22   : > { %2827 = vperm.xlu1 %3687, %v2744_v10   ;;  %v2759_v10 = vld [vmem:[%s5032_s5 + $0x40] sm:$0xff] }
 0xf23   : > { %v2692_v11 = vpop.f32.mrb[4].mxu1 }
 0xf24   : > { %v2693_v13 = vadd.f32 %v4864_v0, %v2692_v11  ;;  %v2694_v19 = vpop.f32.mrb[5].mxu1 }
 0xf25   : > { %v2695_v35 = vpop.f32.mrb[6].mxu1 }
 0xf26   : > { %v2745_v38 = vmul.f32 %v2727_v12, %v2693_v13  ;;  %v2696_v39 = vadd.f32 %v4864_v0, %v2695_v35  ;;  %v2697_v40 = vpop.f32.mrb[7].mxu1 }
 0xf28   : > { %v2746_v37 = vmul.f32 %v2728_v36, %v2696_v39  ;;  %2832 = vperm.xlu0 %3686, %v2745_v38   ;;  %v2760_v38 = vld [vmem:[%s5032_s5 + $0x48] sm:$0xff] }
 0xf2a   : > { %2837 = vperm.xlu1 %3687, %v2746_v37   ;;  %v2761_v37 = vld [vmem:[%s5032_s5 + $0x50] sm:$0xff] }
 0xf2b   : > { %v2700_v41 = vpop.f32.mrb[8].mxu1 }
 0xf2c   : > { %v2701_v17 = vadd.f32 %v4864_v0, %v2700_v41  ;;  %v2702_v20 = vpop.f32.mrb[9].mxu1 }
 0xf2d   : > { %v2703_v21 = vpop.f32.mrb[10].mxu1 }
 0xf2e   : > { %v2747_v23 = vmul.f32 %v2729_v42, %v2701_v17  ;;  %v2704_v24 = vadd.f32 %v4864_v0, %v2703_v21  ;;  %v2705_v25 = vpop.f32.mrb[11].mxu1 }
 0xf30   : > { %v2748_v26 = vmul.f32 %v2730_v22, %v2704_v24  ;;  %2842 = vperm.xlu0 %3686, %v2747_v23   ;;  %v2762_v23 = vld [vmem:[%s5032_s5 + $0x58] sm:$0xff] }
 0xf32   : > { %2847 = vperm.xlu1 %3687, %v2748_v26   ;;  %v2763_v26 = vld [vmem:[%s5032_s5 + $0x60] sm:$0xff] }
 0xf33   : > { %v2708_v14 = vpop.f32.mrb[12].mxu1 }
 0xf34   : > { %v2709_v29 = vadd.f32 %v4864_v0, %v2708_v14  ;;  %v2710_v30 = vpop.f32.mrb[13].mxu1 }
 0xf35   : > { %v2711_v31 = vpop.f32.mrb[14].mxu1 }
 0xf36   : > { %v2749_v33 = vmul.f32 %v2731_v15, %v2709_v29  ;;  %v2712_v34 = vadd.f32 %v4864_v0, %v2711_v31  ;;  %v2713_v45 = vpop.f32.mrb[15].mxu1 }
 0xf38   : > { %v2750_v1 = vmul.f32 %v2732_v32, %v2712_v34  ;;  %2852 = vperm.xlu0 %3686, %v2749_v33   ;;  %v2764_v33 = vld [vmem:[%s5032_s5 + $0x68] sm:$0xff] }
 0xf3a   : > { %2857 = vperm.xlu1 %3687, %v2750_v1  }
 0xf77   : > { %v2773_v43 = vpop.permute.xlu0 %2772 }
 0xf78   : > { %v2860_v49 = vmul.f32 %v2773_v43, %v2751_v28 }
 0xf7a   : > { %v2879_v53 = vsel %vm2878_vm4, %v2860_v49, 0.0 }
 0xf7b   : > { %v2778_v18 = vpop.permute.xlu0 %2777 }
 0xf7c   : > { %v2861_v0 = vmul.f32 %v2778_v18, %v2752_v6  ;;  %v2765_v6 = vld [vmem:[%s5032_s5 + $0x70] sm:$0xff] }
 0xf7e   : > { %v2880_v51 = vsel %vm2878_vm4, %v2861_v0, 0.0 }
 0xf7f   : > { %v2783_v44 = vpop.permute.xlu1 %2782  ;;  %v2881_v56 = vadd.f32 %v2880_v51, %v2879_v53  ;;  %v2767_v51 = vld [vmem:[%s5032_s5 + $0x80] sm:$0xff] }
 0xf80   : > { %v2862_v50 = vmul.f32 %v2783_v44, %v2753_v46  ;;  %v2766_v46 = vld [vmem:[%s5032_s5 + $0x78] sm:$0xff] }
 0xf82   : > { %v2882_v54 = vsel %vm2878_vm4, %v2862_v50, 0.0 }
 0xf83   : > { %v2788_v48 = vpop.permute.xlu1 %2787  ;;  %v2883_v60 = vadd.f32 %v2882_v54, %v2881_v56  ;;  %v2768_v54 = vld [vmem:[%s5032_s5 + $0x88] sm:$0xff] }
 0xf84   : > { %v2863_v52 = vmul.f32 %v2788_v48, %v2754_v47 }
 0xf86   : > { %v2884_v59 = vsel %vm2878_vm4, %v2863_v52, 0.0 }
 0xf87   : > { %v2793_v27 = vpop.permute.xlu0 %2792  ;;  %v2885_v3 = vadd.f32 %v2884_v59, %v2883_v60 }
 0xf88   : > { %v2864_v55 = vmul.f32 %v2793_v27, %v2755_v16 }
 0xf89   : > { %v2798_v58 = vpop.permute.xlu1 %2797 }
 0xf8a   : > { %v2886_v63 = vsel %vm2878_vm4, %v2864_v55, 0.0  ;;  %v2865_v2 = vmul.f32 %v2798_v58, %v2756_v57 }
 0xf8b   : > { %v2887_v5 = vadd.f32 %v2886_v63, %v2885_v3 }
 0xf8c   : > { %v2888_v9 = vsel %vm2878_vm4, %v2865_v2, 0.0 }
 0xf8d   : > { %v2889_v19 = vadd.f32 %v2888_v9, %v2887_v5 }
 0xf8f   : > { %v2803_v62 = vpop.permute.xlu0 %2802 }
 0xf90   : > { %v2866_v4 = vmul.f32 %v2803_v62, %v2757_v61 }
 0xf91   : > { %v2808_v8 = vpop.permute.xlu1 %2807 }
 0xf92   : > { %v2890_v12 = vsel %vm2878_vm4, %v2866_v4, 0.0  ;;  %v2867_v13 = vmul.f32 %v2808_v8, %v2758_v7  ;;  %v2769_v7 = vld [vmem:[%s5032_s5 + $0x90] sm:$0x1] }
 0xf93   : > { %v2891_v36 = vadd.f32 %v2890_v12, %v2889_v19 }
 0xf94   : > { %v2892_v40 = vsel %vm2878_vm4, %v2867_v13, 0.0 }
 0xf95   : > { %v2893_v20 = vadd.f32 %v2892_v40, %v2891_v36 }
 0xf97   : > { %v2813_v11 = vpop.permute.xlu0 %2812 }
 0xf98   : > { %v2868_v35 = vmul.f32 %v2813_v11, %v2759_v10 }
 0xf99   : > { %v2818_v39 = vpop.permute.xlu1 %2817 }
 0xf9a   : > { %v2894_v42 = vsel %vm2878_vm4, %v2868_v35, 0.0  ;;  %v2869_v17 = vmul.f32 %v2818_v39, %v2760_v38 }
 0xf9b   : > { %v2895_v22 = vadd.f32 %v2894_v42, %v2893_v20 }
 0xf9c   : > { %v2896_v25 = vsel %vm2878_vm4, %v2869_v17, 0.0 }
 0xf9d   : > { %v2897_v29 = vadd.f32 %v2896_v25, %v2895_v22 }
 0xf9f   : > { %v2823_v41 = vpop.permute.xlu0 %2822 }
 0xfa0   : > { %v2870_v21 = vmul.f32 %v2823_v41, %v2761_v37 }
 0xfa1   : > { %v2828_v24 = vpop.permute.xlu1 %2827 }
 0xfa2   : > { %v2898_v14 = vsel %vm2878_vm4, %v2870_v21, 0.0  ;;  %v2871_v15 = vmul.f32 %v2828_v24, %v2762_v23 }
 0xfa3   : > { %v2899_v32 = vadd.f32 %v2898_v14, %v2897_v29 }
 0xfa4   : > { %v2900_v45 = vsel %vm2878_vm4, %v2871_v15, 0.0 }
 0xfa5   : > { %v2901_v44 = vadd.f32 %v2900_v45, %v2899_v32 }
 0xfa7   : > { %v2833_v30 = vpop.permute.xlu0 %2832 }
 0xfa8   : > { %v2872_v31 = vmul.f32 %v2833_v30, %v2763_v26 }
 0xfa9   : > { %v2838_v34 = vpop.permute.xlu1 %2837 }
 0xfaa   : > { %v2902_v1 = vsel %vm2878_vm4, %v2872_v31, 0.0  ;;  %v2873_v43 = vmul.f32 %v2838_v34, %v2764_v33 }
 0xfab   : > { %v2903_v18 = vadd.f32 %v2902_v1, %v2901_v44 }
 0xfac   : > { %v2904_v0 = vsel %vm2878_vm4, %v2873_v43, 0.0 }
 0xfad   : > { %v2905_v16 = vadd.f32 %v2904_v0, %v2903_v18 }
 0xfaf   : > { %v2843_v28 = vpop.permute.xlu0 %2842 }
 0xfb0   : > { %v2874_v47 = vmul.f32 %v2843_v28, %v2765_v6 }
 0xfb1   : > { %v2848_v48 = vpop.permute.xlu1 %2847 }
 0xfb2   : > { %v2906_v49 = vsel %vm2878_vm4, %v2874_v47, 0.0  ;;  %v2875_v50 = vmul.f32 %v2848_v48, %v2766_v46 }
 0xfb3   : > { %v2907_v27 = vadd.f32 %v2906_v49, %v2905_v16 }
 0xfb4   : > { %v2908_v52 = vsel %vm2878_vm4, %v2875_v50, 0.0 }
 0xfb5   : > { %v2909_v56 = vadd.f32 %v2908_v52, %v2907_v27 }
 0xfb7   : > { %v2853_v53 = vpop.permute.xlu0 %2852 }
 0xfb8   : > { %v2876_v55 = vmul.f32 %v2853_v53, %v2767_v51 }
 0xfb9   : > { %v2858_v57 = vpop.permute.xlu1 %2857 }
 0xfba   : > { %v2910_v58 = vsel %vm2878_vm4, %v2876_v55, 0.0  ;;  %v2877_v59 = vmul.f32 %v2858_v57, %v2768_v54 }
 0xfbb   : > { %v2911_v60 = vadd.f32 %v2910_v58, %v2909_v56 }
 0xfbc   : > { %v2912_v61 = vsel %vm2878_vm4, %v2877_v59, 0.0 }
 0xfbd   : > { %v2913_v62 = vadd.f32 %v2912_v61, %v2911_v60 }
 0xfbf   : > { %v2914_v63 = vrot.slane %v2913_v62, 4 }
 0xfc1   : > { %v2915_v2 = vadd.f32 %v2914_v63, %v2913_v62 }
 0xfc3   : > { %v2916_v3 = vrot.slane %v2915_v2, 2 }
 0xfc5   : > { %v2917_v4 = vadd.f32 %v2916_v3, %v2915_v2 }
 0xfc7   : > { %v2918_v5 = vrot.slane %v2917_v4, 1 }
 0xfc9   : > { %v2919_v8 = vadd.f32 %v2918_v5, %v2917_v4 }
 0xfcb   : > { %v2920_v9 = vadd.f32 %v2919_v8, %v2769_v7 }
 0xfcd   : > { %v2922_v10 = vsel %vm2921_vm5, %v2920_v9, -inf }
 0xfce   : > { %2923 = vmax.xlane.f32.xlu0 %v2922_v10 }
0x105b   : > { %v2924_v11 = vpop.xlane.xlu0 %2923 }
0x105c   : > { %v2925_v12 = vsub.f32 %v2920_v9, %v2924_v11 }
0x105e   : > { %v2926_v13 = vmul.f32 1.442695, %v2925_v12 }
0x1060   : > { %3746 = vpow2.f32 %v2926_v13 }
0x106a   : > { %v3747_v19 = vpop.eup %3746 }
0x106b   : > { %v2928_v35 = vsel %vm2921_vm5, %v3747_v19, 0.0 }
0x106c   : > { %2929 = vadd.xlane.f32.xlu1 %v2928_v35 }
0x10f9   : > { %v2930_v36 = vpop.xlane.xlu1 %2929 }
0x10fa   : > { %3748 = vrcp.f32 %v2930_v36 }
0x1104   : > { %v3749_v38 = vpop.eup %3748 }
0x1105   : > { %v2932_v39 = vmul.f32 %v3749_v38, %v3747_v19 }
0x1107   : > { %2933 = vst.msk [vmem:[%s290_s26] sm:$0x1] %vm2921_vm5, %v2932_v39 }
0x1108   : > { %3827 = shalt.err (!%p3824_p8)
}
0x1109   : > { %s3828_s15 = scalar_lea.hbm %s4984_s9, 16  ;;  %s3832_s18 = scalar_lea.hbm %s5033_s6, 32 }
0x110a   : > { %p3829_p11 = scmp.ne.s32.totalorder %s4984_s9, %s3828_s15  ;;  %p3833_p0 = scmp.lt.u32.totalorder %s4984_s9, %s5033_s6 }
0x110b   : > { %p3834_p5 = scmp.lt.u32.totalorder %s3832_s18, %s3828_s15  ;;  %p3836_p9 = scmp.lt.u32.totalorder %s3828_s15, %s4984_s9 }
0x110c   : > { %p3830_p13 = pnand %p3829_p11, %p5044_p10 }
0x110d   : > { %p3835_p6 = por %p3834_p5, %p3833_p0 }
0x110e   : > { %p3831_p1 = pneg %p3830_p13 }
0x110f   : > { %p3837_p12 = por %p3836_p9, %p3835_p6 }
0x1111   : > { %p3838_p2 = pnand %p3837_p12, %p3831_p1 }
0x1113   : > { %3841 = shalt.err (!%p3838_p2)
}
0x1114   : > { %3635 = dma.vmem_to_hbm [thread:$0]  (%p5044_p10), %s4986_s28, 16, %s4984_s9, %s2935_s13  }
0x1115 PF: > { %p3647_p3 = scmp.ge.s32.totalorder %s3880_s24, 2  ;;  %s2959_s26 = sand.u32 1, %s3868_s21  }
0x1116   : > { %p5045_p4 = scmp.ne.s32.totalorder %s5038_s8, 0  ;;  %s2960_s29 = scalar_lea.sflag [#allocation4], %s2959_s26 }
0x1118   : > { %p3642_p7 = pnand %p3647_p3, %p5045_p4 }
0x111a   : > { %3863 = dma.done.wait (!%p3642_p7), %s2960_s29, 16  }
0x111b   : > { %3865 = vsyncadd (!%p3642_p7), %s2960_s29, 4294967280  ;;  %p17_p8 = scmp.ge.s32.totalorder %s3949_s27, 4   ;;  %s5046_s21 = smov %s3872_s22 }
0x111c   : > { %s5047_s22 = smov %s3876_s23  ;;  %s5048_s23 = smov %s3960_s30 }
0x111d   : > { %s5049_s24 = smov %s3949_s27  ;;  %19 = sbr.rel (!%p17_p8) target bundleno = 4 (0x4), region = 90 }
0x1124   :  { %2964 = vsyncpa [#allocation3], 1 }
0x1125   :  { %2966 = vsyncpa [#allocation3 + $0x1], 1 }
0x1126   :  { %2967 = vsyncpa [#allocation4], 1 }
0x1127   :  { %2969 = vsyncpa [#allocation4 + $0x1], 1 }

</bundles_post_ra>
